<compile_context>
chip_gen: v6e
topology: v6e:2x2x1
jax: 0.10.0
libtpu: 0.0.40
codegen_flags: <defaults>
</compile_context>

<pallas_src>
import functools

import jax
import jax.numpy as jnp
from jax.experimental import pallas as pl
from jax.experimental.pallas import tpu as pltpu


def _ceil_to(x, m):
    return ((x + m - 1) // m) * m


def _vmem_limit_bytes():
    """Generation-aware scoped-VMEM limit (v5e/v6e 128 MiB phys, v7x 64 MiB)."""
    try:
        info = pltpu.get_tpu_info()
        cap = int(getattr(info, "vmem_capacity_bytes", 0)) or 64 * 1024 * 1024
    except Exception:
        cap = 64 * 1024 * 1024
    return int(min(cap * 3 // 4, 96 * 1024 * 1024))


# ----------------------------------------------------------------------------
# Implicit-GEMM conv kernel (4x4, stride 2, pad 1), via 2x2 space-to-depth.
# One grid step computes one output row (Wo, tn) for one sample:
#   out[ow, :] = sum_{a,b in {0,1}} x_s2d[oh+a, ow+b, :] @ W'[a*2+b]
# x tap a is delivered by its own BlockSpec; the b-shift is a static slice.
# ----------------------------------------------------------------------------
def _conv_kernel(*refs, wo, has_bias):
    if has_bias:
        x0_ref, x1_ref, w_ref, b_ref, o_ref = refs
    else:
        x0_ref, x1_ref, w_ref, o_ref = refs
        b_ref = None

    tn = o_ref.shape[-1]
    acc = None
    for a, xr in enumerate((x0_ref, x1_ref)):
        # block (1, 1, Wq, K4) -> (Wq, K4)
        x = xr[...].reshape(xr.shape[2], xr.shape[3])
        for b in range(2):
            part = jnp.dot(x[b:b + wo, :], w_ref[2 * a + b],
                           preferred_element_type=jnp.float32)
            acc = part if acc is None else acc + part
    if b_ref is not None:
        acc = acc + b_ref[...]                     # folded-BN shift, (1, tn)
    y = jnp.maximum(acc, 0.2 * acc)                # LeakyReLU(0.2), one VALU op
    o_ref[...] = y.reshape(1, 1, wo, tn).astype(o_ref.dtype)


def conv4x4_s2d(x_s2d, wprime, shift, wo, out_dtype=jnp.bfloat16):
    """x_s2d: (N, Ho+1, Wo+1, K4) bf16 (space-to-depth of the padded input).
    wprime: (4, K4, Coutp) bf16, BN scale folded in, Coutp % 128 == 0.
    shift:  (Coutp,) f32 folded-BN shift, or None.
    Returns (N, Ho, Wo, Coutp) in out_dtype."""
    n, hq, wq, k4 = x_s2d.shape
    ho = hq - 1
    assert wq == wo + 1
    _, k4w, coutp = wprime.shape
    assert k4w == k4 and coutp % 128 == 0

    budget = _vmem_limit_bytes()

    def _need(t):
        return (2 * 4 * k4 * t * 2          # resident weight (2-buffered)
                + 2 * 2 * wq * k4 * 2       # two row-tap input blocks
                + 2 * wo * t * 2            # output block
                + 2 * t * 4)                # bias

    tn = coutp                               # full Cout per step when it fits
    while tn > 128 and _need(tn) > budget:
        nt = tn // 2
        if nt % 128 != 0 or coutp % nt != 0:
            nt = 128
        tn = nt

    has_bias = shift is not None
    kernel = functools.partial(_conv_kernel, wo=wo, has_bias=has_bias)

    in_specs = [
        pl.BlockSpec((1, 1, wq, k4), lambda j, nb, i: (nb, i, 0, 0)),      # row oh
        pl.BlockSpec((1, 1, wq, k4), lambda j, nb, i: (nb, i + 1, 0, 0)),  # row oh+1
        pl.BlockSpec((4, k4, tn), lambda j, nb, i: (0, 0, j)),             # weight
    ]
    args = [x_s2d, x_s2d, wprime]
    if has_bias:
        in_specs.append(pl.BlockSpec((1, tn), lambda j, nb, i: (0, j)))
        args.append(shift.reshape(1, coutp).astype(jnp.float32))

    return pl.pallas_call(
        kernel,
        out_shape=jax.ShapeDtypeStruct((n, ho, wo, coutp), out_dtype),
        grid_spec=pltpu.PrefetchScalarGridSpec(
            num_scalar_prefetch=0,
            grid=(coutp // tn, n, ho),
            in_specs=in_specs,
            out_specs=pl.BlockSpec((1, 1, wo, tn),
                                   lambda j, nb, i: (nb, i, 0, j)),
        ),
        compiler_params=pltpu.CompilerParams(
            dimension_semantics=("arbitrary", "parallel", "parallel"),
            vmem_limit_bytes=budget,
        ),
    )(*args)


# ----------------------------------------------------------------------------
# Final layer: 4x4 valid conv (Cout=1) over a 4x4 map == per-sample dot,
# fused with the sigmoid.  No padded 128-wide GEMM, no zero weight DMA.
# ----------------------------------------------------------------------------
def _final_kernel(x_ref, w_ref, o_ref):
    y = jnp.sum(x_ref[...].astype(jnp.float32) * w_ref[...],
                axis=-1, keepdims=True)
    z = jnp.exp(-jnp.abs(y))                        # overflow-free sigmoid
    o_ref[...] = jnp.where(y >= 0.0, 1.0 / (1.0 + z), z / (1.0 + z))


def final_logit_sigmoid(act, w_col):
    """act: (N, 4, 4, Cp) bf16; w_col: (16*Cp,) f32.  Returns (N, 1) f32."""
    n = act.shape[0]
    kf = act.shape[1] * act.shape[2] * act.shape[3]
    x = act.reshape(n, kf)
    np_ = _ceil_to(max(n, 8), 8)
    if np_ != n:
        x = jnp.pad(x, ((0, np_ - n), (0, 0)))
    tm = min(np_, 64)
    while np_ % tm:
        tm //= 2
    out = pl.pallas_call(
        _final_kernel,
        out_shape=jax.ShapeDtypeStruct((np_, 1), jnp.float32),
        grid_spec=pltpu.PrefetchScalarGridSpec(
            num_scalar_prefetch=0,
            grid=(np_ // tm,),
            in_specs=[pl.BlockSpec((tm, kf), lambda i: (i, 0)),
                      pl.BlockSpec((1, kf), lambda i: (0, 0))],
            out_specs=pl.BlockSpec((tm, 1), lambda i: (i, 0)),
        ),
        compiler_params=pltpu.CompilerParams(
            dimension_semantics=("parallel",),
            vmem_limit_bytes=_vmem_limit_bytes(),
        ),
    )(x, w_col.reshape(1, kf).astype(jnp.float32))
    return out[:n]


# ----------------------------------------------------------------------------
# Plain-JAX layout glue: pad-1 + 2x2 space-to-depth (NHWC), ~1x bytes.
# Channel order of the result is (row-parity p, col-parity q, c).
# ----------------------------------------------------------------------------
def space_to_depth_pad(x):
    n, h, w, c = x.shape
    xp = jnp.pad(x, ((0, 0), (1, 1), (1, 1), (0, 0)))
    hq, wq = (h + 2) // 2, (w + 2) // 2
    xp = xp.reshape(n, hq, 2, wq, 2, c)
    xp = jnp.transpose(xp, (0, 1, 3, 2, 4, 5))
    return xp.reshape(n, hq, wq, 4 * c)


# ----------------------------------------------------------------------------
# Deterministic parameter init (DCGAN-style N(0, 0.02) conv weights, BatchNorm
# in eval mode with deterministic running stats).
# ----------------------------------------------------------------------------
def init_params(key, nc, ndf):
    ks = jax.random.split(key, 8)

    def conv_w(k, cin, cout):
        return 0.02 * jax.random.normal(k, (4, 4, cin, cout), jnp.float32)

    def bn_stats(k, c):
        k1, k2, k3, k4 = jax.random.split(k, 4)
        gamma = 1.0 + 0.1 * jax.random.normal(k1, (c,), jnp.float32)
        beta = 0.1 * jax.random.normal(k2, (c,), jnp.float32)
        mean = 0.1 * jax.random.normal(k3, (c,), jnp.float32)
        var = jax.random.uniform(k4, (c,), jnp.float32, minval=0.5, maxval=1.5)
        return gamma, beta, mean, var

    return {
        "w1": conv_w(ks[0], nc, ndf),
        "w2": conv_w(ks[1], ndf, ndf * 2), "bn2": bn_stats(ks[2], ndf * 2),
        "w3": conv_w(ks[3], ndf * 2, ndf * 4), "bn3": bn_stats(ks[4], ndf * 4),
        "w4": conv_w(ks[5], ndf * 4, ndf * 8), "bn4": bn_stats(ks[6], ndf * 8),
        "w5": conv_w(ks[7], ndf * 8, 1),
    }


def _fold_bn(bn, eps=1e-5):
    gamma, beta, mean, var = bn
    scale = gamma / jnp.sqrt(var + eps)
    shift = beta - mean * scale
    return scale, shift


def _prep_conv_weight(w, scale, cin_p, cout_p):
    """(4,4,cin,cout) f32 -> (4, 4*cin_p, cout_p) bf16 matching the s2d layout:
    tap index a*2+b holds W[2a+p, 2b+q] at k = (p*2+q)*cin_p + c."""
    _, _, cin, cout = w.shape
    if scale is not None:
        w = w * scale[None, None, None, :]          # fold BN scale into columns
    w = jnp.pad(w, ((0, 0), (0, 0), (0, cin_p - cin), (0, cout_p - cout)))
    w = w.reshape(2, 2, 2, 2, cin_p, cout_p)        # (a, p, b, q, c, co)
    w = jnp.transpose(w, (0, 2, 1, 3, 4, 5))        # (a, b, p, q, c, co)
    return w.reshape(4, 4 * cin_p, cout_p).astype(jnp.bfloat16)


def prepare_params(params, nc, ndf):
    cin0_p = 4                                       # image channels 3 -> 4
    couts = [ndf, ndf * 2, ndf * 4, ndf * 8]
    couts_p = [_ceil_to(c, 128) for c in couts]
    cins_p = [cin0_p] + couts_p[:3]

    folded = [None, _fold_bn(params["bn2"]), _fold_bn(params["bn3"]),
              _fold_bn(params["bn4"])]
    ws = [params["w1"], params["w2"], params["w3"], params["w4"]]

    conv_layers = []
    for i in range(4):
        if folded[i] is None:
            scale, shift = None, None                # layer 1: no BN, no bias
        else:
            scale, shift = folded[i]
            shift = jnp.pad(shift, (0, couts_p[i] - couts[i])).astype(jnp.float32)
        conv_layers.append((_prep_conv_weight(ws[i], scale, cins_p[i], couts_p[i]),
                            shift))

    # Final 4x4 / stride-1 / valid conv (Cout=1): a single dot per sample.
    cin5, cin5_p = ndf * 8, couts_p[3]
    w5 = jnp.pad(params["w5"], ((0, 0), (0, 0), (0, cin5_p - cin5), (0, 0)))
    w5 = w5.reshape(4 * 4 * cin5_p).astype(jnp.float32)   # (h, w, c) flat order
    return conv_layers, w5


# ----------------------------------------------------------------------------
# Discriminator forward (matches the nn.Sequential in the PyTorch module).
# ----------------------------------------------------------------------------
@jax.jit
def discriminator_forward(x_nchw, conv_layers, w5):
    n, c = x_nchw.shape[0], x_nchw.shape[1]
    x = jnp.transpose(x_nchw, (0, 2, 3, 1)).astype(jnp.bfloat16)   # NHWC, bf16
    cin0_p = conv_layers[0][0].shape[1] // 4
    if cin0_p != c:
        x = jnp.pad(x, ((0, 0), (0, 0), (0, 0), (0, cin0_p - c)))

    for wq, shift in conv_layers:                    # 4x Conv+(BN)+LeakyReLU
        xs = space_to_depth_pad(x)                   # layout-only, ~1x bytes
        wo = x.shape[2] // 2
        x = conv4x4_s2d(xs, wq, shift, wo)

    probs = final_logit_sigmoid(x, w5)               # (N, 1), sigmoid fused
    return probs.reshape(n, 1, 1, 1)                 # PyTorch-shaped (N,1,1,1)


if __name__ == "__main__":
    # The DCGAN discriminator needs a 64x64 input so the final 4x4 valid conv
    # yields a 1x1 output; ndf kept small for a quick run.
    nc_, ndf_, batch, spatial = 3, 8, 2, 64

    key = jax.random.PRNGKey(0)
    k_x, k_p = jax.random.split(key)
    x = jax.random.normal(k_x, (batch, nc_, spatial, spatial), jnp.float32)
    params = init_params(k_p, nc_, ndf_)
    conv_layers, w5 = prepare_params(params, nc_, ndf_)

    out = discriminator_forward(x, conv_layers, w5)
    out = jax.block_until_ready(out)
    assert out.shape == (batch, 1, 1, 1), out.shape
    assert bool(jnp.all((out >= 0.0) & (out <= 1.0)))
    print("KERNEL_OK")
</pallas_src>

<mosaic_0001>
module attributes {stable_mosaic.version = 11 : i64} {
  func.func @_conv_kernel(%arg0: i32, %arg1: i32, %arg2: i32, %arg3: memref<1x1x33x16xbf16, #tpu.memory_space<vmem>>, %arg4: memref<1x1x33x16xbf16, #tpu.memory_space<vmem>>, %arg5: memref<4x16x128xbf16, #tpu.memory_space<vmem>>, %arg6: memref<1x1x32x128xbf16, #tpu.memory_space<vmem>>) attributes {dimension_semantics = [#tpu.dimension_semantics<arbitrary>, #tpu.dimension_semantics<parallel>, #tpu.dimension_semantics<parallel>], iteration_bounds = array<i64: 1, 2, 32>, scalar_prefetch = 0 : i64, scratch_operands = 0 : i64, tpu.core_type = #tpu.core_type<tc>, window_params = [{transform_indices = @transform_0, window_bounds = array<i64: 1, 1, 33, 16>}, {transform_indices = @transform_1, window_bounds = array<i64: 1, 1, 33, 16>}, {transform_indices = @transform_2, window_bounds = array<i64: 4, 16, 128>}, {transform_indices = @transform_3, window_bounds = array<i64: 1, 1, 32, 128>}]} {
    %c0 = arith.constant 0 : index
    %c0_0 = arith.constant 0 : index
    %c0_1 = arith.constant 0 : index
    %c0_2 = arith.constant 0 : index
    %0 = vector.load %arg3[%c0, %c0_0, %c0_1, %c0_2] : memref<1x1x33x16xbf16, #tpu.memory_space<vmem>>, vector<1x1x33x16xbf16>
    %1 = vector.shape_cast %0 : vector<1x1x33x16xbf16> to vector<33x16xbf16>
    %2 = vector.extract_strided_slice %1 {offsets = [0, 0], sizes = [32, 16], strides = [1, 1]} : vector<33x16xbf16> to vector<32x16xbf16>
    %c0_3 = arith.constant 0 : index
    %c0_4 = arith.constant 0 : index
    %c0_5 = arith.constant 0 : index
    %3 = vector.load %arg5[%c0_3, %c0_4, %c0_5] : memref<4x16x128xbf16, #tpu.memory_space<vmem>>, vector<1x16x128xbf16>
    %4 = vector.shape_cast %3 : vector<1x16x128xbf16> to vector<16x128xbf16>
    %cst = arith.constant dense<0.000000e+00> : vector<32x128xf32>
    %5 = tpu.matmul %2, %4, %cst {dimension_numbers = #tpu.dot_dimension_numbers<[1], [0], [0], [1], [0, 0, 1, 1], [], []>} : vector<32x16xbf16>, vector<16x128xbf16>, vector<32x128xf32> -> vector<32x128xf32>
    %6 = vector.extract_strided_slice %1 {offsets = [1, 0], sizes = [32, 16], strides = [1, 1]} : vector<33x16xbf16> to vector<32x16xbf16>
    %c1 = arith.constant 1 : index
    %c0_6 = arith.constant 0 : index
    %c0_7 = arith.constant 0 : index
    %7 = vector.load %arg5[%c1, %c0_6, %c0_7] : memref<4x16x128xbf16, #tpu.memory_space<vmem>>, vector<1x16x128xbf16>
    %8 = vector.shape_cast %7 : vector<1x16x128xbf16> to vector<16x128xbf16>
    %cst_8 = arith.constant dense<0.000000e+00> : vector<32x128xf32>
    %9 = tpu.matmul %6, %8, %cst_8 {dimension_numbers = #tpu.dot_dimension_numbers<[1], [0], [0], [1], [0, 0, 1, 1], [], []>} : vector<32x16xbf16>, vector<16x128xbf16>, vector<32x128xf32> -> vector<32x128xf32>
    %10 = arith.addf %5, %9 : vector<32x128xf32>
    %c0_9 = arith.constant 0 : index
    %c0_10 = arith.constant 0 : index
    %c0_11 = arith.constant 0 : index
    %c0_12 = arith.constant 0 : index
    %11 = vector.load %arg4[%c0_9, %c0_10, %c0_11, %c0_12] : memref<1x1x33x16xbf16, #tpu.memory_space<vmem>>, vector<1x1x33x16xbf16>
    %12 = vector.shape_cast %11 : vector<1x1x33x16xbf16> to vector<33x16xbf16>
    %13 = vector.extract_strided_slice %12 {offsets = [0, 0], sizes = [32, 16], strides = [1, 1]} : vector<33x16xbf16> to vector<32x16xbf16>
    %c2 = arith.constant 2 : index
    %c0_13 = arith.constant 0 : index
    %c0_14 = arith.constant 0 : index
    %14 = vector.load %arg5[%c2, %c0_13, %c0_14] : memref<4x16x128xbf16, #tpu.memory_space<vmem>>, vector<1x16x128xbf16>
    %15 = vector.shape_cast %14 : vector<1x16x128xbf16> to vector<16x128xbf16>
    %cst_15 = arith.constant dense<0.000000e+00> : vector<32x128xf32>
    %16 = tpu.matmul %13, %15, %cst_15 {dimension_numbers = #tpu.dot_dimension_numbers<[1], [0], [0], [1], [0, 0, 1, 1], [], []>} : vector<32x16xbf16>, vector<16x128xbf16>, vector<32x128xf32> -> vector<32x128xf32>
    %17 = arith.addf %10, %16 : vector<32x128xf32>
    %18 = vector.extract_strided_slice %12 {offsets = [1, 0], sizes = [32, 16], strides = [1, 1]} : vector<33x16xbf16> to vector<32x16xbf16>
    %c3 = arith.constant 3 : index
    %c0_16 = arith.constant 0 : index
    %c0_17 = arith.constant 0 : index
    %19 = vector.load %arg5[%c3, %c0_16, %c0_17] : memref<4x16x128xbf16, #tpu.memory_space<vmem>>, vector<1x16x128xbf16>
    %20 = vector.shape_cast %19 : vector<1x16x128xbf16> to vector<16x128xbf16>
    %cst_18 = arith.constant dense<0.000000e+00> : vector<32x128xf32>
    %21 = tpu.matmul %18, %20, %cst_18 {dimension_numbers = #tpu.dot_dimension_numbers<[1], [0], [0], [1], [0, 0, 1, 1], [], []>} : vector<32x16xbf16>, vector<16x128xbf16>, vector<32x128xf32> -> vector<32x128xf32>
    %22 = arith.addf %17, %21 : vector<32x128xf32>
    %cst_19 = arith.constant 2.000000e-01 : f32
    %23 = vector.broadcast %cst_19 : f32 to vector<32x128xf32>
    %24 = arith.mulf %23, %22 : vector<32x128xf32>
    %25 = arith.maximumf %22, %24 : vector<32x128xf32>
    %26 = vector.shape_cast %25 : vector<32x128xf32> to vector<1x1x32x128xf32>
    %27 = arith.truncf %26 : vector<1x1x32x128xf32> to vector<1x1x32x128xbf16>
    %c0_20 = arith.constant 0 : index
    %c0_21 = arith.constant 0 : index
    %c0_22 = arith.constant 0 : index
    %c0_23 = arith.constant 0 : index
    %28 = vector.load %arg6[%c0_20, %c0_21, %c0_22, %c0_23] : memref<1x1x32x128xbf16, #tpu.memory_space<vmem>>, vector<1x1x32x128xbf16>
    tpu.vector_store %arg6[%c0_20, %c0_21, %c0_22, %c0_23], %27 {strides = array<i32>} : memref<1x1x32x128xbf16, #tpu.memory_space<vmem>>, vector<1x1x32x128xbf16>,
    return
  }
  func.func @transform_0(%arg0: i32, %arg1: i32, %arg2: i32) -> (i32, i32, i32, i32) {
    %c0_i32 = arith.constant 0 : i32
    %c0_i32_0 = arith.constant 0 : i32
    %c0_i32_1 = arith.constant 0 : i32
    return %arg1, %arg2, %c0_i32, %c0_i32_0 : i32, i32, i32, i32
  }
  func.func @transform_1(%arg0: i32, %arg1: i32, %arg2: i32) -> (i32, i32, i32, i32) {
    %c1_i32 = arith.constant 1 : i32
    %0 = arith.addi %arg2, %c1_i32 : i32
    %c0_i32 = arith.constant 0 : i32
    %c0_i32_0 = arith.constant 0 : i32
    %c0_i32_1 = arith.constant 0 : i32
    return %arg1, %0, %c0_i32, %c0_i32_0 : i32, i32, i32, i32
  }
  func.func @transform_2(%arg0: i32, %arg1: i32, %arg2: i32) -> (i32, i32, i32) {
    %c0_i32 = arith.constant 0 : i32
    %c0_i32_0 = arith.constant 0 : i32
    %c0_i32_1 = arith.constant 0 : i32
    return %c0_i32, %c0_i32_0, %arg0 : i32, i32, i32
  }
  func.func @transform_3(%arg0: i32, %arg1: i32, %arg2: i32) -> (i32, i32, i32, i32) {
    %c0_i32 = arith.constant 0 : i32
    %c0_i32_0 = arith.constant 0 : i32
    return %arg1, %arg2, %c0_i32, %arg0 : i32, i32, i32, i32
  }
}

module attributes {stable_mosaic.version = 11 : i64} {
  func.func @_conv_kernel(%arg0: i32, %arg1: i32, %arg2: i32, %arg3: memref<1x1x17x512xbf16, #tpu.memory_space<vmem>>, %arg4: memref<1x1x17x512xbf16, #tpu.memory_space<vmem>>, %arg5: memref<4x512x128xbf16, #tpu.memory_space<vmem>>, %arg6: memref<1x128xf32, #tpu.memory_space<vmem>>, %arg7: memref<1x1x16x128xbf16, #tpu.memory_space<vmem>>) attributes {dimension_semantics = [#tpu.dimension_semantics<arbitrary>, #tpu.dimension_semantics<parallel>, #tpu.dimension_semantics<parallel>], iteration_bounds = array<i64: 1, 2, 16>, scalar_prefetch = 0 : i64, scratch_operands = 0 : i64, tpu.core_type = #tpu.core_type<tc>, window_params = [{transform_indices = @transform_0, window_bounds = array<i64: 1, 1, 17, 512>}, {transform_indices = @transform_1, window_bounds = array<i64: 1, 1, 17, 512>}, {transform_indices = @transform_2, window_bounds = array<i64: 4, 512, 128>}, {transform_indices = @transform_3, window_bounds = array<i64: 1, 128>}, {transform_indices = @transform_4, window_bounds = array<i64: 1, 1, 16, 128>}]} {
    %c0 = arith.constant 0 : index
    %c0_0 = arith.constant 0 : index
    %c0_1 = arith.constant 0 : index
    %c0_2 = arith.constant 0 : index
    %0 = vector.load %arg3[%c0, %c0_0, %c0_1, %c0_2] : memref<1x1x17x512xbf16, #tpu.memory_space<vmem>>, vector<1x1x17x512xbf16>
    %1 = vector.shape_cast %0 : vector<1x1x17x512xbf16> to vector<17x512xbf16>
    %2 = vector.extract_strided_slice %1 {offsets = [0, 0], sizes = [16, 512], strides = [1, 1]} : vector<17x512xbf16> to vector<16x512xbf16>
    %c0_3 = arith.constant 0 : index
    %c0_4 = arith.constant 0 : index
    %c0_5 = arith.constant 0 : index
    %3 = vector.load %arg5[%c0_3, %c0_4, %c0_5] : memref<4x512x128xbf16, #tpu.memory_space<vmem>>, vector<1x512x128xbf16>
    %4 = vector.shape_cast %3 : vector<1x512x128xbf16> to vector<512x128xbf16>
    %cst = arith.constant dense<0.000000e+00> : vector<16x128xf32>
    %5 = tpu.matmul %2, %4, %cst {dimension_numbers = #tpu.dot_dimension_numbers<[1], [0], [0], [1], [0, 0, 1, 1], [], []>} : vector<16x512xbf16>, vector<512x128xbf16>, vector<16x128xf32> -> vector<16x128xf32>
    %6 = vector.extract_strided_slice %1 {offsets = [1, 0], sizes = [16, 512], strides = [1, 1]} : vector<17x512xbf16> to vector<16x512xbf16>
    %c1 = arith.constant 1 : index
    %c0_6 = arith.constant 0 : index
    %c0_7 = arith.constant 0 : index
    %7 = vector.load %arg5[%c1, %c0_6, %c0_7] : memref<4x512x128xbf16, #tpu.memory_space<vmem>>, vector<1x512x128xbf16>
    %8 = vector.shape_cast %7 : vector<1x512x128xbf16> to vector<512x128xbf16>
    %cst_8 = arith.constant dense<0.000000e+00> : vector<16x128xf32>
    %9 = tpu.matmul %6, %8, %cst_8 {dimension_numbers = #tpu.dot_dimension_numbers<[1], [0], [0], [1], [0, 0, 1, 1], [], []>} : vector<16x512xbf16>, vector<512x128xbf16>, vector<16x128xf32> -> vector<16x128xf32>
    %10 = arith.addf %5, %9 : vector<16x128xf32>
    %c0_9 = arith.constant 0 : index
    %c0_10 = arith.constant 0 : index
    %c0_11 = arith.constant 0 : index
    %c0_12 = arith.constant 0 : index
    %11 = vector.load %arg4[%c0_9, %c0_10, %c0_11, %c0_12] : memref<1x1x17x512xbf16, #tpu.memory_space<vmem>>, vector<1x1x17x512xbf16>
    %12 = vector.shape_cast %11 : vector<1x1x17x512xbf16> to vector<17x512xbf16>
    %13 = vector.extract_strided_slice %12 {offsets = [0, 0], sizes = [16, 512], strides = [1, 1]} : vector<17x512xbf16> to vector<16x512xbf16>
    %c2 = arith.constant 2 : index
    %c0_13 = arith.constant 0 : index
    %c0_14 = arith.constant 0 : index
    %14 = vector.load %arg5[%c2, %c0_13, %c0_14] : memref<4x512x128xbf16, #tpu.memory_space<vmem>>, vector<1x512x128xbf16>
    %15 = vector.shape_cast %14 : vector<1x512x128xbf16> to vector<512x128xbf16>
    %cst_15 = arith.constant dense<0.000000e+00> : vector<16x128xf32>
    %16 = tpu.matmul %13, %15, %cst_15 {dimension_numbers = #tpu.dot_dimension_numbers<[1], [0], [0], [1], [0, 0, 1, 1], [], []>} : vector<16x512xbf16>, vector<512x128xbf16>, vector<16x128xf32> -> vector<16x128xf32>
    %17 = arith.addf %10, %16 : vector<16x128xf32>
    %18 = vector.extract_strided_slice %12 {offsets = [1, 0], sizes = [16, 512], strides = [1, 1]} : vector<17x512xbf16> to vector<16x512xbf16>
    %c3 = arith.constant 3 : index
    %c0_16 = arith.constant 0 : index
    %c0_17 = arith.constant 0 : index
    %19 = vector.load %arg5[%c3, %c0_16, %c0_17] : memref<4x512x128xbf16, #tpu.memory_space<vmem>>, vector<1x512x128xbf16>
    %20 = vector.shape_cast %19 : vector<1x512x128xbf16> to vector<512x128xbf16>
    %cst_18 = arith.constant dense<0.000000e+00> : vector<16x128xf32>
    %21 = tpu.matmul %18, %20, %cst_18 {dimension_numbers = #tpu.dot_dimension_numbers<[1], [0], [0], [1], [0, 0, 1, 1], [], []>} : vector<16x512xbf16>, vector<512x128xbf16>, vector<16x128xf32> -> vector<16x128xf32>
    %22 = arith.addf %17, %21 : vector<16x128xf32>
    %c0_19 = arith.constant 0 : index
    %c0_20 = arith.constant 0 : index
    %23 = vector.load %arg6[%c0_19, %c0_20] : memref<1x128xf32, #tpu.memory_space<vmem>>, vector<1x128xf32>
    %24 = vector.broadcast %23 : vector<1x128xf32> to vector<16x128xf32>
    %25 = arith.addf %22, %24 : vector<16x128xf32>
    %cst_21 = arith.constant 2.000000e-01 : f32
    %26 = vector.broadcast %cst_21 : f32 to vector<16x128xf32>
    %27 = arith.mulf %26, %25 : vector<16x128xf32>
    %28 = arith.maximumf %25, %27 : vector<16x128xf32>
    %29 = vector.shape_cast %28 : vector<16x128xf32> to vector<1x1x16x128xf32>
    %30 = arith.truncf %29 : vector<1x1x16x128xf32> to vector<1x1x16x128xbf16>
    %c0_22 = arith.constant 0 : index
    %c0_23 = arith.constant 0 : index
    %c0_24 = arith.constant 0 : index
    %c0_25 = arith.constant 0 : index
    %31 = vector.load %arg7[%c0_22, %c0_23, %c0_24, %c0_25] : memref<1x1x16x128xbf16, #tpu.memory_space<vmem>>, vector<1x1x16x128xbf16>
    tpu.vector_store %arg7[%c0_22, %c0_23, %c0_24, %c0_25], %30 {strides = array<i32>} : memref<1x1x16x128xbf16, #tpu.memory_space<vmem>>, vector<1x1x16x128xbf16>,
    return
  }
  func.func @transform_0(%arg0: i32, %arg1: i32, %arg2: i32) -> (i32, i32, i32, i32) {
    %c0_i32 = arith.constant 0 : i32
    %c0_i32_0 = arith.constant 0 : i32
    %c0_i32_1 = arith.constant 0 : i32
    return %arg1, %arg2, %c0_i32, %c0_i32_0 : i32, i32, i32, i32
  }
  func.func @transform_1(%arg0: i32, %arg1: i32, %arg2: i32) -> (i32, i32, i32, i32) {
    %c1_i32 = arith.constant 1 : i32
    %0 = arith.addi %arg2, %c1_i32 : i32
    %c0_i32 = arith.constant 0 : i32
    %c0_i32_0 = arith.constant 0 : i32
    %c0_i32_1 = arith.constant 0 : i32
    return %arg1, %0, %c0_i32, %c0_i32_0 : i32, i32, i32, i32
  }
  func.func @transform_2(%arg0: i32, %arg1: i32, %arg2: i32) -> (i32, i32, i32) {
    %c0_i32 = arith.constant 0 : i32
    %c0_i32_0 = arith.constant 0 : i32
    %c0_i32_1 = arith.constant 0 : i32
    return %c0_i32, %c0_i32_0, %arg0 : i32, i32, i32
  }
  func.func @transform_3(%arg0: i32, %arg1: i32, %arg2: i32) -> (i32, i32) {
    %c0_i32 = arith.constant 0 : i32
    %c0_i32_0 = arith.constant 0 : i32
    return %c0_i32, %arg0 : i32, i32
  }
  func.func @transform_4(%arg0: i32, %arg1: i32, %arg2: i32) -> (i32, i32, i32, i32) {
    %c0_i32 = arith.constant 0 : i32
    %c0_i32_0 = arith.constant 0 : i32
    return %arg1, %arg2, %c0_i32, %arg0 : i32, i32, i32, i32
  }
}

module attributes {stable_mosaic.version = 11 : i64} {
  func.func @_conv_kernel(%arg0: i32, %arg1: i32, %arg2: i32, %arg3: memref<1x1x9x512xbf16, #tpu.memory_space<vmem>>, %arg4: memref<1x1x9x512xbf16, #tpu.memory_space<vmem>>, %arg5: memref<4x512x128xbf16, #tpu.memory_space<vmem>>, %arg6: memref<1x128xf32, #tpu.memory_space<vmem>>, %arg7: memref<1x1x8x128xbf16, #tpu.memory_space<vmem>>) attributes {dimension_semantics = [#tpu.dimension_semantics<arbitrary>, #tpu.dimension_semantics<parallel>, #tpu.dimension_semantics<parallel>], iteration_bounds = array<i64: 1, 2, 8>, scalar_prefetch = 0 : i64, scratch_operands = 0 : i64, tpu.core_type = #tpu.core_type<tc>, window_params = [{transform_indices = @transform_0, window_bounds = array<i64: 1, 1, 9, 512>}, {transform_indices = @transform_1, window_bounds = array<i64: 1, 1, 9, 512>}, {transform_indices = @transform_2, window_bounds = array<i64: 4, 512, 128>}, {transform_indices = @transform_3, window_bounds = array<i64: 1, 128>}, {transform_indices = @transform_4, window_bounds = array<i64: 1, 1, 8, 128>}]} {
    %c0 = arith.constant 0 : index
    %c0_0 = arith.constant 0 : index
    %c0_1 = arith.constant 0 : index
    %c0_2 = arith.constant 0 : index
    %0 = vector.load %arg3[%c0, %c0_0, %c0_1, %c0_2] : memref<1x1x9x512xbf16, #tpu.memory_space<vmem>>, vector<1x1x9x512xbf16>
    %1 = vector.shape_cast %0 : vector<1x1x9x512xbf16> to vector<9x512xbf16>
    %2 = vector.extract_strided_slice %1 {offsets = [0, 0], sizes = [8, 512], strides = [1, 1]} : vector<9x512xbf16> to vector<8x512xbf16>
    %c0_3 = arith.constant 0 : index
    %c0_4 = arith.constant 0 : index
    %c0_5 = arith.constant 0 : index
    %3 = vector.load %arg5[%c0_3, %c0_4, %c0_5] : memref<4x512x128xbf16, #tpu.memory_space<vmem>>, vector<1x512x128xbf16>
    %4 = vector.shape_cast %3 : vector<1x512x128xbf16> to vector<512x128xbf16>
    %cst = arith.constant dense<0.000000e+00> : vector<8x128xf32>
    %5 = tpu.matmul %2, %4, %cst {dimension_numbers = #tpu.dot_dimension_numbers<[1], [0], [0], [1], [0, 0, 1, 1], [], []>} : vector<8x512xbf16>, vector<512x128xbf16>, vector<8x128xf32> -> vector<8x128xf32>
    %6 = vector.extract_strided_slice %1 {offsets = [1, 0], sizes = [8, 512], strides = [1, 1]} : vector<9x512xbf16> to vector<8x512xbf16>
    %c1 = arith.constant 1 : index
    %c0_6 = arith.constant 0 : index
    %c0_7 = arith.constant 0 : index
    %7 = vector.load %arg5[%c1, %c0_6, %c0_7] : memref<4x512x128xbf16, #tpu.memory_space<vmem>>, vector<1x512x128xbf16>
    %8 = vector.shape_cast %7 : vector<1x512x128xbf16> to vector<512x128xbf16>
    %cst_8 = arith.constant dense<0.000000e+00> : vector<8x128xf32>
    %9 = tpu.matmul %6, %8, %cst_8 {dimension_numbers = #tpu.dot_dimension_numbers<[1], [0], [0], [1], [0, 0, 1, 1], [], []>} : vector<8x512xbf16>, vector<512x128xbf16>, vector<8x128xf32> -> vector<8x128xf32>
    %10 = arith.addf %5, %9 : vector<8x128xf32>
    %c0_9 = arith.constant 0 : index
    %c0_10 = arith.constant 0 : index
    %c0_11 = arith.constant 0 : index
    %c0_12 = arith.constant 0 : index
    %11 = vector.load %arg4[%c0_9, %c0_10, %c0_11, %c0_12] : memref<1x1x9x512xbf16, #tpu.memory_space<vmem>>, vector<1x1x9x512xbf16>
    %12 = vector.shape_cast %11 : vector<1x1x9x512xbf16> to vector<9x512xbf16>
    %13 = vector.extract_strided_slice %12 {offsets = [0, 0], sizes = [8, 512], strides = [1, 1]} : vector<9x512xbf16> to vector<8x512xbf16>
    %c2 = arith.constant 2 : index
    %c0_13 = arith.constant 0 : index
    %c0_14 = arith.constant 0 : index
    %14 = vector.load %arg5[%c2, %c0_13, %c0_14] : memref<4x512x128xbf16, #tpu.memory_space<vmem>>, vector<1x512x128xbf16>
    %15 = vector.shape_cast %14 : vector<1x512x128xbf16> to vector<512x128xbf16>
    %cst_15 = arith.constant dense<0.000000e+00> : vector<8x128xf32>
    %16 = tpu.matmul %13, %15, %cst_15 {dimension_numbers = #tpu.dot_dimension_numbers<[1], [0], [0], [1], [0, 0, 1, 1], [], []>} : vector<8x512xbf16>, vector<512x128xbf16>, vector<8x128xf32> -> vector<8x128xf32>
    %17 = arith.addf %10, %16 : vector<8x128xf32>
    %18 = vector.extract_strided_slice %12 {offsets = [1, 0], sizes = [8, 512], strides = [1, 1]} : vector<9x512xbf16> to vector<8x512xbf16>
    %c3 = arith.constant 3 : index
    %c0_16 = arith.constant 0 : index
    %c0_17 = arith.constant 0 : index
    %19 = vector.load %arg5[%c3, %c0_16, %c0_17] : memref<4x512x128xbf16, #tpu.memory_space<vmem>>, vector<1x512x128xbf16>
    %20 = vector.shape_cast %19 : vector<1x512x128xbf16> to vector<512x128xbf16>
    %cst_18 = arith.constant dense<0.000000e+00> : vector<8x128xf32>
    %21 = tpu.matmul %18, %20, %cst_18 {dimension_numbers = #tpu.dot_dimension_numbers<[1], [0], [0], [1], [0, 0, 1, 1], [], []>} : vector<8x512xbf16>, vector<512x128xbf16>, vector<8x128xf32> -> vector<8x128xf32>
    %22 = arith.addf %17, %21 : vector<8x128xf32>
    %c0_19 = arith.constant 0 : index
    %c0_20 = arith.constant 0 : index
    %23 = vector.load %arg6[%c0_19, %c0_20] : memref<1x128xf32, #tpu.memory_space<vmem>>, vector<1x128xf32>
    %24 = vector.broadcast %23 : vector<1x128xf32> to vector<8x128xf32>
    %25 = arith.addf %22, %24 : vector<8x128xf32>
    %cst_21 = arith.constant 2.000000e-01 : f32
    %26 = vector.broadcast %cst_21 : f32 to vector<8x128xf32>
    %27 = arith.mulf %26, %25 : vector<8x128xf32>
    %28 = arith.maximumf %25, %27 : vector<8x128xf32>
    %29 = vector.shape_cast %28 : vector<8x128xf32> to vector<1x1x8x128xf32>
    %30 = arith.truncf %29 : vector<1x1x8x128xf32> to vector<1x1x8x128xbf16>
    %c0_22 = arith.constant 0 : index
    %c0_23 = arith.constant 0 : index
    %c0_24 = arith.constant 0 : index
    %c0_25 = arith.constant 0 : index
    %31 = vector.load %arg7[%c0_22, %c0_23, %c0_24, %c0_25] : memref<1x1x8x128xbf16, #tpu.memory_space<vmem>>, vector<1x1x8x128xbf16>
    tpu.vector_store %arg7[%c0_22, %c0_23, %c0_24, %c0_25], %30 {strides = array<i32>} : memref<1x1x8x128xbf16, #tpu.memory_space<vmem>>, vector<1x1x8x128xbf16>,
    return
  }
  func.func @transform_0(%arg0: i32, %arg1: i32, %arg2: i32) -> (i32, i32, i32, i32) {
    %c0_i32 = arith.constant 0 : i32
    %c0_i32_0 = arith.constant 0 : i32
    %c0_i32_1 = arith.constant 0 : i32
    return %arg1, %arg2, %c0_i32, %c0_i32_0 : i32, i32, i32, i32
  }
  func.func @transform_1(%arg0: i32, %arg1: i32, %arg2: i32) -> (i32, i32, i32, i32) {
    %c1_i32 = arith.constant 1 : i32
    %0 = arith.addi %arg2, %c1_i32 : i32
    %c0_i32 = arith.constant 0 : i32
    %c0_i32_0 = arith.constant 0 : i32
    %c0_i32_1 = arith.constant 0 : i32
    return %arg1, %0, %c0_i32, %c0_i32_0 : i32, i32, i32, i32
  }
  func.func @transform_2(%arg0: i32, %arg1: i32, %arg2: i32) -> (i32, i32, i32) {
    %c0_i32 = arith.constant 0 : i32
    %c0_i32_0 = arith.constant 0 : i32
    %c0_i32_1 = arith.constant 0 : i32
    return %c0_i32, %c0_i32_0, %arg0 : i32, i32, i32
  }
  func.func @transform_3(%arg0: i32, %arg1: i32, %arg2: i32) -> (i32, i32) {
    %c0_i32 = arith.constant 0 : i32
    %c0_i32_0 = arith.constant 0 : i32
    return %c0_i32, %arg0 : i32, i32
  }
  func.func @transform_4(%arg0: i32, %arg1: i32, %arg2: i32) -> (i32, i32, i32, i32) {
    %c0_i32 = arith.constant 0 : i32
    %c0_i32_0 = arith.constant 0 : i32
    return %arg1, %arg2, %c0_i32, %arg0 : i32, i32, i32, i32
  }
}

module attributes {stable_mosaic.version = 11 : i64} {
  func.func @_conv_kernel(%arg0: i32, %arg1: i32, %arg2: i32, %arg3: memref<1x1x5x512xbf16, #tpu.memory_space<vmem>>, %arg4: memref<1x1x5x512xbf16, #tpu.memory_space<vmem>>, %arg5: memref<4x512x128xbf16, #tpu.memory_space<vmem>>, %arg6: memref<1x128xf32, #tpu.memory_space<vmem>>, %arg7: memref<1x1x4x128xbf16, #tpu.memory_space<vmem>>) attributes {dimension_semantics = [#tpu.dimension_semantics<arbitrary>, #tpu.dimension_semantics<parallel>, #tpu.dimension_semantics<parallel>], iteration_bounds = array<i64: 1, 2, 4>, scalar_prefetch = 0 : i64, scratch_operands = 0 : i64, tpu.core_type = #tpu.core_type<tc>, window_params = [{transform_indices = @transform_0, window_bounds = array<i64: 1, 1, 5, 512>}, {transform_indices = @transform_1, window_bounds = array<i64: 1, 1, 5, 512>}, {transform_indices = @transform_2, window_bounds = array<i64: 4, 512, 128>}, {transform_indices = @transform_3, window_bounds = array<i64: 1, 128>}, {transform_indices = @transform_4, window_bounds = array<i64: 1, 1, 4, 128>}]} {
    %c0 = arith.constant 0 : index
    %c0_0 = arith.constant 0 : index
    %c0_1 = arith.constant 0 : index
    %c0_2 = arith.constant 0 : index
    %0 = vector.load %arg3[%c0, %c0_0, %c0_1, %c0_2] : memref<1x1x5x512xbf16, #tpu.memory_space<vmem>>, vector<1x1x5x512xbf16>
    %1 = vector.shape_cast %0 : vector<1x1x5x512xbf16> to vector<5x512xbf16>
    %2 = vector.extract_strided_slice %1 {offsets = [0, 0], sizes = [4, 512], strides = [1, 1]} : vector<5x512xbf16> to vector<4x512xbf16>
    %c0_3 = arith.constant 0 : index
    %c0_4 = arith.constant 0 : index
    %c0_5 = arith.constant 0 : index
    %3 = vector.load %arg5[%c0_3, %c0_4, %c0_5] : memref<4x512x128xbf16, #tpu.memory_space<vmem>>, vector<1x512x128xbf16>
    %4 = vector.shape_cast %3 : vector<1x512x128xbf16> to vector<512x128xbf16>
    %cst = arith.constant dense<0.000000e+00> : vector<4x128xf32>
    %5 = tpu.matmul %2, %4, %cst {dimension_numbers = #tpu.dot_dimension_numbers<[1], [0], [0], [1], [0, 0, 1, 1], [], []>} : vector<4x512xbf16>, vector<512x128xbf16>, vector<4x128xf32> -> vector<4x128xf32>
    %6 = vector.extract_strided_slice %1 {offsets = [1, 0], sizes = [4, 512], strides = [1, 1]} : vector<5x512xbf16> to vector<4x512xbf16>
    %c1 = arith.constant 1 : index
    %c0_6 = arith.constant 0 : index
    %c0_7 = arith.constant 0 : index
    %7 = vector.load %arg5[%c1, %c0_6, %c0_7] : memref<4x512x128xbf16, #tpu.memory_space<vmem>>, vector<1x512x128xbf16>
    %8 = vector.shape_cast %7 : vector<1x512x128xbf16> to vector<512x128xbf16>
    %cst_8 = arith.constant dense<0.000000e+00> : vector<4x128xf32>
    %9 = tpu.matmul %6, %8, %cst_8 {dimension_numbers = #tpu.dot_dimension_numbers<[1], [0], [0], [1], [0, 0, 1, 1], [], []>} : vector<4x512xbf16>, vector<512x128xbf16>, vector<4x128xf32> -> vector<4x128xf32>
    %10 = arith.addf %5, %9 : vector<4x128xf32>
    %c0_9 = arith.constant 0 : index
    %c0_10 = arith.constant 0 : index
    %c0_11 = arith.constant 0 : index
    %c0_12 = arith.constant 0 : index
    %11 = vector.load %arg4[%c0_9, %c0_10, %c0_11, %c0_12] : memref<1x1x5x512xbf16, #tpu.memory_space<vmem>>, vector<1x1x5x512xbf16>
    %12 = vector.shape_cast %11 : vector<1x1x5x512xbf16> to vector<5x512xbf16>
    %13 = vector.extract_strided_slice %12 {offsets = [0, 0], sizes = [4, 512], strides = [1, 1]} : vector<5x512xbf16> to vector<4x512xbf16>
    %c2 = arith.constant 2 : index
    %c0_13 = arith.constant 0 : index
    %c0_14 = arith.constant 0 : index
    %14 = vector.load %arg5[%c2, %c0_13, %c0_14] : memref<4x512x128xbf16, #tpu.memory_space<vmem>>, vector<1x512x128xbf16>
    %15 = vector.shape_cast %14 : vector<1x512x128xbf16> to vector<512x128xbf16>
    %cst_15 = arith.constant dense<0.000000e+00> : vector<4x128xf32>
    %16 = tpu.matmul %13, %15, %cst_15 {dimension_numbers = #tpu.dot_dimension_numbers<[1], [0], [0], [1], [0, 0, 1, 1], [], []>} : vector<4x512xbf16>, vector<512x128xbf16>, vector<4x128xf32> -> vector<4x128xf32>
    %17 = arith.addf %10, %16 : vector<4x128xf32>
    %18 = vector.extract_strided_slice %12 {offsets = [1, 0], sizes = [4, 512], strides = [1, 1]} : vector<5x512xbf16> to vector<4x512xbf16>
    %c3 = arith.constant 3 : index
    %c0_16 = arith.constant 0 : index
    %c0_17 = arith.constant 0 : index
    %19 = vector.load %arg5[%c3, %c0_16, %c0_17] : memref<4x512x128xbf16, #tpu.memory_space<vmem>>, vector<1x512x128xbf16>
    %20 = vector.shape_cast %19 : vector<1x512x128xbf16> to vector<512x128xbf16>
    %cst_18 = arith.constant dense<0.000000e+00> : vector<4x128xf32>
    %21 = tpu.matmul %18, %20, %cst_18 {dimension_numbers = #tpu.dot_dimension_numbers<[1], [0], [0], [1], [0, 0, 1, 1], [], []>} : vector<4x512xbf16>, vector<512x128xbf16>, vector<4x128xf32> -> vector<4x128xf32>
    %22 = arith.addf %17, %21 : vector<4x128xf32>
    %c0_19 = arith.constant 0 : index
    %c0_20 = arith.constant 0 : index
    %23 = vector.load %arg6[%c0_19, %c0_20] : memref<1x128xf32, #tpu.memory_space<vmem>>, vector<1x128xf32>
    %24 = vector.broadcast %23 : vector<1x128xf32> to vector<4x128xf32>
    %25 = arith.addf %22, %24 : vector<4x128xf32>
    %cst_21 = arith.constant 2.000000e-01 : f32
    %26 = vector.broadcast %cst_21 : f32 to vector<4x128xf32>
    %27 = arith.mulf %26, %25 : vector<4x128xf32>
    %28 = arith.maximumf %25, %27 : vector<4x128xf32>
    %29 = vector.shape_cast %28 : vector<4x128xf32> to vector<1x1x4x128xf32>
    %30 = arith.truncf %29 : vector<1x1x4x128xf32> to vector<1x1x4x128xbf16>
    %c0_22 = arith.constant 0 : index
    %c0_23 = arith.constant 0 : index
    %c0_24 = arith.constant 0 : index
    %c0_25 = arith.constant 0 : index
    %31 = vector.load %arg7[%c0_22, %c0_23, %c0_24, %c0_25] : memref<1x1x4x128xbf16, #tpu.memory_space<vmem>>, vector<1x1x4x128xbf16>
    tpu.vector_store %arg7[%c0_22, %c0_23, %c0_24, %c0_25], %30 {strides = array<i32>} : memref<1x1x4x128xbf16, #tpu.memory_space<vmem>>, vector<1x1x4x128xbf16>,
    return
  }
  func.func @transform_0(%arg0: i32, %arg1: i32, %arg2: i32) -> (i32, i32, i32, i32) {
    %c0_i32 = arith.constant 0 : i32
    %c0_i32_0 = arith.constant 0 : i32
    %c0_i32_1 = arith.constant 0 : i32
    return %arg1, %arg2, %c0_i32, %c0_i32_0 : i32, i32, i32, i32
  }
  func.func @transform_1(%arg0: i32, %arg1: i32, %arg2: i32) -> (i32, i32, i32, i32) {
    %c1_i32 = arith.constant 1 : i32
    %0 = arith.addi %arg2, %c1_i32 : i32
    %c0_i32 = arith.constant 0 : i32
    %c0_i32_0 = arith.constant 0 : i32
    %c0_i32_1 = arith.constant 0 : i32
    return %arg1, %0, %c0_i32, %c0_i32_0 : i32, i32, i32, i32
  }
  func.func @transform_2(%arg0: i32, %arg1: i32, %arg2: i32) -> (i32, i32, i32) {
    %c0_i32 = arith.constant 0 : i32
    %c0_i32_0 = arith.constant 0 : i32
    %c0_i32_1 = arith.constant 0 : i32
    return %c0_i32, %c0_i32_0, %arg0 : i32, i32, i32
  }
  func.func @transform_3(%arg0: i32, %arg1: i32, %arg2: i32) -> (i32, i32) {
    %c0_i32 = arith.constant 0 : i32
    %c0_i32_0 = arith.constant 0 : i32
    return %c0_i32, %arg0 : i32, i32
  }
  func.func @transform_4(%arg0: i32, %arg1: i32, %arg2: i32) -> (i32, i32, i32, i32) {
    %c0_i32 = arith.constant 0 : i32
    %c0_i32_0 = arith.constant 0 : i32
    return %arg1, %arg2, %c0_i32, %arg0 : i32, i32, i32, i32
  }
}

module attributes {stable_mosaic.version = 11 : i64} {
  func.func @_final_kernel(%arg0: i32, %arg1: memref<8x2048xbf16, #tpu.memory_space<vmem>>, %arg2: memref<1x2048xf32, #tpu.memory_space<vmem>>, %arg3: memref<8x1xf32, #tpu.memory_space<vmem>>) attributes {dimension_semantics = [#tpu.dimension_semantics<parallel>], iteration_bounds = array<i64: 1>, scalar_prefetch = 0 : i64, scratch_operands = 0 : i64, tpu.core_type = #tpu.core_type<tc>, window_params = [{transform_indices = @transform_0, window_bounds = array<i64: 8, 2048>}, {pipeline_mode = #tpu.pipeline_mode<synchronous>, transform_indices = @transform_1, window_bounds = array<i64: 1, 2048>}, {transform_indices = @transform_2, window_bounds = array<i64: 8, 1>}]} {
    %c0 = arith.constant 0 : index
    %c0_0 = arith.constant 0 : index
    %0 = vector.load %arg1[%c0, %c0_0] : memref<8x2048xbf16, #tpu.memory_space<vmem>>, vector<8x2048xbf16>
    %1 = arith.extf %0 : vector<8x2048xbf16> to vector<8x2048xf32>
    %c0_1 = arith.constant 0 : index
    %c0_2 = arith.constant 0 : index
    %2 = vector.load %arg2[%c0_1, %c0_2] : memref<1x2048xf32, #tpu.memory_space<vmem>>, vector<1x2048xf32>
    %3 = vector.broadcast %2 : vector<1x2048xf32> to vector<8x2048xf32>
    %4 = arith.mulf %1, %3 : vector<8x2048xf32>
    %cst = arith.constant dense<0.000000e+00> : vector<8xf32>
    %5 = vector.multi_reduction <add>, %4, %cst [1] : vector<8x2048xf32> to vector<8xf32>
    %6 = vector.shape_cast %5 : vector<8xf32> to vector<8x1xf32>
    %7 = math.absf %6 : vector<8x1xf32>
    %cst_3 = arith.constant 0.000000e+00 : f32
    %8 = vector.broadcast %cst_3 : f32 to vector<8x1xf32>
    %9 = arith.subf %8, %7 : vector<8x1xf32>
    %10 = math.exp %9 : vector<8x1xf32>
    %cst_4 = arith.constant 0.000000e+00 : f32
    %11 = vector.broadcast %cst_4 : f32 to vector<8x1xf32>
    %12 = arith.cmpf oge, %6, %11 : vector<8x1xf32>
    %cst_5 = arith.constant 1.000000e+00 : f32
    %13 = vector.broadcast %cst_5 : f32 to vector<8x1xf32>
    %14 = arith.addf %13, %10 : vector<8x1xf32>
    %cst_6 = arith.constant 1.000000e+00 : f32
    %15 = vector.broadcast %cst_6 : f32 to vector<8x1xf32>
    %16 = arith.divf %15, %14 : vector<8x1xf32>
    %cst_7 = arith.constant 1.000000e+00 : f32
    %17 = vector.broadcast %cst_7 : f32 to vector<8x1xf32>
    %18 = arith.addf %17, %10 : vector<8x1xf32>
    %19 = arith.divf %10, %18 : vector<8x1xf32>
    %20 = arith.select %12, %16, %19 : vector<8x1xi1>, vector<8x1xf32>
    %c0_8 = arith.constant 0 : index
    %c0_9 = arith.constant 0 : index
    %21 = vector.load %arg3[%c0_8, %c0_9] : memref<8x1xf32, #tpu.memory_space<vmem>>, vector<8x1xf32>
    tpu.vector_store %arg3[%c0_8, %c0_9], %20 {strides = array<i32>} : memref<8x1xf32, #tpu.memory_space<vmem>>, vector<8x1xf32>,
    return
  }
  func.func @transform_0(%arg0: i32) -> (i32, i32) {
    %c0_i32 = arith.constant 0 : i32
    %c0_i32_0 = arith.constant 0 : i32
    return %arg0, %c0_i32 : i32, i32
  }
  func.func @transform_1(%arg0: i32) -> (i32, i32) {
    %c0_i32 = arith.constant 0 : i32
    %c0_i32_0 = arith.constant 0 : i32
    %c0_i32_1 = arith.constant 0 : i32
    return %c0_i32, %c0_i32_0 : i32, i32
  }
  func.func @transform_2(%arg0: i32) -> (i32, i32) {
    %c0_i32 = arith.constant 0 : i32
    %c0_i32_0 = arith.constant 0 : i32
    return %arg0, %c0_i32 : i32, i32
  }
}

</mosaic_0001>

<bundles_post_ra>
// kernel: discriminator_forward.5
= control target key start
LH: loop header
LB: loop body
LE: loop exit
PB: predicated region body
PF: predicated region fallthrough
CT: control target
= control target key end

     0   :  { %s996_s12 = smov 0   ;;  %s998_s13 = smov 0   ;;  %s1085_s0 = inlined_call_operand.vmem [shape: bf16[2,33,33,16], index: 0, kind: input, shape index: {}, may-alias: {0,1}]   ;;  %s1086_s1 = inlined_call_operand.vmem [shape: bf16[2,33,33,16], index: 1, kind: input, shape index: {}, may-alias: {0,1}]   ;;  %s1087_s2 = inlined_call_operand.vmem [shape: bf16[4,16,128], index: 2, kind: input, shape index: {}]   ;;  %s1088_s3 = inlined_call_operand.vmem [shape: bf16[2,32,32,128], index: 3, kind: output, shape index: {}]  }
   0x1   :  { %s1000_s14 = smov 0   ;;  %s1002_s15 = smov 0  }
   0x2   :  { %s1004_s16 = smov 0  }
   0x3 LB: > { %s25_s17 = sadd.s32 1, %s966_s14  ;;  %s28_s18 = sadd.s32 1, %s970_s15  ;;  %s974_s16 = sphi %s1004_s16, %s13_s16   ;;  %s970_s15 = sphi %s1002_s15, %s1092_s15   ;;  %s966_s14 = sphi %s1000_s14, %s1091_s14   ;;  %s962_s13 = sphi %s998_s13, %s1090_s13   ;;  %s958_s12 = sphi %s996_s12, %s1089_s12  }
   0x4   : > { %p26_p0 = scmp.ge.s32.totalorder %s25_s17, 32  ;;  %p796_p1 = scmp.ge.s32.totalorder %s974_s16, 1 }
   0x5   : > { %p195_p2 = scmp.lt.s32.totalorder %s974_s16, 65 }
   0x6   : > { %s1094_s17 = smov (%p26_p0, %s25_s17), 0  ;;  %s1096_s18 = smov (!%p26_p0, %s28_s18), %s970_s15 }
   0x7   : > { %p196_p3 = pnand %p796_p1, %p195_p2  ;;  %p30_p4 = scmp.ge.s32.totalorder %s1096_s18, 2 }
   0x8   : > { %p244_p5 = scmp.lt.s32.totalorder (!%p196_p3), %s962_s13, 1  ;;  %p246_p6 = scmp.lt.s32.totalorder (!%p196_p3), %s958_s12, 32 }
   0x9   : > { %s1098_s18 = smov (%p30_p4, %s1096_s18), 0  ;;  %199 = sbr.rel (%p196_p3) target bundleno = 249 (0xf9), region = 32 }
   0xa   : > { %s253_s27 = sadd.s32 (!%p196_p3), 1, %s958_s12  ;;  %p270_p8 = scmp.lt.s32.totalorder (!%p196_p3), %s958_s12, 31 }
   0xb   : > { %p256_p7 = scmp.lt.s32.totalorder (!%p196_p3), %s253_s27, 32 }
   0xe   : > { %v926_v0 = vld [vmem:[%s1087_s2] sm:$0xff]   ;;  %v927_v1 = vld [vmem:[%s1087_s2 + $0x8] sm:$0xff]   ;;  %s1100_s13 = smov (!%p244_p5, %s962_s13), 1  ;;  %v930_v2 = vld [vmem:[%s1087_s2 + $0x10] sm:$0xff]   ;;  %vm331_vm0 = vcmask 130048   ;;  %s1102_s27 = smov (!%p256_p7, %s253_s27), 32 }
   0xf   : > { %865 = vmatprep.subr.bf16.mxu1 %v926_v0  ;;  %859 = vmatprep.subr.bf16.mxu0 %v927_v1  ;;  %s247_s23 = scalar_select %p246_p6, %s958_s12, 32  ;;  %v932_v3 = vld [vmem:[%s1087_s2 + $0x18] sm:$0xff]   ;;  %vm304_vm1 = vsmask.f32 7424 }
  0x10   : > { %866 = vmatpush3.bf16.msra.mxu1 %v926_v0  ;;  %s884_s26 = smul.u32 165, %s1100_s13  ;;  %860 = vmatpush3.bf16.msra.mxu0 %v927_v1  ;;  %s1104_s12 = smov (!%p270_p8, %s958_s12), 31 }
  0x11   : > { %s883_s30 = smul.u32 5, %s247_s23  ;;  %871 = vmatprep.subr.bf16.mxu0 %v930_v2  ;;  %877 = vmatprep.subr.bf16.mxu1 %v932_v3  ;;  %s799_s22 = sshll.u32 %s1104_s12, 2 }
  0x12   : > { %s885_s9 = smul.u32 5, %s1102_s27  ;;  %s800_s23 = sshll.u32 %s1100_s13, 7 }
  0x13   : > { %s250_s4 = sadd.s32 %s884_s26, %s883_s30  ;;  %s277_s24 = sadd.s32 %s800_s23, %s799_s22 }
  0x14   : > { %s797_s5 = sshll.u32 %s250_s4, 2  ;;  %s260_s10 = sadd.s32 %s885_s9, %s884_s26 }
  0x15   : > { %s252_s8 = scalar_lea.vmem %s1085_s0, %s797_s5  ;;  %s798_s11 = sshll.u32 %s260_s10, 2 }
  0x16   : > { %v928_v4 = vld [vmem:[%s252_s8] sm:$0xff]   ;;  %v929_v5 = vld [vmem:[%s252_s8 + $0x8] sm:$0xff]   ;;  %v931_v10 = vld [vmem:[%s252_s8 + $0x10] ss:$0 sps:$4 sm:$0x11]   ;;  %s262_s21 = scalar_lea.vmem %s1086_s1, %s798_s11  ;;  %s801_s25 = sshll.u32 %s277_s24, 2 }
  0x17   : > { %867 = vmatprep.mubr.msk.bf16.mxu1 %vm331_vm0, %v928_v4  ;;  %v306_v6 = vshrl.u32 %v928_v4, 16  ;;  %v308_v7 = vshll.u32 %v928_v4, 16  ;;  %v313_v8 = vshll.u32 %v929_v5, 16  ;;  %v317_v9 = vshrl.u32 %v929_v5, 16  ;;  %v933_v17 = vld [vmem:[%s262_s21] sm:$0xff]   ;;  %v934_v19 = vld [vmem:[%s262_s21 + $0x8] sm:$0xff]   ;;  %s279_s26 = scalar_lea.vmem %s1088_s3, %s801_s25 }
  0x18   : > { %868 = vmatmul.mubr.msk.bf16.vlgmr.msra.gmra.mxu1 %vm331_vm0, %v929_v5  ;;  %v321_v13 = vshll.u32 %v931_v10, 16  ;;  %v535_v21 = vshrl.u32 %v933_v17, 16  ;;  %v537_v22 = vshll.u32 %v933_v17, 16  ;;  %v541_v23 = vshll.u32 %v934_v19, 16 }
  0x19   : > { %v310_v11 = vrot.slane %v308_v7, 1  ;;  %878 = vmatpush3.bf16.msra.mxu1 %v932_v3  ;;  %v315_v12 = vrot.slane %v313_v8, 1  ;;  %v545_v24 = vshrl.u32 %v934_v19, 16  ;;  %v935_v25 = vld [vmem:[%s262_s21 + $0x10] ss:$0 sps:$4 sm:$0x11]  }
  0x1a   : > { %v323_v16 = vrot.slane %v321_v13, 1  ;;  %v539_v26 = vrot.slane %v537_v22, 1  ;;  %v543_v27 = vrot.slane %v541_v23, 1  ;;  %v549_v28 = vshll.u32 %v935_v25, 16 }
  0x1b   : > { %v311_v14 = vor.u32 %v310_v11, %v306_v6  ;;  %v319_v15 = vor.u32 %v317_v9, %v315_v12 }
  0x1c   : > { %v540_v29 = vor.u32 %v539_v26, %v535_v21  ;;  %v547_v30 = vor.u32 %v545_v24, %v543_v27  ;;  %v551_v31 = vrot.slane %v549_v28, 1 }
  0x1d   : > { %v316_v18 = vsel %vm304_vm1, %v311_v14, %v315_v12  ;;  %v324_v20 = vsel %vm304_vm1, %v319_v15, %v323_v16 }
  0x1e   : > { %861 = vmatprep.mubr.msk.bf16.mxu0 %vm331_vm0, %v316_v18  ;;  %v544_v32 = vsel %vm304_vm1, %v540_v29, %v543_v27  ;;  %v552_v33 = vsel %vm304_vm1, %v547_v30, %v551_v31 }
  0x1f   : > { %862 = vmatmul.mubr.msk.bf16.vlgmr.msra.gmra.mxu0 %vm331_vm0, %v324_v20  ;;  %879 = vmatprep.mubr.msk.bf16.mxu1 %vm331_vm0, %v544_v32 }
  0x20   : > { %872 = vmatpush3.bf16.msra.mxu0 %v930_v2  ;;  %873 = vmatprep.mubr.msk.bf16.mxu0 %vm331_vm0, %v933_v17 }
  0x21   : > { %880 = vmatmul.mubr.msk.bf16.vlgmr.msra.gmra.mxu1 %vm331_vm0, %v552_v33 }
  0x27   : > { %874 = vmatmul.mubr.msk.bf16.vlgmr.msra.gmra.mxu0 %vm331_vm0, %v934_v19 }
  0xd8   : > { %v869_v34 = vpop.f32.mrf.mxu1 }
  0xda   : > { %v431_v35 = vpop.f32.mrf.mxu1 }
  0xdc   : > { %v870_v36 = vpop.f32.mrf.mxu1 }
  0xde   : > { %v434_v39 = vpop.f32.mrf.mxu1 }
  0xdf   : > { %v863_v37 = vpop.f32.mrf.mxu0 }
  0xe0   : > { %v440_v42 = vadd.f32 %v869_v34, %v863_v37 }
  0xe1   : > { %v372_v38 = vpop.f32.mrf.mxu0  ;;  %v881_v43 = vpop.f32.mrf.mxu1 }
  0xe2   : > { %v432_v45 = vadd.f32 %v431_v35, %v372_v38 }
  0xe3   : > { %v864_v40 = vpop.f32.mrf.mxu0  ;;  %v599_v46 = vpop.f32.mrf.mxu1 }
  0xe4   : > { %v443_v49 = vadd.f32 %v870_v36, %v864_v40 }
  0xe5   : > { %v375_v41 = vpop.f32.mrf.mxu0  ;;  %v882_v52 = vpop.f32.mrf.mxu1 }
  0xe6   : > { %v435_v54 = vadd.f32 %v434_v39, %v375_v41 }
  0xe7   : > { %v875_v44 = vpop.f32.mrf.mxu0  ;;  %v602_v61 = vpop.f32.mrf.mxu1 }
  0xe8   : > { %v527_v47 = vadd.f32 %v875_v44, %v440_v42 }
  0xe9   : > { %v510_v48 = vpop.f32.mrf.mxu0 }
  0xea   : > { %v616_v50 = vadd.f32 %v881_v43, %v527_v47  ;;  %v525_v51 = vadd.f32 %v510_v48, %v432_v45 }
  0xeb   : > { %v876_v53 = vpop.f32.mrf.mxu0 }
  0xec   : > { %v614_v55 = vadd.f32 %v599_v46, %v525_v51  ;;  %v528_v56 = vadd.f32 %v876_v53, %v443_v49  ;;  %v620_v58 = vmul.f32 0.2, %v616_v50 }
  0xed   : > { %v513_v57 = vpop.f32.mrf.mxu0 }
  0xee   : > { %v617_v59 = vadd.f32 %v882_v52, %v528_v56  ;;  %v526_v60 = vadd.f32 %v513_v57, %v435_v54  ;;  %v618_v62 = vmul.f32 0.2, %v614_v55  ;;  %v624_v1 = vmax.f32 %v616_v50, %v620_v58 }
  0xf0   : > { %v621_v63 = vmul.f32 0.2, %v617_v59  ;;  %v615_v0 = vadd.f32 %v602_v61, %v526_v60  ;;  %v622_v4 = vmax.f32 %v614_v55, %v618_v62 }
  0xf2   : > { %v625_v2 = vmax.f32 %v617_v59, %v621_v63  ;;  %v619_v3 = vmul.f32 0.2, %v615_v0 }
  0xf4   : > { %v844_v5 = vpack.c.bf16 %v625_v2, %v624_v1  ;;  %v623_v6 = vmax.f32 %v615_v0, %v619_v3 }
  0xf6   : > { %846 = vst [vmem:[%s279_s26 + $0x8] sm:$0xff] %v844_v5   ;;  %v839_v7 = vpack.c.bf16 %v623_v6, %v622_v4 }
  0xf8   : > { %840 = vst [vmem:[%s279_s26] sm:$0xff] %v839_v7  }
  0xf9 PF: > { %s13_s16 = sadd.s32 1, %s974_s16   ;;  %s1089_s12 = smov %s966_s14 }
  0xfa   : > { %p10_p9 = scmp.ge.s32.totalorder %s13_s16, 66   ;;  %s1090_s13 = smov %s970_s15 }
  0xfb   : > { %s1091_s14 = smov %s1094_s17  ;;  %s1092_s15 = smov %s1098_s18 }
  0xfc   :  { %12 = sbr.rel (!%p10_p9) target bundleno = 3 (0x3), region = 71 }

// kernel: discriminator_forward.6
= control target key start
LH: loop header
LB: loop body
LE: loop exit
PB: predicated region body
PF: predicated region fallthrough
CT: control target
= control target key end

     0   :  { %s2830_s15 = smov 0   ;;  %s2832_s16 = smov 0   ;;  %s3336_s0 = inlined_call_operand.vmem [shape: bf16[2,17,17,512], index: 0, kind: input, shape index: {}, may-alias: {0,1}]   ;;  %s3337_s1 = inlined_call_operand.vmem [shape: bf16[2,17,17,512], index: 1, kind: input, shape index: {}, may-alias: {0,1}]   ;;  %s3338_s2 = inlined_call_operand.vmem [shape: bf16[4,512,128], index: 2, kind: input, shape index: {}]   ;;  %s3339_s3 = inlined_call_operand.vmem [shape: f32[1,128], index: 3, kind: input, shape index: {}]   ;;  %s3340_s4 = inlined_call_operand.vmem [shape: bf16[2,16,16,128], index: 4, kind: output, shape index: {}]  }
   0x1   :  { %s2834_s17 = smov 0   ;;  %s2836_s18 = smov 0  }
   0x2   :  { %s2838_s19 = smov 0  }
   0x3 LB: > { %s26_s20 = sadd.s32 1, %s2795_s17  ;;  %s29_s21 = sadd.s32 1, %s2799_s18  ;;  %s2803_s19 = sphi %s2838_s19, %s14_s19   ;;  %s2799_s18 = sphi %s2836_s18, %s3344_s18   ;;  %s2795_s17 = sphi %s2834_s17, %s3343_s17   ;;  %s2791_s16 = sphi %s2832_s16, %s3342_s16   ;;  %s2787_s15 = sphi %s2830_s15, %s3341_s15  }
   0x4   : > { %p27_p0 = scmp.ge.s32.totalorder %s26_s20, 16  ;;  %p2044_p1 = scmp.ge.s32.totalorder %s2803_s19, 1 }
   0x5   : > { %p228_p2 = scmp.lt.s32.totalorder %s2803_s19, 33 }
   0x6   : > { %s3346_s20 = smov (%p27_p0, %s26_s20), 0  ;;  %s3348_s21 = smov (!%p27_p0, %s29_s21), %s2799_s18 }
   0x7   : > { %p229_p3 = pnand %p2044_p1, %p228_p2  ;;  %p31_p4 = scmp.ge.s32.totalorder %s3348_s21, 2 }
   0x8   : > { %p282_p5 = scmp.lt.s32.totalorder (!%p229_p3), %s2791_s16, 1  ;;  %p284_p6 = scmp.lt.s32.totalorder (!%p229_p3), %s2787_s15, 16 }
   0x9   : > { %s3350_s21 = smov (%p31_p4, %s3348_s21), 0  ;;  %232 = sbr.rel (%p229_p3) target bundleno = 360 (0x168), region = 36 }
   0xa   : > { %s291_s30 = sadd.s32 (!%p229_p3), 1, %s2787_s15  ;;  %p311_p8 = scmp.lt.s32.totalorder (!%p229_p3), %s2787_s15, 15 }
   0xb   : > { %p294_p7 = scmp.lt.s32.totalorder (!%p229_p3), %s291_s30, 16 }
   0xe   : > { %v2617_v0 = vld [vmem:[%s3338_s2 + $0x178] sm:$0xff]   ;;  %v2621_v4 = vld [vmem:[%s3338_s2 + $0x170] sm:$0xff]   ;;  %v2625_v8 = vld [vmem:[%s3338_s2 + $0x168] sm:$0xff]   ;;  %s3352_s16 = smov (!%p282_p5, %s2791_s16), 1  ;;  %vm483_vm0 = vsmask.f32 7424 }
   0xf   : > { %v2618_v1 = vld [vmem:[%s3338_s2 + $0x1f8] sm:$0xff]   ;;  %2398 = vmatprep.subr.bf16.mxu0 %v2617_v0  ;;  %v2622_v5 = vld [vmem:[%s3338_s2 + $0x1f0] sm:$0xff]   ;;  %v2626_v9 = vld [vmem:[%s3338_s2 + $0x1e8] sm:$0xff]   ;;  %s285_s9 = scalar_select %p284_p6, %s2787_s15, 16 }
  0x10   : > { %v2619_v2 = vld [vmem:[%s3338_s2 + $0x138] sm:$0xff]   ;;  %2420 = vmatprep.subr.bf16.mxu1 %v2618_v1  ;;  %v2623_v6 = vld [vmem:[%s3338_s2 + $0x130] sm:$0xff]   ;;  %v2627_v10 = vld [vmem:[%s3338_s2 + $0x128] sm:$0xff]   ;;  %s2575_s23 = smul.u32 204, %s3352_s16  ;;  %s3354_s30 = smov (!%p294_p7, %s291_s30), 16 }
  0x11   : > { %v2620_v3 = vld [vmem:[%s3338_s2 + $0x1b8] sm:$0xff]   ;;  %2399 = vmatpush3.bf16.msra.mxu0 %v2619_v2  ;;  %v2624_v7 = vld [vmem:[%s3338_s2 + $0x1b0] sm:$0xff]   ;;  %v2628_v11 = vld [vmem:[%s3338_s2 + $0x1a8] sm:$0xff]   ;;  %s2574_s26 = smul.u32 12, %s285_s9  ;;  %s3356_s15 = smov (!%p311_p8, %s2787_s15), 15 }
  0x12   : > { %2421 = vmatpush3.bf16.msra.mxu1 %v2620_v3  ;;  %2400 = vmatprep.subr.bf16.mxu0 %v2621_v4  ;;  %v2629_v12 = vld [vmem:[%s3338_s2 + $0x160] sm:$0xff]   ;;  %v2633_v16 = vld [vmem:[%s3338_s2 + $0x158] sm:$0xff]   ;;  %v2637_v20 = vld [vmem:[%s3338_s2 + $0x150] sm:$0xff]   ;;  %s2576_s10 = smul.u32 12, %s3354_s30  ;;  %s2047_s13 = sshll.u32 %s3356_s15, 1 }
  0x13   : > { %2422 = vmatprep.subr.bf16.mxu1 %v2622_v5  ;;  %v2630_v13 = vld [vmem:[%s3338_s2 + $0x1e0] sm:$0xff]   ;;  %v2634_v17 = vld [vmem:[%s3338_s2 + $0x1d8] sm:$0xff]   ;;  %v2638_v21 = vld [vmem:[%s3338_s2 + $0x1d0] sm:$0xff]   ;;  %s288_s9 = sadd.s32 %s2575_s23, %s2574_s26  ;;  %s2048_s14 = sshll.u32 %s3352_s16, 5 }
  0x14   : > { %v2631_v14 = vld [vmem:[%s3338_s2 + $0x120] sm:$0xff]   ;;  %v2635_v18 = vld [vmem:[%s3338_s2 + $0x118] sm:$0xff]   ;;  %v2639_v22 = vld [vmem:[%s3338_s2 + $0x110] sm:$0xff]   ;;  %s2045_s24 = sshll.u32 %s288_s9, 2  ;;  %s298_s30 = sadd.s32 %s2576_s10, %s2575_s23 }
  0x15   : > { %2401 = vmatpush3.bf16.msra.mxu0 %v2623_v6  ;;  %v2632_v15 = vld [vmem:[%s3338_s2 + $0x1a0] sm:$0xff]   ;;  %v2636_v19 = vld [vmem:[%s3338_s2 + $0x198] sm:$0xff]   ;;  %v2640_v23 = vld [vmem:[%s3338_s2 + $0x190] sm:$0xff]   ;;  %s290_s7 = scalar_lea.vmem %s3336_s0, %s2045_s24  ;;  %s2046_s8 = sshll.u32 %s298_s30, 2 }
  0x16   : > { %2423 = vmatpush3.bf16.msra.mxu1 %v2624_v7  ;;  %2402 = vmatprep.subr.bf16.mxu0 %v2625_v8  ;;  %v2641_v24 = vld [vmem:[%s3338_s2 + $0x148] sm:$0xff]   ;;  %v2645_v28 = vld [vmem:[%s3338_s2 + $0x140] sm:$0xff]   ;;  %v2659_v44 = vld [vmem:[%s3338_s2 + $0x78] sm:$0xff]   ;;  %s3178_s24 = scalar_lea.vmem %s3337_s1, %s2046_s8  ;;  %s318_s22 = sadd.s32 %s2048_s14, %s2047_s13 }
  0x17   : > { %2424 = vmatprep.subr.bf16.mxu1 %v2626_v9  ;;  %v2642_v25 = vld [vmem:[%s3338_s2 + $0x1c8] sm:$0xff]   ;;  %v2646_v29 = vld [vmem:[%s3338_s2 + $0x1c0] sm:$0xff]   ;;  %v2660_v57 = vld [vmem:[%s3338_s2 + $0xf8] sm:$0xff]   ;;  %s2049_s25 = sshll.u32 %s318_s22, 2 }
  0x18   : > { %v2643_v26 = vld [vmem:[%s3338_s2 + $0x108] sm:$0xff]   ;;  %v2647_v30 = vld [vmem:[%s3338_s2 + $0x100] sm:$0xff]   ;;  %v2661_v1 = vld [vmem:[%s3338_s2 + $0x38] sm:$0xff]   ;;  %s320_s26 = scalar_lea.vmem %s3340_s4, %s2049_s25 }
  0x19   : > { %2403 = vmatpush3.bf16.msra.mxu0 %v2627_v10  ;;  %v2644_v27 = vld [vmem:[%s3338_s2 + $0x188] sm:$0xff]   ;;  %v2648_v31 = vld [vmem:[%s3338_s2 + $0x180] sm:$0xff]   ;;  %v2662_v4 = vld [vmem:[%s3338_s2 + $0xb8] sm:$0xff]  }
  0x1a   : > { %2425 = vmatpush3.bf16.msra.mxu1 %v2628_v11  ;;  %2404 = vmatprep.subr.bf16.mxu0 %v2629_v12  ;;  %v326_v32 = vld [vmem:[%s290_s7 + $0x20] sm:$0x11]  ;;  %v327_v36 = vld [vmem:[%s290_s7 + $0x28] sm:$0x11]  ;;  %v2663_v5 = vld [vmem:[%s3338_s2 + $0x70] sm:$0xff]  }
  0x1b   : > { %2426 = vmatprep.subr.bf16.mxu1 %v2630_v13  ;;  %v2649_v33 = vld [vmem:[%s290_s7 + $0x4] ss:$16 sps:$4 sm:$0xff]   ;;  %v2119_v34 = vcombine.high %v326_v32, %v326_v32  ;;  %v2118_v35 = vcombine.low %v326_v32, %v326_v32  ;;  %v2652_v37 = vld [vmem:[%s290_s7 + $0xc] ss:$16 sps:$4 sm:$0xff]   ;;  %v2972_v38 = vld [vmem:[%s290_s7] ss:$16 sps:$4 sm:$0xff]   ;;  %v2121_v42 = vcombine.high %v327_v36, %v327_v36  ;;  %v2120_v55 = vcombine.low %v327_v36, %v327_v36 }
  0x1c   : > { %v497_v39 = vshrl.u32 %v2649_v33, 16  ;;  %v499_v40 = vshll.u32 %v2649_v33, 16  ;;  %v2974_v43 = vld [vmem:[%s290_s7 + $0x8] ss:$16 sps:$4 sm:$0xff]   ;;  %v521_v45 = vshrl.u32 %v2652_v37, 16  ;;  %v523_v46 = vshll.u32 %v2652_v37, 16 }
  0x1d   : > { %2405 = vmatpush3.bf16.msra.mxu0 %v2631_v14  ;;  %v504_v41 = vshll.u32 %v2119_v34, 16  ;;  %v485_v47 = vshrl.u32 %v2972_v38, 16  ;;  %v487_v48 = vshll.u32 %v2972_v38, 16  ;;  %v528_v51 = vshll.u32 %v2121_v42, 16  ;;  %v2664_v9 = vld [vmem:[%s3338_s2 + $0xf0] sm:$0xff]   ;;  %v2667_v14 = vld [vmem:[%s3338_s2 + $0x68] sm:$0xff]  }
  0x1e   : > { %2427 = vmatpush3.bf16.msra.mxu1 %v2632_v15  ;;  %2406 = vmatprep.subr.bf16.mxu0 %v2633_v16  ;;  %v501_v49 = vrot.slane %v499_v40, 1  ;;  %v492_v52 = vshll.u32 %v2118_v35, 16  ;;  %v525_v53 = vrot.slane %v523_v46, 1  ;;  %v509_v56 = vshrl.u32 %v2974_v43, 16  ;;  %v2665_v11 = vld [vmem:[%s3338_s2 + $0x30] sm:$0xff]   ;;  %v2668_v15 = vld [vmem:[%s3338_s2 + $0xe8] sm:$0xff]  }
  0x1f   : > { %2428 = vmatprep.subr.bf16.mxu1 %v2634_v17  ;;  %v506_v50 = vrot.slane %v504_v41, 1  ;;  %v489_v54 = vrot.slane %v487_v48, 1  ;;  %v530_v59 = vrot.slane %v528_v51, 1  ;;  %v511_v61 = vshll.u32 %v2974_v43, 16  ;;  %v2666_v13 = vld [vmem:[%s3338_s2 + $0xb0] sm:$0xff]   ;;  %v2669_v16 = vld [vmem:[%s3338_s2 + $0x28] sm:$0xff]  }
  0x20   : > { %v502_v58 = vor.u32 %v501_v49, %v497_v39  ;;  %v494_v60 = vrot.slane %v492_v52, 1  ;;  %v526_v62 = vor.u32 %v525_v53, %v521_v45  ;;  %v516_v0 = vshll.u32 %v2120_v55, 16  ;;  %v2670_v17 = vld [vmem:[%s3338_s2 + $0xa8] sm:$0xff]   ;;  %v2687_v34 = vld [vmem:[%s3338_s2 + $0x40] sm:$0xff]   ;;  %v2691_v39 = vld [vmem:[%s3338_s2 + $0x278] sm:$0xff]  }
  0x21   : > { %2407 = vmatpush3.bf16.msra.mxu0 %v2635_v18  ;;  %v490_v63 = vor.u32 %v489_v54, %v485_v47  ;;  %v513_v3 = vrot.slane %v511_v61, 1  ;;  %v2671_v18 = vld [vmem:[%s3338_s2 + $0x60] sm:$0xff]   ;;  %v2685_v32 = vld [vmem:[%s3338_s2 + $0x8] sm:$0xff]   ;;  %v2692_v40 = vld [vmem:[%s3338_s2 + $0x2f8] sm:$0xff]  }
  0x22   : > { %2429 = vmatpush3.bf16.msra.mxu1 %v2636_v19  ;;  %2408 = vmatprep.subr.bf16.mxu0 %v2637_v20  ;;  %v507_v2 = vsel %vm483_vm0, %v502_v58, %v506_v50  ;;  %v531_v6 = vsel %vm483_vm0, %v526_v62, %v530_v59  ;;  %v518_v8 = vrot.slane %v516_v0, 1  ;;  %v2672_v19 = vld [vmem:[%s3338_s2 + $0xe0] sm:$0xff]   ;;  %v2693_v41 = vld [vmem:[%s3338_s2 + $0x238] sm:$0xff]   ;;  %v2696_v45 = vld [vmem:[%s3338_s2 + $0x2f0] sm:$0xff]  }
  0x23   : > { %2430 = vmatprep.subr.bf16.mxu1 %v2638_v21  ;;  %760 = vmatprep.mubr.bf16.mxu0 %v507_v2  ;;  %v495_v7 = vsel %vm483_vm0, %v490_v63, %v494_v60  ;;  %v514_v10 = vor.u32 %v513_v3, %v509_v56  ;;  %v2673_v20 = vld [vmem:[%s3338_s2 + $0x20] sm:$0xff]   ;;  %v2694_v42 = vld [vmem:[%s3338_s2 + $0x2b8] sm:$0xff]   ;;  %v2697_v46 = vld [vmem:[%s3338_s2 + $0x230] sm:$0xff]  }
  0x24   : > { %801 = vmatprep.mubr.bf16.mxu1 %v531_v6  ;;  %v2674_v21 = vld [vmem:[%s3338_s2 + $0xa0] sm:$0xff]   ;;  %v2698_v47 = vld [vmem:[%s3338_s2 + $0x2b0] sm:$0xff]   ;;  %v2700_v48 = vld [vmem:[%s3338_s2 + $0x2e8] sm:$0xff]  }
  0x25   : > { %2409 = vmatpush3.bf16.msra.mxu0 %v2639_v22  ;;  %v519_v12 = vsel %vm483_vm0, %v514_v10, %v518_v8  ;;  %v2675_v22 = vld [vmem:[%s3338_s2 + $0x58] sm:$0xff]   ;;  %v2688_v35 = vld [vmem:[%s3338_s2 + $0xc0] sm:$0xff]   ;;  %v2701_v49 = vld [vmem:[%s3338_s2 + $0x228] sm:$0xff]  }
  0x26   : > { %2431 = vmatpush3.bf16.msra.mxu1 %v2640_v23  ;;  %2410 = vmatprep.subr.bf16.mxu0 %v2641_v24  ;;  %v2676_v23 = vld [vmem:[%s3338_s2 + $0xd8] sm:$0xff]   ;;  %v2689_v36 = vld [vmem:[%s3338_s2] sm:$0xff]   ;;  %v2711_v58 = vld [vmem:[%s3338_s2 + $0x250] sm:$0xff]  }
  0x27   : > { %2432 = vmatprep.subr.bf16.mxu1 %v2642_v25  ;;  %v2677_v24 = vld [vmem:[%s3338_s2 + $0x18] sm:$0xff]   ;;  %v2703_v50 = vld [vmem:[%s3338_s2 + $0x260] sm:$0xff]   ;;  %v2712_v59 = vld [vmem:[%s3338_s2 + $0x2d0] sm:$0xff]  }
  0x28   : > { %v2678_v25 = vld [vmem:[%s3338_s2 + $0x98] sm:$0xff]   ;;  %v2704_v51 = vld [vmem:[%s3338_s2 + $0x2e0] sm:$0xff]   ;;  %v2713_v60 = vld [vmem:[%s3338_s2 + $0x210] sm:$0xff]  }
  0x29   : > { %2411 = vmatpush3.bf16.msra.mxu0 %v2643_v26  ;;  %v2679_v26 = vld [vmem:[%s3338_s2 + $0x50] sm:$0xff]   ;;  %v2705_v52 = vld [vmem:[%s3338_s2 + $0x220] sm:$0xff]   ;;  %v2707_v54 = vld [vmem:[%s3338_s2 + $0x258] sm:$0xff]  }
  0x2a   : > { %2433 = vmatpush3.bf16.msra.mxu1 %v2644_v27  ;;  %2412 = vmatprep.subr.bf16.mxu0 %v2645_v28  ;;  %v2680_v27 = vld [vmem:[%s3338_s2 + $0xd0] sm:$0xff]   ;;  %v2706_v53 = vld [vmem:[%s3338_s2 + $0x2a0] sm:$0xff]   ;;  %v2708_v55 = vld [vmem:[%s3338_s2 + $0x2d8] sm:$0xff]  }
  0x2b   : > { %2434 = vmatprep.subr.bf16.mxu1 %v2646_v29  ;;  %v2681_v28 = vld [vmem:[%s3338_s2 + $0x10] sm:$0xff]   ;;  %v2709_v56 = vld [vmem:[%s3338_s2 + $0x218] sm:$0xff]   ;;  %v2715_v62 = vld [vmem:[%s3338_s2 + $0x248] sm:$0xff]  }
  0x2c   : > { %v2682_v29 = vld [vmem:[%s3338_s2 + $0x90] sm:$0xff]   ;;  %v2716_v63 = vld [vmem:[%s3338_s2 + $0x2c8] sm:$0xff]   ;;  %v2719_v2 = vld [vmem:[%s3338_s2 + $0x240] sm:$0xff]  }
  0x2d   : > { %2413 = vmatpush3.bf16.msra.mxu0 %v2647_v30  ;;  %v2683_v30 = vld [vmem:[%s3338_s2 + $0x48] sm:$0xff]   ;;  %v2714_v61 = vld [vmem:[%s3338_s2 + $0x290] sm:$0xff]   ;;  %v2720_v3 = vld [vmem:[%s3338_s2 + $0x2c0] sm:$0xff]  }
  0x2e   : > { %2435 = vmatpush3.bf16.msra.mxu1 %v2648_v31  ;;  %2442 = vmatprep.subr.bf16.mxu0 %v2659_v44  ;;  %v2684_v31 = vld [vmem:[%s3338_s2 + $0xc8] sm:$0xff]   ;;  %v2695_v44 = vld [vmem:[%s3338_s2 + $0x270] sm:$0xff]   ;;  %v2729_v10 = vld [vmem:[%s3338_s2 + $0x378] sm:$0xff]  }
  0x2f   : > { %2464 = vmatprep.subr.bf16.mxu1 %v2660_v57  ;;  %v2710_v57 = vld [vmem:[%s3338_s2 + $0x298] sm:$0xff]   ;;  %v2717_v0 = vld [vmem:[%s3338_s2 + $0x208] sm:$0xff]   ;;  %v3187_v6 = vld [vmem:[%s3178_s24 + $0x4] ss:$16 sps:$4 sm:$0xff]  }
  0x30   : > { %761 = vmatmul.mubr.bf16.vlgmr.msra.gmra.mxu0 %v495_v7  ;;  %v3190_v7 = vld [vmem:[%s3178_s24] ss:$16 sps:$4 sm:$0xff]   ;;  %v3193_v8 = vld [vmem:[%s3178_s24 + $0x8] ss:$16 sps:$4 sm:$0xff]  }
  0x31   : > { %2443 = vmatpush3.bf16.msra.mxu0 %v2661_v1  ;;  %1038 = vmatprep.mubr.bf16.mxu0 %v2649_v33  ;;  %v2686_v33 = vld [vmem:[%s3338_s2 + $0x88] sm:$0xff]  }
  0x32   : > { %2444 = vmatprep.subr.bf16.mxu0 %v2663_v5  ;;  %802 = vmatmul.mubr.bf16.vlgmr.msra.gmra.mxu1 %v519_v12  ;;  %v2718_v1 = vld [vmem:[%s3338_s2 + $0x288] sm:$0xff]   ;;  %v2722_v5 = vld [vmem:[%s3338_s2 + $0x280] sm:$0xff]   ;;  %v2731_v12 = vld [vmem:[%s3338_s2 + $0x338] sm:$0xff]  }
  0x33   : > { %2465 = vmatpush3.bf16.msra.mxu1 %v2662_v4  ;;  %1079 = vmatprep.mubr.bf16.mxu1 %v2652_v37  ;;  %v2690_v37 = vld [vmem:[%s3338_s2 + $0x80] sm:$0xff]  }
  0x34   : > { %2466 = vmatprep.subr.bf16.mxu1 %v2664_v9  ;;  %v2721_v4 = vld [vmem:[%s3338_s2 + $0x200] sm:$0xff]   ;;  %v3196_v9 = vld [vmem:[%s3178_s24 + $0xc] ss:$16 sps:$4 sm:$0xff]  }
  0x35   : > { %2445 = vmatpush3.bf16.msra.mxu0 %v2665_v11  ;;  %v2730_v11 = vld [vmem:[%s3338_s2 + $0x3f8] sm:$0xff]  }
  0x36   : > { %2446 = vmatprep.subr.bf16.mxu0 %v2667_v14  ;;  %v2733_v14 = vld [vmem:[%s3338_s2 + $0x370] sm:$0xff]  }
  0x37   : > { %2467 = vmatpush3.bf16.msra.mxu1 %v2666_v13  ;;  %v2732_v13 = vld [vmem:[%s3338_s2 + $0x3b8] sm:$0xff]  }
  0x38   : > { %2468 = vmatprep.subr.bf16.mxu1 %v2668_v15  ;;  %v2734_v15 = vld [vmem:[%s3338_s2 + $0x3f0] sm:$0xff]  }
  0x39   : > { %2447 = vmatpush3.bf16.msra.mxu0 %v2669_v16  ;;  %v2735_v16 = vld [vmem:[%s3338_s2 + $0x330] sm:$0xff]  }
  0x3a   : > { %2448 = vmatprep.subr.bf16.mxu0 %v2671_v18  ;;  %v2737_v18 = vld [vmem:[%s3338_s2 + $0x368] sm:$0xff]  }
  0x3b   : > { %2469 = vmatpush3.bf16.msra.mxu1 %v2670_v17  ;;  %v2736_v17 = vld [vmem:[%s3338_s2 + $0x3b0] sm:$0xff]  }
  0x3c   : > { %2470 = vmatprep.subr.bf16.mxu1 %v2672_v19  ;;  %v2738_v19 = vld [vmem:[%s3338_s2 + $0x3e8] sm:$0xff]  }
  0x3d   : > { %2449 = vmatpush3.bf16.msra.mxu0 %v2673_v20  ;;  %v2739_v20 = vld [vmem:[%s3338_s2 + $0x328] sm:$0xff]  }
  0x3e   : > { %2450 = vmatprep.subr.bf16.mxu0 %v2675_v22  ;;  %v2741_v22 = vld [vmem:[%s3338_s2 + $0x360] sm:$0xff]  }
  0x3f   : > { %2471 = vmatpush3.bf16.msra.mxu1 %v2674_v21  ;;  %v2740_v21 = vld [vmem:[%s3338_s2 + $0x3a8] sm:$0xff]  }
  0x40   : > { %2472 = vmatprep.subr.bf16.mxu1 %v2676_v23  ;;  %v2742_v23 = vld [vmem:[%s3338_s2 + $0x3e0] sm:$0xff]  }
  0x41   : > { %2451 = vmatpush3.bf16.msra.mxu0 %v2677_v24  ;;  %v2743_v24 = vld [vmem:[%s3338_s2 + $0x320] sm:$0xff]  }
  0x42   : > { %2452 = vmatprep.subr.bf16.mxu0 %v2679_v26  ;;  %v2745_v26 = vld [vmem:[%s3338_s2 + $0x358] sm:$0xff]  }
  0x43   : > { %2473 = vmatpush3.bf16.msra.mxu1 %v2678_v25  ;;  %v2744_v25 = vld [vmem:[%s3338_s2 + $0x3a0] sm:$0xff]  }
  0x44   : > { %2474 = vmatprep.subr.bf16.mxu1 %v2680_v27  ;;  %v1545_v27 = vshll.u32 %v3187_v6, 16 }
  0x45   : > { %2453 = vmatpush3.bf16.msra.mxu0 %v2681_v28  ;;  %v2746_v28 = vld [vmem:[%s3338_s2 + $0x3d8] sm:$0xff]  }
  0x46   : > { %2454 = vmatprep.subr.bf16.mxu0 %v2683_v30  ;;  %v1569_v30 = vshll.u32 %v3196_v9, 16 }
  0x47   : > { %2475 = vmatpush3.bf16.msra.mxu1 %v2682_v29  ;;  %v2747_v29 = vld [vmem:[%s3338_s2 + $0x318] sm:$0xff]  }
  0x48   : > { %2476 = vmatprep.subr.bf16.mxu1 %v2684_v31  ;;  %v2748_v31 = vld [vmem:[%s3338_s2 + $0x398] sm:$0xff]  }
  0x49   : > { %2455 = vmatpush3.bf16.msra.mxu0 %v2685_v32  ;;  %v2749_v32 = vld [vmem:[%s3338_s2 + $0x350] sm:$0xff]  }
  0x4a   : > { %2456 = vmatprep.subr.bf16.mxu0 %v2687_v34  ;;  %v2750_v34 = vld [vmem:[%s3338_s2 + $0x3d0] sm:$0xff]  }
  0x4b   : > { %2477 = vmatpush3.bf16.msra.mxu1 %v2686_v33  ;;  %v1543_v33 = vshrl.u32 %v3187_v6, 16 }
  0x4c   : > { %2478 = vmatprep.subr.bf16.mxu1 %v2688_v35  ;;  %v1547_v35 = vrot.slane %v1545_v27, 1 }
  0x4d   : > { %2457 = vmatpush3.bf16.msra.mxu0 %v2689_v36  ;;  %v2751_v36 = vld [vmem:[%s3338_s2 + $0x310] sm:$0xff]  }
  0x4e   : > { %2486 = vmatprep.subr.bf16.mxu0 %v2691_v39  ;;  %v2752_v39 = vld [vmem:[%s3338_s2 + $0x390] sm:$0xff]  }
  0x4f   : > { %2479 = vmatpush3.bf16.msra.mxu1 %v2690_v37  ;;  %v1567_v37 = vshrl.u32 %v3196_v9, 16 }
  0x50   : > { %1039 = vmatmul.mubr.bf16.vlgmr.msra.gmra.mxu0 %v2972_v38  ;;  %2508 = vmatprep.subr.bf16.mxu1 %v2692_v40  ;;  %v2699_v38 = vld [vmem:[%s3338_s2 + $0x268] sm:$0xff]   ;;  %v1571_v40 = vrot.slane %v1569_v30, 1 }
  0x51   : > { %2487 = vmatpush3.bf16.msra.mxu0 %v2693_v41  ;;  %1403 = vmatprep.mubr.bf16.mxu0 %v3187_v6  ;;  %v2753_v41 = vld [vmem:[%s3338_s2 + $0x348] sm:$0xff]  }
  0x52   : > { %2488 = vmatprep.subr.bf16.mxu0 %v2695_v44  ;;  %1080 = vmatmul.mubr.bf16.vlgmr.msra.gmra.mxu1 %v2974_v43  ;;  %v2702_v43 = vld [vmem:[%s3338_s2 + $0x2a8] sm:$0xff]  }
  0x53   : > { %2509 = vmatpush3.bf16.msra.mxu1 %v2694_v42  ;;  %1444 = vmatprep.mubr.bf16.mxu1 %v3196_v9  ;;  %v1533_v42 = vshll.u32 %v3190_v7, 16  ;;  %v2754_v44 = vld [vmem:[%s3338_s2 + $0x3c8] sm:$0xff]  }
  0x54   : > { %2510 = vmatprep.subr.bf16.mxu1 %v2696_v45  ;;  %v1557_v45 = vshll.u32 %v3193_v8, 16 }
  0x55   : > { %2489 = vmatpush3.bf16.msra.mxu0 %v2697_v46  ;;  %v2755_v46 = vld [vmem:[%s3338_s2 + $0x308] sm:$0xff]  }
  0x56   : > { %2490 = vmatprep.subr.bf16.mxu0 %v2699_v38  ;;  %v2756_v38 = vld [vmem:[%s3338_s2 + $0x388] sm:$0xff]  }
  0x57   : > { %2511 = vmatpush3.bf16.msra.mxu1 %v2698_v47  ;;  %v1531_v47 = vshrl.u32 %v3190_v7, 16 }
  0x58   : > { %2512 = vmatprep.subr.bf16.mxu1 %v2700_v48  ;;  %v1555_v48 = vshrl.u32 %v3193_v8, 16 }
  0x59   : > { %2491 = vmatpush3.bf16.msra.mxu0 %v2701_v49  ;;  %v2757_v49 = vld [vmem:[%s3338_s2 + $0x340] sm:$0xff]  }
  0x5a   : > { %2492 = vmatprep.subr.bf16.mxu0 %v2703_v50  ;;  %v2758_v50 = vld [vmem:[%s3338_s2 + $0x3c0] sm:$0xff]  }
  0x5b   : > { %2513 = vmatpush3.bf16.msra.mxu1 %v2702_v43  ;;  %v1535_v43 = vrot.slane %v1533_v42, 1 }
  0x5c   : > { %2514 = vmatprep.subr.bf16.mxu1 %v2704_v51  ;;  %v1559_v51 = vrot.slane %v1557_v45, 1 }
  0x5d   : > { %2493 = vmatpush3.bf16.msra.mxu0 %v2705_v52  ;;  %v2759_v52 = vld [vmem:[%s3338_s2 + $0x300] sm:$0xff]  }
  0x5e   : > { %2494 = vmatprep.subr.bf16.mxu0 %v2707_v54  ;;  %v1092_v54 = vld [vmem:[%s3178_s24 + $0x20] sm:$0x11] }
  0x5f   : > { %2515 = vmatpush3.bf16.msra.mxu1 %v2706_v53  ;;  %v2760_v53 = vld [vmem:[%s3338_s2 + $0x380] sm:$0xff]  }
  0x60   : > { %2516 = vmatprep.subr.bf16.mxu1 %v2708_v55  ;;  %v1093_v55 = vld [vmem:[%s3178_s24 + $0x28] sm:$0x11] }
  0x61   : > { %2495 = vmatpush3.bf16.msra.mxu0 %v2709_v56  ;;  %v2351_v56 = vcombine.high %v1092_v54, %v1092_v54 }
  0x62   : > { %2496 = vmatprep.subr.bf16.mxu0 %v2711_v58  ;;  %v2350_v58 = vcombine.low %v1092_v54, %v1092_v54 }
  0x63   : > { %2517 = vmatpush3.bf16.msra.mxu1 %v2710_v57  ;;  %v2353_v57 = vcombine.high %v1093_v55, %v1093_v55 }
  0x64   : > { %2518 = vmatprep.subr.bf16.mxu1 %v2712_v59  ;;  %v2352_v59 = vcombine.low %v1093_v55, %v1093_v55 }
  0x65   : > { %2497 = vmatpush3.bf16.msra.mxu0 %v2713_v60  ;;  %v1548_v60 = vor.u32 %v1547_v35, %v1543_v33 }
  0x66   : > { %2498 = vmatprep.subr.bf16.mxu0 %v2715_v62  ;;  %v1536_v62 = vor.u32 %v1535_v43, %v1531_v47 }
  0x67   : > { %2519 = vmatpush3.bf16.msra.mxu1 %v2714_v61  ;;  %v1572_v61 = vor.u32 %v1571_v40, %v1567_v37 }
  0x68   : > { %2520 = vmatprep.subr.bf16.mxu1 %v2716_v63  ;;  %v1560_v63 = vor.u32 %v1559_v51, %v1555_v48 }
  0x69   : > { %2499 = vmatpush3.bf16.msra.mxu0 %v2717_v0  ;;  %v1550_v0 = vshll.u32 %v2351_v56, 16 }
  0x6a   : > { %2500 = vmatprep.subr.bf16.mxu0 %v2719_v2  ;;  %v1538_v2 = vshll.u32 %v2350_v58, 16 }
  0x6b   : > { %2521 = vmatpush3.bf16.msra.mxu1 %v2718_v1  ;;  %v1574_v1 = vshll.u32 %v2353_v57, 16 }
  0x6c   : > { %2522 = vmatprep.subr.bf16.mxu1 %v2720_v3  ;;  %v1562_v3 = vshll.u32 %v2352_v59, 16  ;;  %v1540_v6 = vrot.slane %v1538_v2, 1 }
  0x6d   : > { %2501 = vmatpush3.bf16.msra.mxu0 %v2721_v4  ;;  %v1552_v4 = vrot.slane %v1550_v0, 1 }
  0x6e   : > { %2530 = vmatprep.subr.bf16.mxu0 %v2729_v10  ;;  %v1541_v10 = vsel %vm483_vm0, %v1536_v62, %v1540_v6 }
  0x6f   : > { %2523 = vmatpush3.bf16.msra.mxu1 %v2722_v5  ;;  %v1576_v5 = vrot.slane %v1574_v1, 1  ;;  %v2386_v1 = vld [vmem:[%s3339_s3] ss:$0 sm:$0xff] }
  0x70   : > { %1404 = vmatmul.mubr.bf16.vlgmr.msra.gmra.mxu0 %v3190_v7  ;;  %2552 = vmatprep.subr.bf16.mxu1 %v2730_v11  ;;  %v1564_v7 = vrot.slane %v1562_v3, 1 }
  0x71   : > { %2531 = vmatpush3.bf16.msra.mxu0 %v2731_v12  ;;  %v1577_v9 = vsel %vm483_vm0, %v1572_v61, %v1576_v5 }
  0x72   : > { %1445 = vmatmul.mubr.bf16.vlgmr.msra.gmra.mxu1 %v3193_v8  ;;  %2532 = vmatprep.subr.bf16.mxu0 %v2733_v14  ;;  %v1553_v8 = vsel %vm483_vm0, %v1548_v60, %v1552_v4  ;;  %v1565_v11 = vsel %vm483_vm0, %v1560_v63, %v1564_v7 }
  0x73   : > { %2553 = vmatpush3.bf16.msra.mxu1 %v2732_v13  ;;  %1806 = vmatprep.mubr.bf16.mxu0 %v1553_v8 }
  0x74   : > { %2554 = vmatprep.subr.bf16.mxu1 %v2734_v15  ;;  %1847 = vmatprep.mubr.bf16.mxu1 %v1577_v9 }
  0x75   : > { %2533 = vmatpush3.bf16.msra.mxu0 %v2735_v16 }
  0x76   : > { %2534 = vmatprep.subr.bf16.mxu0 %v2737_v18 }
  0x77   : > { %2555 = vmatpush3.bf16.msra.mxu1 %v2736_v17 }
  0x78   : > { %2556 = vmatprep.subr.bf16.mxu1 %v2738_v19 }
  0x79   : > { %2535 = vmatpush3.bf16.msra.mxu0 %v2739_v20 }
  0x7a   : > { %2536 = vmatprep.subr.bf16.mxu0 %v2741_v22 }
  0x7b   : > { %2557 = vmatpush3.bf16.msra.mxu1 %v2740_v21 }
  0x7c   : > { %2558 = vmatprep.subr.bf16.mxu1 %v2742_v23 }
  0x7d   : > { %2537 = vmatpush3.bf16.msra.mxu0 %v2743_v24 }
  0x7e   : > { %2538 = vmatprep.subr.bf16.mxu0 %v2745_v26 }
  0x7f   : > { %2559 = vmatpush3.bf16.msra.mxu1 %v2744_v25 }
  0x80   : > { %2560 = vmatprep.subr.bf16.mxu1 %v2746_v28 }
  0x81   : > { %2539 = vmatpush3.bf16.msra.mxu0 %v2747_v29 }
  0x82   : > { %2540 = vmatprep.subr.bf16.mxu0 %v2749_v32 }
  0x83   : > { %2561 = vmatpush3.bf16.msra.mxu1 %v2748_v31 }
  0x84   : > { %2562 = vmatprep.subr.bf16.mxu1 %v2750_v34 }
  0x85   : > { %2541 = vmatpush3.bf16.msra.mxu0 %v2751_v36 }
  0x86   : > { %2542 = vmatprep.subr.bf16.mxu0 %v2753_v41 }
  0x87   : > { %2563 = vmatpush3.bf16.msra.mxu1 %v2752_v39 }
  0x88   : > { %2564 = vmatprep.subr.bf16.mxu1 %v2754_v44 }
  0x89   : > { %2543 = vmatpush3.bf16.msra.mxu0 %v2755_v46 }
  0x8a   : > { %2544 = vmatprep.subr.bf16.mxu0 %v2757_v49 }
  0x8b   : > { %2565 = vmatpush3.bf16.msra.mxu1 %v2756_v38 }
  0x8c   : > { %2566 = vmatprep.subr.bf16.mxu1 %v2758_v50 }
  0x8d   : > { %2545 = vmatpush3.bf16.msra.mxu0 %v2759_v52 }
  0x8f   : > { %2567 = vmatpush3.bf16.msra.mxu1 %v2760_v53 }
  0x90   : > { %1807 = vmatmul.mubr.bf16.vlgmr.msra.gmra.mxu0 %v1541_v10 }
  0x92   : > { %1848 = vmatmul.mubr.bf16.vlgmr.msra.gmra.mxu1 %v1565_v11 }
  0xf0   : > { %v2414_v12 = vpop.f32.mrf.mxu0 }
  0xf2   : > { %v2436_v13 = vpop.f32.mrf.mxu1  ;;  %v2415_v14 = vpop.f32.mrf.mxu0 }
  0xf3   : > { %v2416_v32 = vadd.f32 %v2415_v14, %v2414_v12 }
  0xf4   : > { %v2437_v15 = vpop.f32.mrf.mxu1  ;;  %v2417_v16 = vpop.f32.mrf.mxu0 }
  0xf5   : > { %v2438_v33 = vadd.f32 %v2437_v15, %v2436_v13 }
  0xf6   : > { %v2439_v17 = vpop.f32.mrf.mxu1  ;;  %v2418_v18 = vpop.f32.mrf.mxu0 }
  0xf7   : > { %v2419_v37 = vadd.f32 %v2418_v18, %v2417_v16  ;;  %v804_v40 = vadd.f32 %v2438_v33, %v2416_v32 }
  0xf8   : > { %v2440_v19 = vpop.f32.mrf.mxu1 }
  0xf9   : > { %v2441_v39 = vadd.f32 %v2440_v19, %v2439_v17 }
  0xfb   : > { %v807_v38 = vadd.f32 %v2441_v39, %v2419_v37 }
 0x110   : > { %v2458_v20 = vpop.f32.mrf.mxu0 }
 0x112   : > { %v2480_v21 = vpop.f32.mrf.mxu1  ;;  %v2459_v22 = vpop.f32.mrf.mxu0 }
 0x113   : > { %v2460_v36 = vadd.f32 %v2459_v22, %v2458_v20 }
 0x114   : > { %v2481_v23 = vpop.f32.mrf.mxu1  ;;  %v2461_v24 = vpop.f32.mrf.mxu0 }
 0x115   : > { %v1041_v46 = vadd.f32 %v2460_v36, %v804_v40  ;;  %v2482_v43 = vadd.f32 %v2481_v23, %v2480_v21 }
 0x116   : > { %v2483_v25 = vpop.f32.mrf.mxu1  ;;  %v2462_v26 = vpop.f32.mrf.mxu0 }
 0x117   : > { %v2463_v47 = vadd.f32 %v2462_v26, %v2461_v24  ;;  %v1082_v55 = vadd.f32 %v2482_v43, %v1041_v46 }
 0x118   : > { %v2484_v27 = vpop.f32.mrf.mxu1 }
 0x119   : > { %v1044_v56 = vadd.f32 %v2463_v47, %v807_v38  ;;  %v2485_v61 = vadd.f32 %v2484_v27, %v2483_v25 }
 0x11b   : > { %v1085_v4 = vadd.f32 %v2485_v61, %v1044_v56 }
 0x130   : > { %v2502_v28 = vpop.f32.mrf.mxu0 }
 0x132   : > { %v2524_v29 = vpop.f32.mrf.mxu1  ;;  %v2503_v30 = vpop.f32.mrf.mxu0 }
 0x133   : > { %v2504_v41 = vadd.f32 %v2503_v30, %v2502_v28 }
 0x134   : > { %v2525_v31 = vpop.f32.mrf.mxu1  ;;  %v2505_v34 = vpop.f32.mrf.mxu0 }
 0x135   : > { %v2526_v42 = vadd.f32 %v2525_v31, %v2524_v29 }
 0x136   : > { %v2527_v35 = vpop.f32.mrf.mxu1  ;;  %v2506_v44 = vpop.f32.mrf.mxu0 }
 0x137   : > { %v1447_v50 = vadd.f32 %v2526_v42, %v2504_v41  ;;  %v2507_v51 = vadd.f32 %v2506_v44, %v2505_v34 }
 0x138   : > { %v2528_v45 = vpop.f32.mrf.mxu1 }
 0x139   : > { %v2529_v52 = vadd.f32 %v2528_v45, %v2527_v35  ;;  %v1453_v62 = vadd.f32 %v1447_v50, %v1082_v55 }
 0x13b   : > { %v1450_v63 = vadd.f32 %v2529_v52, %v2507_v51 }
 0x13d   : > { %v1454_v8 = vadd.f32 %v1450_v63, %v1085_v4 }
 0x150   : > { %v2546_v48 = vpop.f32.mrf.mxu0 }
 0x152   : > { %v2568_v49 = vpop.f32.mrf.mxu1  ;;  %v2547_v53 = vpop.f32.mrf.mxu0 }
 0x153   : > { %v2548_v57 = vadd.f32 %v2547_v53, %v2546_v48 }
 0x154   : > { %v2569_v54 = vpop.f32.mrf.mxu1  ;;  %v2549_v59 = vpop.f32.mrf.mxu0 }
 0x155   : > { %v2570_v58 = vadd.f32 %v2569_v54, %v2568_v49 }
 0x156   : > { %v2571_v60 = vpop.f32.mrf.mxu1  ;;  %v2550_v2 = vpop.f32.mrf.mxu0 }
 0x157   : > { %v1850_v0 = vadd.f32 %v2570_v58, %v2548_v57  ;;  %v2551_v6 = vadd.f32 %v2550_v2, %v2549_v59 }
 0x158   : > { %v2572_v3 = vpop.f32.mrf.mxu1 }
 0x159   : > { %v1856_v5 = vadd.f32 %v1850_v0, %v1453_v62  ;;  %v2573_v7 = vadd.f32 %v2572_v3, %v2571_v60 }
 0x15b   : > { %v1865_v9 = vadd.f32 %v2386_v1, %v1856_v5  ;;  %v1853_v10 = vadd.f32 %v2573_v7, %v2551_v6 }
 0x15d   : > { %v1857_v11 = vadd.f32 %v1853_v10, %v1454_v8  ;;  %v1867_v12 = vmul.f32 0.2, %v1865_v9 }
 0x15f   : > { %v1866_v13 = vadd.f32 %v2386_v1, %v1857_v11  ;;  %v1869_v15 = vmax.f32 %v1865_v9, %v1867_v12 }
 0x161   : > { %v1868_v14 = vmul.f32 0.2, %v1866_v13 }
 0x163   : > { %v1870_v16 = vmax.f32 %v1866_v13, %v1868_v14 }
 0x165   : > { %v2396_v17 = vpack.c.bf16 %v1870_v16, %v1869_v15 }
 0x167   : > { %2397 = vst [vmem:[%s320_s26] sm:$0xff] %v2396_v17  }
 0x168 PF: > { %s14_s19 = sadd.s32 1, %s2803_s19   ;;  %s3341_s15 = smov %s2795_s17 }
 0x169   : > { %p11_p9 = scmp.ge.s32.totalorder %s14_s19, 34   ;;  %s3342_s16 = smov %s2799_s18 }
 0x16a   : > { %s3343_s17 = smov %s3346_s20  ;;  %s3344_s18 = smov %s3350_s21 }
 0x16b   :  { %13 = sbr.rel (!%p11_p9) target bundleno = 3 (0x3), region = 78 }

// kernel: discriminator_forward.7
= control target key start
LH: loop header
LB: loop body
LE: loop exit
PB: predicated region body
PF: predicated region fallthrough
CT: control target
= control target key end

     0   :  { %s2730_s15 = smov 0   ;;  %s2732_s16 = smov 0   ;;  %s3228_s0 = inlined_call_operand.vmem [shape: bf16[2,9,9,512], index: 0, kind: input, shape index: {}, may-alias: {0,1}]   ;;  %s3229_s1 = inlined_call_operand.vmem [shape: bf16[2,9,9,512], index: 1, kind: input, shape index: {}, may-alias: {0,1}]   ;;  %s3230_s2 = inlined_call_operand.vmem [shape: bf16[4,512,128], index: 2, kind: input, shape index: {}]   ;;  %s3231_s3 = inlined_call_operand.vmem [shape: f32[1,128], index: 3, kind: input, shape index: {}]   ;;  %s3232_s4 = inlined_call_operand.vmem [shape: bf16[2,8,8,128], index: 4, kind: output, shape index: {}]  }
   0x1   :  { %s2734_s17 = smov 0   ;;  %s2736_s18 = smov 0  }
   0x2   :  { %s2738_s19 = smov 0  }
   0x3 LB: > { %s26_s20 = sadd.s32 1, %s2695_s17  ;;  %s29_s21 = sadd.s32 1, %s2699_s18  ;;  %s2703_s19 = sphi %s2738_s19, %s14_s19   ;;  %s2699_s18 = sphi %s2736_s18, %s3236_s18   ;;  %s2695_s17 = sphi %s2734_s17, %s3235_s17   ;;  %s2691_s16 = sphi %s2732_s16, %s3234_s16   ;;  %s2687_s15 = sphi %s2730_s15, %s3233_s15  }
   0x4   : > { %p27_p0 = scmp.ge.s32.totalorder %s26_s20, 8  ;;  %p1958_p1 = scmp.ge.s32.totalorder %s2703_s19, 1 }
   0x5   : > { %p228_p2 = scmp.lt.s32.totalorder %s2703_s19, 17 }
   0x6   : > { %s3238_s20 = smov (%p27_p0, %s26_s20), 0  ;;  %s3240_s21 = smov (!%p27_p0, %s29_s21), %s2699_s18 }
   0x7   : > { %p229_p3 = pnand %p1958_p1, %p228_p2  ;;  %p31_p4 = scmp.ge.s32.totalorder %s3240_s21, 2 }
   0x8   : > { %p281_p5 = scmp.lt.s32.totalorder (!%p229_p3), %s2691_s16, 1  ;;  %p283_p6 = scmp.lt.s32.totalorder (!%p229_p3), %s2687_s15, 8 }
   0x9   : > { %s3242_s21 = smov (%p31_p4, %s3240_s21), 0  ;;  %232 = sbr.rel (%p229_p3) target bundleno = 355 (0x163), region = 36 }
   0xa   : > { %s290_s30 = sadd.s32 (!%p229_p3), 1, %s2687_s15  ;;  %p310_p8 = scmp.lt.s32.totalorder (!%p229_p3), %s2687_s15, 7 }
   0xb   : > { %p293_p7 = scmp.lt.s32.totalorder (!%p229_p3), %s290_s30, 8 }
   0xe   : > { %v2521_v0 = vld [vmem:[%s3230_s2 + $0x178] sm:$0xff]   ;;  %v2525_v4 = vld [vmem:[%s3230_s2 + $0x170] sm:$0xff]   ;;  %v2529_v8 = vld [vmem:[%s3230_s2 + $0x168] sm:$0xff]   ;;  %s3244_s16 = smov (!%p281_p5, %s2691_s16), 1  ;;  %s3246_s30 = smov (!%p293_p7, %s290_s30), 8 }
   0xf   : > { %v2522_v1 = vld [vmem:[%s3230_s2 + $0x1f8] sm:$0xff]   ;;  %2304 = vmatprep.subr.bf16.mxu0 %v2521_v0  ;;  %v2526_v5 = vld [vmem:[%s3230_s2 + $0x1f0] sm:$0xff]   ;;  %v2530_v9 = vld [vmem:[%s3230_s2 + $0x1e8] sm:$0xff]   ;;  %s284_s11 = scalar_select %p283_p6, %s2687_s15, 8 }
  0x10   : > { %v2523_v2 = vld [vmem:[%s3230_s2 + $0x138] sm:$0xff]   ;;  %2326 = vmatprep.subr.bf16.mxu1 %v2522_v1  ;;  %v2527_v6 = vld [vmem:[%s3230_s2 + $0x130] sm:$0xff]   ;;  %v2531_v10 = vld [vmem:[%s3230_s2 + $0x128] sm:$0xff]   ;;  %s2480_s25 = smul.u32 72, %s3244_s16  ;;  %s1961_s10 = sshll.u32 %s3246_s30, 3 }
  0x11   : > { %v2524_v3 = vld [vmem:[%s3230_s2 + $0x1b8] sm:$0xff]   ;;  %2305 = vmatpush3.bf16.msra.mxu0 %v2523_v2  ;;  %v2528_v7 = vld [vmem:[%s3230_s2 + $0x1b0] sm:$0xff]   ;;  %v2532_v11 = vld [vmem:[%s3230_s2 + $0x1a8] sm:$0xff]   ;;  %s1959_s28 = sshll.u32 %s284_s11, 3  ;;  %s3248_s15 = smov (!%p310_p8, %s2687_s15), 7 }
  0x12   : > { %2327 = vmatpush3.bf16.msra.mxu1 %v2524_v3  ;;  %2306 = vmatprep.subr.bf16.mxu0 %v2525_v4  ;;  %v2533_v12 = vld [vmem:[%s3230_s2 + $0x160] sm:$0xff]   ;;  %v2537_v16 = vld [vmem:[%s3230_s2 + $0x158] sm:$0xff]   ;;  %v2541_v20 = vld [vmem:[%s3230_s2 + $0x150] sm:$0xff]   ;;  %s287_s9 = sadd.s32 %s2480_s25, %s1959_s28  ;;  %s297_s24 = sadd.s32 %s2480_s25, %s1961_s10 }
  0x13   : > { %2328 = vmatprep.subr.bf16.mxu1 %v2526_v5  ;;  %v2534_v13 = vld [vmem:[%s3230_s2 + $0x1e0] sm:$0xff]   ;;  %v2538_v17 = vld [vmem:[%s3230_s2 + $0x1d8] sm:$0xff]   ;;  %v2542_v21 = vld [vmem:[%s3230_s2 + $0x1d0] sm:$0xff]   ;;  %s1960_s23 = sshll.u32 %s287_s9, 2  ;;  %s1962_s6 = sshll.u32 %s297_s24, 2 }
  0x14   : > { %v2535_v14 = vld [vmem:[%s3230_s2 + $0x120] sm:$0xff]   ;;  %v2539_v18 = vld [vmem:[%s3230_s2 + $0x118] sm:$0xff]   ;;  %v2543_v22 = vld [vmem:[%s3230_s2 + $0x110] sm:$0xff]   ;;  %s289_s7 = scalar_lea.vmem %s3228_s0, %s1960_s23  ;;  %s3077_s14 = scalar_lea.vmem %s3229_s1, %s1962_s6 }
  0x15   : > { %2307 = vmatpush3.bf16.msra.mxu0 %v2527_v6  ;;  %v2536_v15 = vld [vmem:[%s3230_s2 + $0x1a0] sm:$0xff]   ;;  %v2540_v19 = vld [vmem:[%s3230_s2 + $0x198] sm:$0xff]   ;;  %v2544_v23 = vld [vmem:[%s3230_s2 + $0x190] sm:$0xff]  }
  0x16   : > { %2329 = vmatpush3.bf16.msra.mxu1 %v2528_v7  ;;  %2308 = vmatprep.subr.bf16.mxu0 %v2529_v8  ;;  %v2545_v24 = vld [vmem:[%s3230_s2 + $0x148] sm:$0xff]   ;;  %v2549_v28 = vld [vmem:[%s3230_s2 + $0x140] sm:$0xff]   ;;  %v322_v33 = vld [vmem:[%s289_s7 + $0x10] sm:$0x11] }
  0x17   : > { %2330 = vmatprep.subr.bf16.mxu1 %v2530_v9  ;;  %v2546_v25 = vld [vmem:[%s3230_s2 + $0x1c8] sm:$0xff]   ;;  %v2550_v29 = vld [vmem:[%s3230_s2 + $0x1c0] sm:$0xff]   ;;  %v323_v37 = vld [vmem:[%s289_s7 + $0x18] sm:$0x11] }
  0x18   : > { %v2547_v26 = vld [vmem:[%s3230_s2 + $0x108] sm:$0xff]   ;;  %v2551_v30 = vld [vmem:[%s3230_s2 + $0x100] sm:$0xff]   ;;  %v2557_v40 = vld [vmem:[%s3230_s2 + $0x78] sm:$0xff]  }
  0x19   : > { %2309 = vmatpush3.bf16.msra.mxu0 %v2531_v10  ;;  %v2548_v27 = vld [vmem:[%s3230_s2 + $0x188] sm:$0xff]   ;;  %v2552_v31 = vld [vmem:[%s3230_s2 + $0x180] sm:$0xff]   ;;  %v2558_v45 = vld [vmem:[%s3230_s2 + $0xf8] sm:$0xff]  }
  0x1a   : > { %2331 = vmatpush3.bf16.msra.mxu1 %v2532_v11  ;;  %2310 = vmatprep.subr.bf16.mxu0 %v2533_v12  ;;  %v2872_v32 = vld [vmem:[%s289_s7] sm:$0xff]  ;;  %v2874_v34 = vld [vmem:[%s289_s7 + $0x8] sm:$0xff]  ;;  %v2559_v52 = vld [vmem:[%s3230_s2 + $0x38] sm:$0xff]  }
  0x1b   : > { %2332 = vmatprep.subr.bf16.mxu1 %v2534_v13  ;;  %v2029_v35 = vcombine.low %v2872_v32, %v322_v33  ;;  %v2030_v36 = vcombine.high %v2872_v32, %v322_v33  ;;  %v2031_v38 = vcombine.low %v2874_v34, %v323_v37  ;;  %v2032_v39 = vcombine.high %v2874_v34, %v323_v37  ;;  %v2560_v55 = vld [vmem:[%s3230_s2 + $0xb8] sm:$0xff]   ;;  %v2561_v56 = vld [vmem:[%s3230_s2 + $0x70] sm:$0xff]   ;;  %v2565_v2 = vld [vmem:[%s3230_s2 + $0x68] sm:$0xff]  }
  0x1c   : > { %v2562_v61 = vld [vmem:[%s3230_s2 + $0xf0] sm:$0xff]   ;;  %v2066_v63 = vcombine.high %v2872_v32, %v2872_v32  ;;  %v2068_v1 = vcombine.high %v2874_v34, %v2874_v34  ;;  %v2566_v3 = vld [vmem:[%s3230_s2 + $0xe8] sm:$0xff]   ;;  %v2569_v6 = vld [vmem:[%s3230_s2 + $0x60] sm:$0xff]  }
  0x1d   : > { %2311 = vmatpush3.bf16.msra.mxu0 %v2535_v14  ;;  %v477_v41 = vshrl.u32 %v2030_v36, 16  ;;  %v479_v42 = vshll.u32 %v2030_v36, 16  ;;  %v470_v43 = vshrl.u32 %v2029_v35, 16  ;;  %v472_v44 = vshll.u32 %v2029_v35, 16  ;;  %v2563_v62 = vld [vmem:[%s3230_s2 + $0x30] sm:$0xff]   ;;  %v2567_v4 = vld [vmem:[%s3230_s2 + $0x28] sm:$0xff]  }
  0x1e   : > { %2333 = vmatpush3.bf16.msra.mxu1 %v2536_v15  ;;  %2312 = vmatprep.subr.bf16.mxu0 %v2537_v16  ;;  %v491_v46 = vshrl.u32 %v2032_v39, 16  ;;  %v493_v47 = vshll.u32 %v2032_v39, 16  ;;  %v484_v48 = vshrl.u32 %v2031_v38, 16  ;;  %v486_v49 = vshll.u32 %v2031_v38, 16  ;;  %v2564_v0 = vld [vmem:[%s3230_s2 + $0xb0] sm:$0xff]   ;;  %v2568_v5 = vld [vmem:[%s3230_s2 + $0xa8] sm:$0xff]  }
  0x1f   : > { %2334 = vmatprep.subr.bf16.mxu1 %v2538_v17  ;;  %v481_v50 = vrot.slane %v479_v42, 1  ;;  %v474_v51 = vrot.slane %v472_v44, 1  ;;  %v2570_v7 = vld [vmem:[%s3230_s2 + $0xe0] sm:$0xff]   ;;  %v2573_v10 = vld [vmem:[%s3230_s2 + $0x58] sm:$0xff]   ;;  %v2577_v14 = vld [vmem:[%s3230_s2 + $0x50] sm:$0xff]  }
  0x20   : > { %v495_v53 = vrot.slane %v493_v47, 1  ;;  %v488_v54 = vrot.slane %v486_v49, 1  ;;  %v2571_v8 = vld [vmem:[%s3230_s2 + $0x20] sm:$0xff]   ;;  %v2574_v11 = vld [vmem:[%s3230_s2 + $0xd8] sm:$0xff]   ;;  %v2578_v15 = vld [vmem:[%s3230_s2 + $0xd0] sm:$0xff]  }
  0x21   : > { %2313 = vmatpush3.bf16.msra.mxu0 %v2539_v18  ;;  %v482_v57 = vor.u32 %v481_v50, %v477_v41  ;;  %v475_v58 = vor.u32 %v474_v51, %v470_v43  ;;  %v2572_v9 = vld [vmem:[%s3230_s2 + $0xa0] sm:$0xff]   ;;  %v2575_v12 = vld [vmem:[%s3230_s2 + $0x18] sm:$0xff]   ;;  %v2579_v16 = vld [vmem:[%s3230_s2 + $0x10] sm:$0xff]  }
  0x22   : > { %2335 = vmatpush3.bf16.msra.mxu1 %v2540_v19  ;;  %2314 = vmatprep.subr.bf16.mxu0 %v2541_v20  ;;  %v496_v59 = vor.u32 %v495_v53, %v491_v46  ;;  %v489_v60 = vor.u32 %v488_v54, %v484_v48  ;;  %v2576_v13 = vld [vmem:[%s3230_s2 + $0x98] sm:$0xff]   ;;  %v2580_v17 = vld [vmem:[%s3230_s2 + $0x90] sm:$0xff]   ;;  %v2581_v18 = vld [vmem:[%s3230_s2 + $0x48] sm:$0xff]  }
  0x23   : > { %2336 = vmatprep.subr.bf16.mxu1 %v2542_v21  ;;  %725 = vmatprep.mubr.bf16.mxu0 %v482_v57  ;;  %v2582_v19 = vld [vmem:[%s3230_s2 + $0xc8] sm:$0xff]   ;;  %v2597_v33 = vld [vmem:[%s3230_s2 + $0x270] sm:$0xff]   ;;  %v2606_v41 = vld [vmem:[%s3230_s2 + $0x2e0] sm:$0xff]  }
  0x24   : > { %765 = vmatprep.mubr.bf16.mxu1 %v496_v59  ;;  %v2583_v20 = vld [vmem:[%s3230_s2 + $0x8] sm:$0xff]   ;;  %v2598_v35 = vld [vmem:[%s3230_s2 + $0x2f0] sm:$0xff]   ;;  %v2607_v42 = vld [vmem:[%s3230_s2 + $0x220] sm:$0xff]  }
  0x25   : > { %2315 = vmatpush3.bf16.msra.mxu0 %v2543_v22  ;;  %v2584_v21 = vld [vmem:[%s3230_s2 + $0x88] sm:$0xff]   ;;  %v2585_v22 = vld [vmem:[%s3230_s2 + $0x40] sm:$0xff]   ;;  %v2609_v44 = vld [vmem:[%s3230_s2 + $0x258] sm:$0xff]  }
  0x26   : > { %2337 = vmatpush3.bf16.msra.mxu1 %v2544_v23  ;;  %2316 = vmatprep.subr.bf16.mxu0 %v2545_v24  ;;  %v2586_v23 = vld [vmem:[%s3230_s2 + $0xc0] sm:$0xff]   ;;  %v2601_v36 = vld [vmem:[%s3230_s2 + $0x268] sm:$0xff]   ;;  %v2611_v46 = vld [vmem:[%s3230_s2 + $0x218] sm:$0xff]  }
  0x27   : > { %2338 = vmatprep.subr.bf16.mxu1 %v2546_v25  ;;  %v2587_v24 = vld [vmem:[%s3230_s2] sm:$0xff]   ;;  %v2602_v37 = vld [vmem:[%s3230_s2 + $0x2e8] sm:$0xff]   ;;  %v2612_v47 = vld [vmem:[%s3230_s2 + $0x298] sm:$0xff]  }
  0x28   : > { %v2588_v25 = vld [vmem:[%s3230_s2 + $0x80] sm:$0xff]   ;;  %v2603_v38 = vld [vmem:[%s3230_s2 + $0x228] sm:$0xff]   ;;  %v2613_v48 = vld [vmem:[%s3230_s2 + $0x250] sm:$0xff]  }
  0x29   : > { %2317 = vmatpush3.bf16.msra.mxu0 %v2547_v26  ;;  %v2593_v26 = vld [vmem:[%s3230_s2 + $0x278] sm:$0xff]   ;;  %v2604_v39 = vld [vmem:[%s3230_s2 + $0x2a8] sm:$0xff]   ;;  %v2608_v43 = vld [vmem:[%s3230_s2 + $0x2a0] sm:$0xff]  }
  0x2a   : > { %2339 = vmatpush3.bf16.msra.mxu1 %v2548_v27  ;;  %2318 = vmatprep.subr.bf16.mxu0 %v2549_v28  ;;  %v2594_v27 = vld [vmem:[%s3230_s2 + $0x2f8] sm:$0xff]   ;;  %v2614_v49 = vld [vmem:[%s3230_s2 + $0x2d0] sm:$0xff]   ;;  %v2618_v53 = vld [vmem:[%s3230_s2 + $0x2c8] sm:$0xff]  }
  0x2b   : > { %2340 = vmatprep.subr.bf16.mxu1 %v2550_v29  ;;  %v2595_v28 = vld [vmem:[%s3230_s2 + $0x238] sm:$0xff]   ;;  %v2065_v29 = vcombine.low %v2872_v32, %v2872_v32  ;;  %v2599_v32 = vld [vmem:[%s3230_s2 + $0x230] sm:$0xff]   ;;  %v2619_v54 = vld [vmem:[%s3230_s2 + $0x208] sm:$0xff]  }
  0x2c   : > { %v2615_v50 = vld [vmem:[%s3230_s2 + $0x210] sm:$0xff]   ;;  %v2622_v57 = vld [vmem:[%s3230_s2 + $0x2c0] sm:$0xff]  }
  0x2d   : > { %2319 = vmatpush3.bf16.msra.mxu0 %v2551_v30  ;;  %v2596_v30 = vld [vmem:[%s3230_s2 + $0x2b8] sm:$0xff]   ;;  %v2616_v51 = vld [vmem:[%s3230_s2 + $0x290] sm:$0xff]   ;;  %v2624_v59 = vld [vmem:[%s3230_s2 + $0x280] sm:$0xff]  }
  0x2e   : > { %2341 = vmatpush3.bf16.msra.mxu1 %v2552_v31  ;;  %2348 = vmatprep.subr.bf16.mxu0 %v2557_v40  ;;  %v2067_v31 = vcombine.low %v2874_v34, %v2874_v34  ;;  %v2600_v34 = vld [vmem:[%s3230_s2 + $0x2b0] sm:$0xff]   ;;  %v2605_v40 = vld [vmem:[%s3230_s2 + $0x260] sm:$0xff]  }
  0x2f   : > { %2370 = vmatprep.subr.bf16.mxu1 %v2558_v45  ;;  %v2610_v45 = vld [vmem:[%s3230_s2 + $0x2d8] sm:$0xff]  }
  0x30   : > { %726 = vmatmul.mubr.bf16.vlgmr.msra.gmra.mxu0 %v475_v58  ;;  %v2623_v58 = vld [vmem:[%s3230_s2 + $0x200] sm:$0xff]  }
  0x31   : > { %766 = vmatmul.mubr.bf16.vlgmr.msra.gmra.mxu1 %v489_v60  ;;  %2349 = vmatpush3.bf16.msra.mxu0 %v2559_v52  ;;  %v2617_v52 = vld [vmem:[%s3230_s2 + $0x248] sm:$0xff]   ;;  %v3089_v60 = vld [vmem:[%s3077_s14] sm:$0xff] }
  0x32   : > { %2371 = vmatpush3.bf16.msra.mxu1 %v2560_v55  ;;  %2350 = vmatprep.subr.bf16.mxu0 %v2561_v56  ;;  %v2620_v55 = vld [vmem:[%s3230_s2 + $0x288] sm:$0xff]   ;;  %v2621_v56 = vld [vmem:[%s3230_s2 + $0x240] sm:$0xff]  }
  0x33   : > { %2372 = vmatprep.subr.bf16.mxu1 %v2562_v61  ;;  %1005 = vmatprep.mubr.bf16.mxu0 %v2066_v63  ;;  %v2166_v61 = vcombine.high %v3089_v60, %v3089_v60 }
  0x34   : > { %1045 = vmatprep.mubr.bf16.mxu1 %v2068_v1  ;;  %v2630_v1 = vld [vmem:[%s3230_s2 + $0x3f8] sm:$0xff]  }
  0x35   : > { %2351 = vmatpush3.bf16.msra.mxu0 %v2563_v62  ;;  %v3094_v62 = vld [vmem:[%s3077_s14 + $0x8] sm:$0xff] }
  0x36   : > { %2373 = vmatpush3.bf16.msra.mxu1 %v2564_v0  ;;  %2352 = vmatprep.subr.bf16.mxu0 %v2565_v2  ;;  %v2168_v63 = vcombine.high %v3094_v62, %v3094_v62  ;;  %v2629_v0 = vld [vmem:[%s3230_s2 + $0x378] sm:$0xff]   ;;  %v2165_v2 = vcombine.low %v3089_v60, %v3089_v60 }
  0x37   : > { %2374 = vmatprep.subr.bf16.mxu1 %v2566_v3  ;;  %v2631_v3 = vld [vmem:[%s3230_s2 + $0x338] sm:$0xff]  }
  0x39   : > { %2353 = vmatpush3.bf16.msra.mxu0 %v2567_v4  ;;  %v2167_v4 = vcombine.low %v3094_v62, %v3094_v62 }
  0x3a   : > { %2375 = vmatpush3.bf16.msra.mxu1 %v2568_v5  ;;  %2354 = vmatprep.subr.bf16.mxu0 %v2569_v6  ;;  %v2632_v5 = vld [vmem:[%s3230_s2 + $0x3b8] sm:$0xff]   ;;  %v2633_v6 = vld [vmem:[%s3230_s2 + $0x370] sm:$0xff]  }
  0x3b   : > { %2376 = vmatprep.subr.bf16.mxu1 %v2570_v7  ;;  %v2634_v7 = vld [vmem:[%s3230_s2 + $0x3f0] sm:$0xff]  }
  0x3d   : > { %2355 = vmatpush3.bf16.msra.mxu0 %v2571_v8  ;;  %v2635_v8 = vld [vmem:[%s3230_s2 + $0x330] sm:$0xff]  }
  0x3e   : > { %2377 = vmatpush3.bf16.msra.mxu1 %v2572_v9  ;;  %2356 = vmatprep.subr.bf16.mxu0 %v2573_v10  ;;  %v2636_v9 = vld [vmem:[%s3230_s2 + $0x3b0] sm:$0xff]   ;;  %v2637_v10 = vld [vmem:[%s3230_s2 + $0x368] sm:$0xff]  }
  0x3f   : > { %2378 = vmatprep.subr.bf16.mxu1 %v2574_v11  ;;  %v2638_v11 = vld [vmem:[%s3230_s2 + $0x3e8] sm:$0xff]  }
  0x41   : > { %2357 = vmatpush3.bf16.msra.mxu0 %v2575_v12  ;;  %v2639_v12 = vld [vmem:[%s3230_s2 + $0x328] sm:$0xff]  }
  0x42   : > { %2379 = vmatpush3.bf16.msra.mxu1 %v2576_v13  ;;  %2358 = vmatprep.subr.bf16.mxu0 %v2577_v14  ;;  %v2640_v13 = vld [vmem:[%s3230_s2 + $0x3a8] sm:$0xff]   ;;  %v2641_v14 = vld [vmem:[%s3230_s2 + $0x360] sm:$0xff]  }
  0x43   : > { %2380 = vmatprep.subr.bf16.mxu1 %v2578_v15  ;;  %v2642_v15 = vld [vmem:[%s3230_s2 + $0x3e0] sm:$0xff]  }
  0x45   : > { %2359 = vmatpush3.bf16.msra.mxu0 %v2579_v16  ;;  %v2643_v16 = vld [vmem:[%s3230_s2 + $0x320] sm:$0xff]  }
  0x46   : > { %2381 = vmatpush3.bf16.msra.mxu1 %v2580_v17  ;;  %2360 = vmatprep.subr.bf16.mxu0 %v2581_v18  ;;  %v2644_v17 = vld [vmem:[%s3230_s2 + $0x3a0] sm:$0xff]   ;;  %v2645_v18 = vld [vmem:[%s3230_s2 + $0x358] sm:$0xff]  }
  0x47   : > { %2382 = vmatprep.subr.bf16.mxu1 %v2582_v19  ;;  %v2646_v19 = vld [vmem:[%s3230_s2 + $0x3d8] sm:$0xff]  }
  0x49   : > { %2361 = vmatpush3.bf16.msra.mxu0 %v2583_v20  ;;  %v2647_v20 = vld [vmem:[%s3230_s2 + $0x318] sm:$0xff]  }
  0x4a   : > { %2383 = vmatpush3.bf16.msra.mxu1 %v2584_v21  ;;  %2362 = vmatprep.subr.bf16.mxu0 %v2585_v22  ;;  %v2648_v21 = vld [vmem:[%s3230_s2 + $0x398] sm:$0xff]   ;;  %v2649_v22 = vld [vmem:[%s3230_s2 + $0x350] sm:$0xff]  }
  0x4b   : > { %2384 = vmatprep.subr.bf16.mxu1 %v2586_v23  ;;  %v2650_v23 = vld [vmem:[%s3230_s2 + $0x3d0] sm:$0xff]  }
  0x4d   : > { %2363 = vmatpush3.bf16.msra.mxu0 %v2587_v24  ;;  %v2651_v24 = vld [vmem:[%s3230_s2 + $0x310] sm:$0xff]  }
  0x4e   : > { %2385 = vmatpush3.bf16.msra.mxu1 %v2588_v25  ;;  %2392 = vmatprep.subr.bf16.mxu0 %v2593_v26  ;;  %v2652_v25 = vld [vmem:[%s3230_s2 + $0x390] sm:$0xff]   ;;  %v2653_v26 = vld [vmem:[%s3230_s2 + $0x348] sm:$0xff]  }
  0x4f   : > { %2414 = vmatprep.subr.bf16.mxu1 %v2594_v27  ;;  %v2654_v27 = vld [vmem:[%s3230_s2 + $0x3c8] sm:$0xff]  }
  0x50   : > { %1006 = vmatmul.mubr.bf16.vlgmr.msra.gmra.mxu0 %v2065_v29  ;;  %v2656_v29 = vld [vmem:[%s3230_s2 + $0x388] sm:$0xff]  }
  0x51   : > { %1046 = vmatmul.mubr.bf16.vlgmr.msra.gmra.mxu1 %v2067_v31  ;;  %2393 = vmatpush3.bf16.msra.mxu0 %v2595_v28  ;;  %v2655_v28 = vld [vmem:[%s3230_s2 + $0x308] sm:$0xff]   ;;  %v2658_v31 = vld [vmem:[%s3230_s2 + $0x3c0] sm:$0xff]  }
  0x52   : > { %2415 = vmatpush3.bf16.msra.mxu1 %v2596_v30  ;;  %2394 = vmatprep.subr.bf16.mxu0 %v2597_v33  ;;  %v2657_v30 = vld [vmem:[%s3230_s2 + $0x340] sm:$0xff]  }
  0x53   : > { %2416 = vmatprep.subr.bf16.mxu1 %v2598_v35  ;;  %1360 = vmatprep.mubr.bf16.mxu0 %v2166_v61  ;;  %v2659_v33 = vld [vmem:[%s3230_s2 + $0x300] sm:$0xff]   ;;  %v1055_v35 = vld [vmem:[%s3077_s14 + $0x10] sm:$0x11] }
  0x54   : > { %1400 = vmatprep.mubr.bf16.mxu1 %v2168_v63 }
  0x55   : > { %2395 = vmatpush3.bf16.msra.mxu0 %v2599_v32  ;;  %v1056_v32 = vld [vmem:[%s3077_s14 + $0x18] sm:$0x11]  ;;  %s1963_s14 = sshll.u32 %s3244_s16, 3 }
  0x56   : > { %2417 = vmatpush3.bf16.msra.mxu1 %v2600_v34  ;;  %2396 = vmatprep.subr.bf16.mxu0 %v2601_v36  ;;  %v2660_v34 = vld [vmem:[%s3230_s2 + $0x380] sm:$0xff]   ;;  %v2265_v36 = vcombine.low %v3089_v60, %v1055_v35  ;;  %s316_s22 = sadd.s32 %s1963_s14, %s3248_s15 }
  0x57   : > { %2418 = vmatprep.subr.bf16.mxu1 %v2602_v37  ;;  %v2266_v37 = vcombine.high %v3089_v60, %v1055_v35  ;;  %s1964_s23 = sshll.u32 %s316_s22, 2 }
  0x58   : > { %s318_s30 = scalar_lea.vmem %s3232_s4, %s1964_s23 }
  0x59   : > { %2397 = vmatpush3.bf16.msra.mxu0 %v2603_v38  ;;  %v2267_v38 = vcombine.low %v3094_v62, %v1056_v32 }
  0x5a   : > { %2419 = vmatpush3.bf16.msra.mxu1 %v2604_v39  ;;  %2398 = vmatprep.subr.bf16.mxu0 %v2605_v40  ;;  %v2268_v39 = vcombine.high %v3094_v62, %v1056_v32  ;;  %v1492_v40 = vshrl.u32 %v2266_v37, 16 }
  0x5b   : > { %2420 = vmatprep.subr.bf16.mxu1 %v2606_v41  ;;  %v1494_v41 = vshll.u32 %v2266_v37, 16  ;;  %v2301_v37 = vld [vmem:[%s3231_s3] ss:$0 sm:$0xff] }
  0x5d   : > { %2399 = vmatpush3.bf16.msra.mxu0 %v2607_v42  ;;  %v1485_v42 = vshrl.u32 %v2265_v36, 16 }
  0x5e   : > { %2421 = vmatpush3.bf16.msra.mxu1 %v2608_v43  ;;  %2400 = vmatprep.subr.bf16.mxu0 %v2609_v44  ;;  %v1487_v43 = vshll.u32 %v2265_v36, 16  ;;  %v1506_v44 = vshrl.u32 %v2268_v39, 16 }
  0x5f   : > { %2422 = vmatprep.subr.bf16.mxu1 %v2610_v45  ;;  %v1508_v45 = vshll.u32 %v2268_v39, 16 }
  0x61   : > { %2401 = vmatpush3.bf16.msra.mxu0 %v2611_v46  ;;  %v1499_v46 = vshrl.u32 %v2267_v38, 16 }
  0x62   : > { %2423 = vmatpush3.bf16.msra.mxu1 %v2612_v47  ;;  %2402 = vmatprep.subr.bf16.mxu0 %v2613_v48  ;;  %v1501_v47 = vshll.u32 %v2267_v38, 16  ;;  %v1496_v48 = vrot.slane %v1494_v41, 1 }
  0x63   : > { %2424 = vmatprep.subr.bf16.mxu1 %v2614_v49  ;;  %v1489_v49 = vrot.slane %v1487_v43, 1 }
  0x65   : > { %2403 = vmatpush3.bf16.msra.mxu0 %v2615_v50  ;;  %v1510_v50 = vrot.slane %v1508_v45, 1 }
  0x66   : > { %2425 = vmatpush3.bf16.msra.mxu1 %v2616_v51  ;;  %2404 = vmatprep.subr.bf16.mxu0 %v2617_v52  ;;  %v1503_v51 = vrot.slane %v1501_v47, 1  ;;  %v1497_v52 = vor.u32 %v1496_v48, %v1492_v40 }
  0x67   : > { %2426 = vmatprep.subr.bf16.mxu1 %v2618_v53  ;;  %v1490_v53 = vor.u32 %v1489_v49, %v1485_v42 }
  0x69   : > { %2405 = vmatpush3.bf16.msra.mxu0 %v2619_v54  ;;  %v1511_v54 = vor.u32 %v1510_v50, %v1506_v44 }
  0x6a   : > { %2427 = vmatpush3.bf16.msra.mxu1 %v2620_v55  ;;  %2406 = vmatprep.subr.bf16.mxu0 %v2621_v56  ;;  %v1504_v55 = vor.u32 %v1503_v51, %v1499_v46 }
  0x6b   : > { %2428 = vmatprep.subr.bf16.mxu1 %v2622_v57 }
  0x6d   : > { %2407 = vmatpush3.bf16.msra.mxu0 %v2623_v58 }
  0x6e   : > { %2429 = vmatpush3.bf16.msra.mxu1 %v2624_v59  ;;  %2436 = vmatprep.subr.bf16.mxu0 %v2629_v0 }
  0x6f   : > { %2458 = vmatprep.subr.bf16.mxu1 %v2630_v1 }
  0x70   : > { %1361 = vmatmul.mubr.bf16.vlgmr.msra.gmra.mxu0 %v2165_v2 }
  0x71   : > { %1401 = vmatmul.mubr.bf16.vlgmr.msra.gmra.mxu1 %v2167_v4  ;;  %2437 = vmatpush3.bf16.msra.mxu0 %v2631_v3 }
  0x72   : > { %2459 = vmatpush3.bf16.msra.mxu1 %v2632_v5  ;;  %2438 = vmatprep.subr.bf16.mxu0 %v2633_v6 }
  0x73   : > { %2460 = vmatprep.subr.bf16.mxu1 %v2634_v7  ;;  %1740 = vmatprep.mubr.bf16.mxu0 %v1497_v52 }
  0x74   : > { %1780 = vmatprep.mubr.bf16.mxu1 %v1511_v54 }
  0x75   : > { %2439 = vmatpush3.bf16.msra.mxu0 %v2635_v8 }
  0x76   : > { %2461 = vmatpush3.bf16.msra.mxu1 %v2636_v9  ;;  %2440 = vmatprep.subr.bf16.mxu0 %v2637_v10 }
  0x77   : > { %2462 = vmatprep.subr.bf16.mxu1 %v2638_v11 }
  0x79   : > { %2441 = vmatpush3.bf16.msra.mxu0 %v2639_v12 }
  0x7a   : > { %2463 = vmatpush3.bf16.msra.mxu1 %v2640_v13  ;;  %2442 = vmatprep.subr.bf16.mxu0 %v2641_v14 }
  0x7b   : > { %2464 = vmatprep.subr.bf16.mxu1 %v2642_v15 }
  0x7d   : > { %2443 = vmatpush3.bf16.msra.mxu0 %v2643_v16 }
  0x7e   : > { %2465 = vmatpush3.bf16.msra.mxu1 %v2644_v17  ;;  %2444 = vmatprep.subr.bf16.mxu0 %v2645_v18 }
  0x7f   : > { %2466 = vmatprep.subr.bf16.mxu1 %v2646_v19 }
  0x81   : > { %2445 = vmatpush3.bf16.msra.mxu0 %v2647_v20 }
  0x82   : > { %2467 = vmatpush3.bf16.msra.mxu1 %v2648_v21  ;;  %2446 = vmatprep.subr.bf16.mxu0 %v2649_v22 }
  0x83   : > { %2468 = vmatprep.subr.bf16.mxu1 %v2650_v23 }
  0x85   : > { %2447 = vmatpush3.bf16.msra.mxu0 %v2651_v24 }
  0x86   : > { %2469 = vmatpush3.bf16.msra.mxu1 %v2652_v25  ;;  %2448 = vmatprep.subr.bf16.mxu0 %v2653_v26 }
  0x87   : > { %2470 = vmatprep.subr.bf16.mxu1 %v2654_v27 }
  0x89   : > { %2449 = vmatpush3.bf16.msra.mxu0 %v2655_v28 }
  0x8a   : > { %2471 = vmatpush3.bf16.msra.mxu1 %v2656_v29  ;;  %2450 = vmatprep.subr.bf16.mxu0 %v2657_v30 }
  0x8b   : > { %2472 = vmatprep.subr.bf16.mxu1 %v2658_v31 }
  0x8d   : > { %2451 = vmatpush3.bf16.msra.mxu0 %v2659_v33 }
  0x8e   : > { %2473 = vmatpush3.bf16.msra.mxu1 %v2660_v34 }
  0x90   : > { %1741 = vmatmul.mubr.bf16.vlgmr.msra.gmra.mxu0 %v1490_v53 }
  0x91   : > { %1781 = vmatmul.mubr.bf16.vlgmr.msra.gmra.mxu1 %v1504_v55 }
  0xf0   : > { %v2320_v56 = vpop.f32.mrf.mxu0 }
  0xf1   : > { %v2342_v57 = vpop.f32.mrf.mxu1 }
  0xf2   : > { %v2321_v58 = vpop.f32.mrf.mxu0 }
  0xf3   : > { %v2322_v59 = vadd.f32 %v2321_v58, %v2320_v56  ;;  %v2343_v60 = vpop.f32.mrf.mxu1 }
  0xf4   : > { %v2344_v61 = vadd.f32 %v2343_v60, %v2342_v57  ;;  %v2323_v62 = vpop.f32.mrf.mxu0 }
  0xf5   : > { %v2345_v63 = vpop.f32.mrf.mxu1 }
  0xf6   : > { %v768_v0 = vadd.f32 %v2344_v61, %v2322_v59  ;;  %v2324_v1 = vpop.f32.mrf.mxu0 }
  0xf7   : > { %v2346_v2 = vpop.f32.mrf.mxu1 }
 0x110   : > { %v2364_v3 = vpop.f32.mrf.mxu0 }
 0x111   : > { %v2386_v4 = vpop.f32.mrf.mxu1 }
 0x112   : > { %v2365_v5 = vpop.f32.mrf.mxu0 }
 0x113   : > { %v2366_v6 = vadd.f32 %v2365_v5, %v2364_v3  ;;  %v2387_v7 = vpop.f32.mrf.mxu1 }
 0x114   : > { %v2388_v8 = vadd.f32 %v2387_v7, %v2386_v4  ;;  %v2367_v9 = vpop.f32.mrf.mxu0 }
 0x115   : > { %v1008_v10 = vadd.f32 %v2366_v6, %v768_v0  ;;  %v2389_v11 = vpop.f32.mrf.mxu1 }
 0x116   : > { %v2368_v12 = vpop.f32.mrf.mxu0 }
 0x117   : > { %v1048_v13 = vadd.f32 %v2388_v8, %v1008_v10  ;;  %v2390_v14 = vpop.f32.mrf.mxu1 }
 0x130   : > { %v2408_v15 = vpop.f32.mrf.mxu0 }
 0x131   : > { %v2430_v16 = vpop.f32.mrf.mxu1 }
 0x132   : > { %v2409_v17 = vpop.f32.mrf.mxu0 }
 0x133   : > { %v2431_v18 = vpop.f32.mrf.mxu1  ;;  %v2410_v23 = vadd.f32 %v2409_v17, %v2408_v15 }
 0x134   : > { %v2411_v19 = vpop.f32.mrf.mxu0  ;;  %v2432_v24 = vadd.f32 %v2431_v18, %v2430_v16 }
 0x135   : > { %v2433_v20 = vpop.f32.mrf.mxu1 }
 0x136   : > { %v2412_v21 = vpop.f32.mrf.mxu0  ;;  %v1403_v27 = vadd.f32 %v2432_v24, %v2410_v23 }
 0x137   : > { %v2434_v22 = vpop.f32.mrf.mxu1 }
 0x138   : > { %v1408_v32 = vadd.f32 %v1403_v27, %v1048_v13 }
 0x150   : > { %v2452_v25 = vpop.f32.mrf.mxu0 }
 0x151   : > { %v2474_v26 = vpop.f32.mrf.mxu1 }
 0x152   : > { %v2453_v28 = vpop.f32.mrf.mxu0 }
 0x153   : > { %v2454_v29 = vadd.f32 %v2453_v28, %v2452_v25  ;;  %v2475_v30 = vpop.f32.mrf.mxu1 }
 0x154   : > { %v2476_v31 = vadd.f32 %v2475_v30, %v2474_v26  ;;  %v2455_v33 = vpop.f32.mrf.mxu0 }
 0x155   : > { %v2477_v35 = vpop.f32.mrf.mxu1 }
 0x156   : > { %v1783_v34 = vadd.f32 %v2476_v31, %v2454_v29  ;;  %v2456_v36 = vpop.f32.mrf.mxu0 }
 0x157   : > { %v2478_v38 = vpop.f32.mrf.mxu1 }
 0x158   : > { %v1788_v39 = vadd.f32 %v1783_v34, %v1408_v32 }
 0x15a   : > { %v1796_v40 = vadd.f32 %v2301_v37, %v1788_v39 }
 0x15c   : > { %v1797_v41 = vmul.f32 0.2, %v1796_v40 }
 0x15e   : > { %v1798_v42 = vmax.f32 %v1796_v40, %v1797_v41 }
 0x160   : > { %v1799_v43 = vpack.c.bf16 %v1798_v42, %v1798_v42 }
 0x162   : > { %1800 = vst [vmem:[%s318_s30] sm:$0xf] %v1799_v43 }
 0x163 PF: > { %s14_s19 = sadd.s32 1, %s2703_s19   ;;  %s3233_s15 = smov %s2695_s17 }
 0x164   : > { %p11_p9 = scmp.ge.s32.totalorder %s14_s19, 18   ;;  %s3234_s16 = smov %s2699_s18 }
 0x165   : > { %s3235_s17 = smov %s3238_s20  ;;  %s3236_s18 = smov %s3242_s21 }
 0x166   :  { %13 = sbr.rel (!%p11_p9) target bundleno = 3 (0x3), region = 78 }

// kernel: discriminator_forward.9
= control target key start
LH: loop header
LB: loop body
LE: loop exit
PB: predicated region body
PF: predicated region fallthrough
CT: control target
= control target key end

     0   :  { %v39_v0 = vlaneseq  ;;  %vm162_vm0 = vcmask 7168   ;;  %s230_s0 = inlined_call_operand.vmem [shape: bf16[8,2048], index: 0, kind: input, shape index: {}]   ;;  %s231_s1 = inlined_call_operand.vmem [shape: f32[1,2048], index: 1, kind: input, shape index: {}]   ;;  %s232_s2 = inlined_call_operand.vmem [shape: f32[8,1], index: 2, kind: output, shape index: {}]  }
   0x1   :  { %v11_v1 = vld [vmem:[%s230_s0] sm:$0xff]  ;;  %v12_v7 = vld [vmem:[%s230_s0 + $0x8] sm:$0xff]  ;;  %v13_v16 = vld [vmem:[%s230_s0 + $0x10] sm:$0xff] }
   0x2   :  { %v190_v2 = vshrl.u32 %v39_v0, 7  ;;  %v35_v3 = vld [vmem:[%s231_s1] sm:$0xff]  ;;  %v19_v8 = vunpack.c.l.bf16 %v11_v1  ;;  %v20_v9 = vunpack.c.h.bf16 %v11_v1  ;;  %v21_v13 = vunpack.c.l.bf16 %v12_v7  ;;  %v14_v26 = vld [vmem:[%s230_s0 + $0x18] sm:$0xff]  ;;  %v36_v37 = vld [vmem:[%s231_s1 + $0x8] sm:$0xff] }
   0x3   :  { %v22_v17 = vunpack.c.h.bf16 %v12_v7  ;;  %v23_v22 = vunpack.c.l.bf16 %v13_v16  ;;  %v24_v27 = vunpack.c.h.bf16 %v13_v16  ;;  %v25_v32 = vunpack.c.l.bf16 %v14_v26  ;;  %v15_v36 = vld [vmem:[%s230_s0 + $0x20] sm:$0xff]  ;;  %v16_v46 = vld [vmem:[%s230_s0 + $0x28] sm:$0xff]  ;;  %v17_v55 = vld [vmem:[%s230_s0 + $0x30] sm:$0xff] }
   0x4   :  { %v41_v4 = vsub.s32 0, %v190_v2  ;;  %v45_v5 = vsub.s32 1, %v190_v2  ;;  %v49_v6 = vsub.s32 2, %v190_v2  ;;  %v53_v12 = vsub.s32 3, %v190_v2  ;;  %v18_v0 = vld [vmem:[%s230_s0 + $0x38] sm:$0xff] }
   0x5   :  { %v57_v15 = vsub.s32 4, %v190_v2  ;;  %v61_v19 = vsub.s32 5, %v190_v2  ;;  %v65_v24 = vsub.s32 6, %v190_v2  ;;  %v69_v29 = vsub.s32 7, %v190_v2 }
   0x6   :  { %v42_v10 = vrot.slane %v35_v3, %v41_v4  ;;  %v46_v11 = vrot.slane %v35_v3, %v45_v5  ;;  %v50_v14 = vrot.slane %v35_v3, %v49_v6  ;;  %v54_v18 = vrot.slane %v35_v3, %v53_v12 }
   0x7   :  { %v58_v23 = vrot.slane %v35_v3, %v57_v15  ;;  %v62_v28 = vrot.slane %v35_v3, %v61_v19  ;;  %v66_v33 = vrot.slane %v35_v3, %v65_v24  ;;  %v26_v38 = vunpack.c.h.bf16 %v14_v26 }
   0x8   :  { %v119_v20 = vmul.f32 %v42_v10, %v19_v8  ;;  %v120_v21 = vmul.f32 %v46_v11, %v20_v9  ;;  %v121_v25 = vmul.f32 %v50_v14, %v21_v13  ;;  %v122_v30 = vmul.f32 %v54_v18, %v22_v17 }
   0x9   :  { %v123_v34 = vmul.f32 %v58_v23, %v23_v22  ;;  %v70_v39 = vrot.slane %v35_v3, %v69_v29  ;;  %v124_v40 = vmul.f32 %v62_v28, %v24_v27  ;;  %v27_v42 = vunpack.c.l.bf16 %v15_v36 }
   0xa   :  { %v135_v31 = vadd.f32 %v120_v21, %v119_v20  ;;  %v74_v43 = vrot.slane %v36_v37, %v41_v4  ;;  %v125_v44 = vmul.f32 %v66_v33, %v25_v32  ;;  %v28_v47 = vunpack.c.h.bf16 %v15_v36 }
   0xb   :  { %v78_v48 = vrot.slane %v36_v37, %v45_v5  ;;  %v126_v49 = vmul.f32 %v70_v39, %v26_v38  ;;  %v29_v51 = vunpack.c.l.bf16 %v16_v46  ;;  %v82_v52 = vrot.slane %v36_v37, %v49_v6 }
   0xc   :  { %v136_v35 = vadd.f32 %v135_v31, %v121_v25  ;;  %v127_v53 = vmul.f32 %v74_v43, %v27_v42  ;;  %v30_v56 = vunpack.c.h.bf16 %v16_v46  ;;  %v86_v57 = vrot.slane %v36_v37, %v53_v12 }
   0xd   :  { %v128_v58 = vmul.f32 %v78_v48, %v28_v47  ;;  %v31_v60 = vunpack.c.l.bf16 %v17_v55  ;;  %v90_v61 = vrot.slane %v36_v37, %v57_v15  ;;  %v129_v62 = vmul.f32 %v82_v52, %v29_v51 }
   0xe   :  { %v137_v41 = vadd.f32 %v136_v35, %v122_v30  ;;  %v32_v1 = vunpack.c.h.bf16 %v17_v55  ;;  %v94_v2 = vrot.slane %v36_v37, %v61_v19  ;;  %v130_v3 = vmul.f32 %v86_v57, %v30_v56 }
   0xf   :  { %v33_v5 = vunpack.c.l.bf16 %v18_v0  ;;  %v98_v6 = vrot.slane %v36_v37, %v65_v24  ;;  %v131_v7 = vmul.f32 %v90_v61, %v31_v60  ;;  %v34_v9 = vunpack.c.h.bf16 %v18_v0 }
  0x10   :  { %v138_v45 = vadd.f32 %v137_v41, %v123_v34  ;;  %v102_v10 = vrot.slane %v36_v37, %v69_v29  ;;  %v132_v11 = vmul.f32 %v94_v2, %v32_v1 }
  0x11   :  { %v133_v13 = vmul.f32 %v98_v6, %v33_v5 }
  0x12   :  { %v139_v50 = vadd.f32 %v138_v45, %v124_v40  ;;  %v134_v15 = vmul.f32 %v102_v10, %v34_v9 }
  0x14   :  { %v140_v54 = vadd.f32 %v139_v50, %v125_v44 }
  0x16   :  { %v141_v59 = vadd.f32 %v140_v54, %v126_v49 }
  0x18   :  { %v142_v63 = vadd.f32 %v141_v59, %v127_v53 }
  0x1a   :  { %v143_v4 = vadd.f32 %v142_v63, %v128_v58 }
  0x1c   :  { %v144_v8 = vadd.f32 %v143_v4, %v129_v62 }
  0x1e   :  { %v145_v12 = vadd.f32 %v144_v8, %v130_v3 }
  0x20   :  { %v146_v14 = vadd.f32 %v145_v12, %v131_v7 }
  0x22   :  { %v147_v16 = vadd.f32 %v146_v14, %v132_v11 }
  0x24   :  { %v148_v17 = vadd.f32 %v147_v16, %v133_v13 }
  0x26   :  { %v149_v18 = vadd.f32 %v148_v17, %v134_v15 }
  0x28   :  { %150 = vadd.xlane.f32.xlu0 %v149_v18 }
  0xb1   :  { %v151_v20 = vpop.xlane.xlu0 %150 }
  0xb2   :  { %v152_v21 = vand.u32 2147483647, %v151_v20  ;;  %vm156_vm1 = vcmp.ge.f32.partialorder %v151_v20, 0.0 }
  0xb4   :  { %v153_v19 = vsub.f32 0.0, %v152_v21 }
  0xb6   :  { %v154_v22 = vmul.f32 1.442695, %v153_v19 }
  0xb8   :  { %168 = vpow2.f32 %v154_v22 }
  0xc5   :  { %v169_v23 = vpop.eup %168 }
  0xc6   :  { %v157_v24 = vadd.f32 1.0, %v169_v23 }
  0xc8   :  { %170 = vrcp.f32 %v157_v24 }
  0xd5   :  { %v171_v25 = vpop.eup %170 }
  0xd6   :  { %v160_v26 = vmul.f32 %v171_v25, %v169_v23 }
  0xd8   :  { %v161_v27 = vsel %vm156_vm1, %v171_v25, %v160_v26 }
  0xd9   :  { %163 = vst.msk [vmem:[%s232_s2] sm:$0xff] %vm162_vm0, %v161_v27 }

// kernel: discriminator_forward.8
= control target key start
LH: loop header
LB: loop body
LE: loop exit
PB: predicated region body
PF: predicated region fallthrough
CT: control target
= control target key end

     0   :  { %s2690_s15 = smov 0   ;;  %s2692_s16 = smov 0   ;;  %s3170_s0 = inlined_call_operand.vmem [shape: bf16[2,5,5,512], index: 0, kind: input, shape index: {}, may-alias: {0,1}]   ;;  %s3171_s1 = inlined_call_operand.vmem [shape: bf16[2,5,5,512], index: 1, kind: input, shape index: {}, may-alias: {0,1}]   ;;  %s3172_s2 = inlined_call_operand.vmem [shape: bf16[4,512,128], index: 2, kind: input, shape index: {}]   ;;  %s3173_s3 = inlined_call_operand.vmem [shape: f32[1,128], index: 3, kind: input, shape index: {}]   ;;  %s3174_s4 = inlined_call_operand.vmem [shape: bf16[2,4,4,128], index: 4, kind: output, shape index: {}]  }
   0x1   :  { %s2694_s17 = smov 0   ;;  %s2696_s18 = smov 0  }
   0x2   :  { %s2698_s19 = smov 0  }
   0x3 LB: > { %s26_s20 = sadd.s32 1, %s2655_s17  ;;  %s29_s21 = sadd.s32 1, %s2659_s18  ;;  %s2663_s19 = sphi %s2698_s19, %s14_s19   ;;  %s2659_s18 = sphi %s2696_s18, %s3178_s18   ;;  %s2655_s17 = sphi %s2694_s17, %s3177_s17   ;;  %s2651_s16 = sphi %s2692_s16, %s3176_s16   ;;  %s2647_s15 = sphi %s2690_s15, %s3175_s15  }
   0x4   : > { %p27_p0 = scmp.ge.s32.totalorder %s26_s20, 4  ;;  %p1934_p1 = scmp.ge.s32.totalorder %s2663_s19, 1 }
   0x5   : > { %p228_p2 = scmp.lt.s32.totalorder %s2663_s19, 9 }
   0x6   : > { %s3180_s20 = smov (%p27_p0, %s26_s20), 0  ;;  %s3182_s21 = smov (!%p27_p0, %s29_s21), %s2659_s18 }
   0x7   : > { %p229_p3 = pnand %p1934_p1, %p228_p2  ;;  %p31_p4 = scmp.ge.s32.totalorder %s3182_s21, 2 }
   0x8   : > { %p281_p5 = scmp.lt.s32.totalorder (!%p229_p3), %s2651_s16, 1  ;;  %p283_p6 = scmp.lt.s32.totalorder (!%p229_p3), %s2647_s15, 4 }
   0x9   : > { %s3184_s21 = smov (%p31_p4, %s3182_s21), 0  ;;  %232 = sbr.rel (%p229_p3) target bundleno = 355 (0x163), region = 36 }
   0xa   : > { %s290_s30 = sadd.s32 (!%p229_p3), 1, %s2647_s15  ;;  %p310_p8 = scmp.lt.s32.totalorder (!%p229_p3), %s2647_s15, 3 }
   0xb   : > { %p293_p7 = scmp.lt.s32.totalorder (!%p229_p3), %s290_s30, 4 }
   0xe   : > { %v2489_v0 = vld [vmem:[%s3172_s2 + $0x178] sm:$0xff]   ;;  %v2493_v4 = vld [vmem:[%s3172_s2 + $0x170] sm:$0xff]   ;;  %v2497_v8 = vld [vmem:[%s3172_s2 + $0x168] sm:$0xff]   ;;  %s3186_s16 = smov (!%p281_p5, %s2651_s16), 1  ;;  %s3188_s30 = smov (!%p293_p7, %s290_s30), 4 }
   0xf   : > { %v2490_v1 = vld [vmem:[%s3172_s2 + $0x1f8] sm:$0xff]   ;;  %2272 = vmatprep.subr.bf16.mxu0 %v2489_v0  ;;  %v2494_v5 = vld [vmem:[%s3172_s2 + $0x1f0] sm:$0xff]   ;;  %v2498_v9 = vld [vmem:[%s3172_s2 + $0x1e8] sm:$0xff]   ;;  %s284_s11 = scalar_select %p283_p6, %s2647_s15, 4 }
  0x10   : > { %v2491_v2 = vld [vmem:[%s3172_s2 + $0x138] sm:$0xff]   ;;  %2294 = vmatprep.subr.bf16.mxu1 %v2490_v1  ;;  %v2495_v6 = vld [vmem:[%s3172_s2 + $0x130] sm:$0xff]   ;;  %v2499_v10 = vld [vmem:[%s3172_s2 + $0x128] sm:$0xff]   ;;  %s2448_s25 = smul.u32 20, %s3186_s16  ;;  %s1937_s10 = sshll.u32 %s3188_s30, 2 }
  0x11   : > { %v2492_v3 = vld [vmem:[%s3172_s2 + $0x1b8] sm:$0xff]   ;;  %2273 = vmatpush3.bf16.msra.mxu0 %v2491_v2  ;;  %v2496_v7 = vld [vmem:[%s3172_s2 + $0x1b0] sm:$0xff]   ;;  %v2500_v11 = vld [vmem:[%s3172_s2 + $0x1a8] sm:$0xff]   ;;  %s1935_s28 = sshll.u32 %s284_s11, 2  ;;  %s3190_s15 = smov (!%p310_p8, %s2647_s15), 3 }
  0x12   : > { %2295 = vmatpush3.bf16.msra.mxu1 %v2492_v3  ;;  %2274 = vmatprep.subr.bf16.mxu0 %v2493_v4  ;;  %v2501_v12 = vld [vmem:[%s3172_s2 + $0x160] sm:$0xff]   ;;  %v2505_v16 = vld [vmem:[%s3172_s2 + $0x158] sm:$0xff]   ;;  %v2509_v20 = vld [vmem:[%s3172_s2 + $0x150] sm:$0xff]   ;;  %s287_s9 = sadd.s32 %s2448_s25, %s1935_s28  ;;  %s297_s24 = sadd.s32 %s2448_s25, %s1937_s10 }
  0x13   : > { %2296 = vmatprep.subr.bf16.mxu1 %v2494_v5  ;;  %v2502_v13 = vld [vmem:[%s3172_s2 + $0x1e0] sm:$0xff]   ;;  %v2506_v17 = vld [vmem:[%s3172_s2 + $0x1d8] sm:$0xff]   ;;  %v2510_v21 = vld [vmem:[%s3172_s2 + $0x1d0] sm:$0xff]   ;;  %s1936_s23 = sshll.u32 %s287_s9, 2  ;;  %s1938_s6 = sshll.u32 %s297_s24, 2 }
  0x14   : > { %v2503_v14 = vld [vmem:[%s3172_s2 + $0x120] sm:$0xff]   ;;  %v2507_v18 = vld [vmem:[%s3172_s2 + $0x118] sm:$0xff]   ;;  %v2511_v22 = vld [vmem:[%s3172_s2 + $0x110] sm:$0xff]   ;;  %s289_s7 = scalar_lea.vmem %s3170_s0, %s1936_s23  ;;  %s299_s14 = scalar_lea.vmem %s3171_s1, %s1938_s6 }
  0x15   : > { %2275 = vmatpush3.bf16.msra.mxu0 %v2495_v6  ;;  %v2504_v15 = vld [vmem:[%s3172_s2 + $0x1a0] sm:$0xff]   ;;  %v2508_v19 = vld [vmem:[%s3172_s2 + $0x198] sm:$0xff]   ;;  %v2512_v23 = vld [vmem:[%s3172_s2 + $0x190] sm:$0xff]   ;;  %s1939_s9 = sshll.u32 %s3186_s16, 2 }
  0x16   : > { %2297 = vmatpush3.bf16.msra.mxu1 %v2496_v7  ;;  %2276 = vmatprep.subr.bf16.mxu0 %v2497_v8  ;;  %v2513_v24 = vld [vmem:[%s3172_s2 + $0x148] sm:$0xff]   ;;  %v2517_v28 = vld [vmem:[%s3172_s2 + $0x140] sm:$0xff]   ;;  %v2525_v38 = vld [vmem:[%s3172_s2 + $0x78] sm:$0xff]   ;;  %s316_s12 = sadd.s32 %s1939_s9, %s3190_s15 }
  0x17   : > { %2298 = vmatprep.subr.bf16.mxu1 %v2498_v9  ;;  %v2514_v25 = vld [vmem:[%s3172_s2 + $0x1c8] sm:$0xff]   ;;  %v2518_v29 = vld [vmem:[%s3172_s2 + $0x1c0] sm:$0xff]   ;;  %v2526_v39 = vld [vmem:[%s3172_s2 + $0xf8] sm:$0xff]   ;;  %s1940_s13 = sshll.u32 %s316_s12, 1 }
  0x18   : > { %v2515_v26 = vld [vmem:[%s3172_s2 + $0x108] sm:$0xff]   ;;  %v2519_v30 = vld [vmem:[%s3172_s2 + $0x100] sm:$0xff]   ;;  %v2527_v50 = vld [vmem:[%s3172_s2 + $0x38] sm:$0xff]   ;;  %s318_s23 = scalar_lea.vmem %s3174_s4, %s1940_s13 }
  0x19   : > { %2277 = vmatpush3.bf16.msra.mxu0 %v2499_v10  ;;  %v2516_v27 = vld [vmem:[%s3172_s2 + $0x188] sm:$0xff]   ;;  %v2520_v31 = vld [vmem:[%s3172_s2 + $0x180] sm:$0xff]   ;;  %v2528_v51 = vld [vmem:[%s3172_s2 + $0xb8] sm:$0xff]  }
  0x1a   : > { %2299 = vmatpush3.bf16.msra.mxu1 %v2500_v11  ;;  %2278 = vmatprep.subr.bf16.mxu0 %v2501_v12  ;;  %v320_v32 = vld [vmem:[%s289_s7] sm:$0x77]  ;;  %v321_v33 = vld [vmem:[%s289_s7 + $0x8] sm:$0x77]  ;;  %v2529_v56 = vld [vmem:[%s3172_s2 + $0x70] sm:$0xff]  }
  0x1b   : > { %2300 = vmatprep.subr.bf16.mxu1 %v2502_v13  ;;  %v2832_v34 = vcombine.low %v320_v32, %v320_v32  ;;  %v2006_v35 = vcombine.high %v320_v32, %v320_v32  ;;  %v2834_v36 = vcombine.low %v321_v33, %v321_v33  ;;  %v2008_v37 = vcombine.high %v321_v33, %v321_v33  ;;  %v2530_v59 = vld [vmem:[%s3172_s2 + $0xf0] sm:$0xff]   ;;  %v2533_v62 = vld [vmem:[%s3172_s2 + $0x68] sm:$0xff]   ;;  %v2537_v2 = vld [vmem:[%s3172_s2 + $0x60] sm:$0xff]  }
  0x1c   : > { %v2531_v60 = vld [vmem:[%s3172_s2 + $0x30] sm:$0xff]   ;;  %v2534_v63 = vld [vmem:[%s3172_s2 + $0xe8] sm:$0xff]   ;;  %v2538_v3 = vld [vmem:[%s3172_s2 + $0xe0] sm:$0xff]  }
  0x1d   : > { %2279 = vmatpush3.bf16.msra.mxu0 %v2503_v14  ;;  %v469_v40 = vshrl.u32 %v2006_v35, 16  ;;  %v471_v41 = vshll.u32 %v2006_v35, 16  ;;  %v483_v42 = vshrl.u32 %v2008_v37, 16  ;;  %v485_v43 = vshll.u32 %v2008_v37, 16  ;;  %v2532_v61 = vld [vmem:[%s3172_s2 + $0xb0] sm:$0xff]   ;;  %v2535_v0 = vld [vmem:[%s3172_s2 + $0x28] sm:$0xff]  }
  0x1e   : > { %2301 = vmatpush3.bf16.msra.mxu1 %v2504_v15  ;;  %2280 = vmatprep.subr.bf16.mxu0 %v2505_v16  ;;  %v462_v44 = vshrl.u32 %v2832_v34, 16  ;;  %v464_v45 = vshll.u32 %v2832_v34, 16  ;;  %v476_v46 = vshrl.u32 %v2834_v36, 16  ;;  %v478_v47 = vshll.u32 %v2834_v36, 16  ;;  %v2536_v1 = vld [vmem:[%s3172_s2 + $0xa8] sm:$0xff]   ;;  %v2539_v4 = vld [vmem:[%s3172_s2 + $0x20] sm:$0xff]  }
  0x1f   : > { %2302 = vmatprep.subr.bf16.mxu1 %v2506_v17  ;;  %v473_v48 = vrot.slane %v471_v41, 1  ;;  %v487_v49 = vrot.slane %v485_v43, 1  ;;  %v2540_v5 = vld [vmem:[%s3172_s2 + $0xa0] sm:$0xff]   ;;  %v2541_v6 = vld [vmem:[%s3172_s2 + $0x58] sm:$0xff]   ;;  %v2545_v10 = vld [vmem:[%s3172_s2 + $0x50] sm:$0xff]  }
  0x20   : > { %v466_v52 = vrot.slane %v464_v45, 1  ;;  %v480_v53 = vrot.slane %v478_v47, 1  ;;  %v2542_v7 = vld [vmem:[%s3172_s2 + $0xd8] sm:$0xff]   ;;  %v2546_v11 = vld [vmem:[%s3172_s2 + $0xd0] sm:$0xff]   ;;  %v2549_v14 = vld [vmem:[%s3172_s2 + $0x48] sm:$0xff]  }
  0x21   : > { %2281 = vmatpush3.bf16.msra.mxu0 %v2507_v18  ;;  %v474_v54 = vor.u32 %v473_v48, %v469_v40  ;;  %v488_v55 = vor.u32 %v487_v49, %v483_v42  ;;  %v2543_v8 = vld [vmem:[%s3172_s2 + $0x18] sm:$0xff]   ;;  %v2547_v12 = vld [vmem:[%s3172_s2 + $0x10] sm:$0xff]   ;;  %v2550_v15 = vld [vmem:[%s3172_s2 + $0xc8] sm:$0xff]  }
  0x22   : > { %2303 = vmatpush3.bf16.msra.mxu1 %v2508_v19  ;;  %2282 = vmatprep.subr.bf16.mxu0 %v2509_v20  ;;  %v467_v57 = vor.u32 %v466_v52, %v462_v44  ;;  %v481_v58 = vor.u32 %v480_v53, %v476_v46  ;;  %v2544_v9 = vld [vmem:[%s3172_s2 + $0x98] sm:$0xff]   ;;  %v2548_v13 = vld [vmem:[%s3172_s2 + $0x90] sm:$0xff]   ;;  %v2551_v16 = vld [vmem:[%s3172_s2 + $0x8] sm:$0xff]  }
  0x23   : > { %2304 = vmatprep.subr.bf16.mxu1 %v2510_v21  ;;  %717 = vmatprep.mubr.bf16.mxu0 %v474_v54  ;;  %v2552_v17 = vld [vmem:[%s3172_s2 + $0x88] sm:$0xff]   ;;  %v2553_v18 = vld [vmem:[%s3172_s2 + $0x40] sm:$0xff]   ;;  %v2575_v40 = vld [vmem:[%s3172_s2 + $0x218] sm:$0xff]  }
  0x24   : > { %757 = vmatprep.mubr.bf16.mxu1 %v488_v55  ;;  %v2554_v19 = vld [vmem:[%s3172_s2 + $0xc0] sm:$0xff]   ;;  %v2567_v32 = vld [vmem:[%s3172_s2 + $0x228] sm:$0xff]   ;;  %v2576_v41 = vld [vmem:[%s3172_s2 + $0x298] sm:$0xff]  }
  0x25   : > { %2283 = vmatpush3.bf16.msra.mxu0 %v2511_v22  ;;  %v2555_v20 = vld [vmem:[%s3172_s2] sm:$0xff]   ;;  %v2557_v22 = vld [vmem:[%s3172_s2 + $0x278] sm:$0xff]   ;;  %v2568_v33 = vld [vmem:[%s3172_s2 + $0x2a8] sm:$0xff]  }
  0x26   : > { %2305 = vmatpush3.bf16.msra.mxu1 %v2512_v23  ;;  %2284 = vmatprep.subr.bf16.mxu0 %v2513_v24  ;;  %v2556_v21 = vld [vmem:[%s3172_s2 + $0x80] sm:$0xff]   ;;  %v2558_v23 = vld [vmem:[%s3172_s2 + $0x2f8] sm:$0xff]   ;;  %v2577_v42 = vld [vmem:[%s3172_s2 + $0x250] sm:$0xff]  }
  0x27   : > { %2306 = vmatprep.subr.bf16.mxu1 %v2514_v25  ;;  %v2559_v24 = vld [vmem:[%s3172_s2 + $0x238] sm:$0xff]   ;;  %v2578_v43 = vld [vmem:[%s3172_s2 + $0x2d0] sm:$0xff]   ;;  %v2581_v46 = vld [vmem:[%s3172_s2 + $0x248] sm:$0xff]  }
  0x28   : > { %v2560_v25 = vld [vmem:[%s3172_s2 + $0x2b8] sm:$0xff]   ;;  %v2579_v44 = vld [vmem:[%s3172_s2 + $0x210] sm:$0xff]   ;;  %v2582_v47 = vld [vmem:[%s3172_s2 + $0x2c8] sm:$0xff]  }
  0x29   : > { %2285 = vmatpush3.bf16.msra.mxu0 %v2515_v26  ;;  %v2561_v26 = vld [vmem:[%s3172_s2 + $0x270] sm:$0xff]   ;;  %v2583_v48 = vld [vmem:[%s3172_s2 + $0x208] sm:$0xff]   ;;  %v2587_v52 = vld [vmem:[%s3172_s2 + $0x200] sm:$0xff]  }
  0x2a   : > { %2307 = vmatpush3.bf16.msra.mxu1 %v2516_v27  ;;  %2286 = vmatprep.subr.bf16.mxu0 %v2517_v28  ;;  %v2562_v27 = vld [vmem:[%s3172_s2 + $0x2f0] sm:$0xff]   ;;  %v2584_v49 = vld [vmem:[%s3172_s2 + $0x288] sm:$0xff]   ;;  %v2588_v53 = vld [vmem:[%s3172_s2 + $0x280] sm:$0xff]  }
  0x2b   : > { %2308 = vmatprep.subr.bf16.mxu1 %v2518_v29  ;;  %v2563_v28 = vld [vmem:[%s3172_s2 + $0x230] sm:$0xff]   ;;  %v1041_v54 = vld [vmem:[%s299_s14] sm:$0x77]  ;;  %v1042_v55 = vld [vmem:[%s299_s14 + $0x8] sm:$0x77] }
  0x2c   : > { %v2564_v29 = vld [vmem:[%s3172_s2 + $0x2b0] sm:$0xff]  }
  0x2d   : > { %2287 = vmatpush3.bf16.msra.mxu0 %v2519_v30  ;;  %v2565_v30 = vld [vmem:[%s3172_s2 + $0x268] sm:$0xff]   ;;  %v2580_v45 = vld [vmem:[%s3172_s2 + $0x290] sm:$0xff]  }
  0x2e   : > { %2309 = vmatpush3.bf16.msra.mxu1 %v2520_v31  ;;  %2316 = vmatprep.subr.bf16.mxu0 %v2525_v38  ;;  %v2566_v31 = vld [vmem:[%s3172_s2 + $0x2e8] sm:$0xff]   ;;  %v2573_v38 = vld [vmem:[%s3172_s2 + $0x258] sm:$0xff]  }
  0x2f   : > { %2338 = vmatprep.subr.bf16.mxu1 %v2526_v39  ;;  %v2574_v39 = vld [vmem:[%s3172_s2 + $0x2d8] sm:$0xff]  }
  0x30   : > { %718 = vmatmul.mubr.bf16.vlgmr.msra.gmra.mxu0 %v467_v57  ;;  %v2593_v57 = vld [vmem:[%s3172_s2 + $0x378] sm:$0xff]  }
  0x31   : > { %758 = vmatmul.mubr.bf16.vlgmr.msra.gmra.mxu1 %v481_v58  ;;  %2317 = vmatpush3.bf16.msra.mxu0 %v2527_v50  ;;  %v2585_v50 = vld [vmem:[%s3172_s2 + $0x240] sm:$0xff]   ;;  %v2140_v58 = vcombine.high %v1042_v55, %v1042_v55 }
  0x32   : > { %2339 = vmatpush3.bf16.msra.mxu1 %v2528_v51  ;;  %2318 = vmatprep.subr.bf16.mxu0 %v2529_v56  ;;  %v2586_v51 = vld [vmem:[%s3172_s2 + $0x2c0] sm:$0xff]   ;;  %v2138_v56 = vcombine.high %v1041_v54, %v1041_v54 }
  0x33   : > { %2340 = vmatprep.subr.bf16.mxu1 %v2530_v59  ;;  %993 = vmatprep.mubr.bf16.mxu0 %v2006_v35  ;;  %v2570_v35 = vld [vmem:[%s3172_s2 + $0x2e0] sm:$0xff]   ;;  %v2594_v59 = vld [vmem:[%s3172_s2 + $0x3f8] sm:$0xff]  }
  0x34   : > { %1033 = vmatprep.mubr.bf16.mxu1 %v2008_v37  ;;  %v2572_v37 = vld [vmem:[%s3172_s2 + $0x2a0] sm:$0xff]  }
  0x35   : > { %2319 = vmatpush3.bf16.msra.mxu0 %v2531_v60  ;;  %v2595_v60 = vld [vmem:[%s3172_s2 + $0x338] sm:$0xff]  }
  0x36   : > { %2341 = vmatpush3.bf16.msra.mxu1 %v2532_v61  ;;  %2320 = vmatprep.subr.bf16.mxu0 %v2533_v62  ;;  %v1468_v61 = vshrl.u32 %v2138_v56, 16  ;;  %v3049_v62 = vcombine.low %v1041_v54, %v1041_v54 }
  0x37   : > { %2342 = vmatprep.subr.bf16.mxu1 %v2534_v63  ;;  %v3051_v63 = vcombine.low %v1042_v55, %v1042_v55 }
  0x39   : > { %2321 = vmatpush3.bf16.msra.mxu0 %v2535_v0  ;;  %v2596_v0 = vld [vmem:[%s3172_s2 + $0x3b8] sm:$0xff]  }
  0x3a   : > { %2343 = vmatpush3.bf16.msra.mxu1 %v2536_v1  ;;  %2322 = vmatprep.subr.bf16.mxu0 %v2537_v2  ;;  %v1470_v1 = vshll.u32 %v2138_v56, 16  ;;  %v2597_v2 = vld [vmem:[%s3172_s2 + $0x370] sm:$0xff]  }
  0x3b   : > { %2344 = vmatprep.subr.bf16.mxu1 %v2538_v3  ;;  %v1482_v3 = vshrl.u32 %v2140_v58, 16 }
  0x3d   : > { %2323 = vmatpush3.bf16.msra.mxu0 %v2539_v4  ;;  %v2598_v4 = vld [vmem:[%s3172_s2 + $0x3f0] sm:$0xff]  }
  0x3e   : > { %2345 = vmatpush3.bf16.msra.mxu1 %v2540_v5  ;;  %2324 = vmatprep.subr.bf16.mxu0 %v2541_v6  ;;  %v1472_v5 = vrot.slane %v1470_v1, 1  ;;  %v2599_v6 = vld [vmem:[%s3172_s2 + $0x330] sm:$0xff]  }
  0x3f   : > { %2346 = vmatprep.subr.bf16.mxu1 %v2542_v7  ;;  %v1484_v7 = vshll.u32 %v2140_v58, 16 }
  0x41   : > { %2325 = vmatpush3.bf16.msra.mxu0 %v2543_v8  ;;  %v2600_v8 = vld [vmem:[%s3172_s2 + $0x3b0] sm:$0xff]  }
  0x42   : > { %2347 = vmatpush3.bf16.msra.mxu1 %v2544_v9  ;;  %2326 = vmatprep.subr.bf16.mxu0 %v2545_v10  ;;  %v1473_v9 = vor.u32 %v1472_v5, %v1468_v61  ;;  %v2601_v10 = vld [vmem:[%s3172_s2 + $0x368] sm:$0xff]  }
  0x43   : > { %2348 = vmatprep.subr.bf16.mxu1 %v2546_v11  ;;  %v1486_v11 = vrot.slane %v1484_v7, 1 }
  0x45   : > { %2327 = vmatpush3.bf16.msra.mxu0 %v2547_v12  ;;  %v2602_v12 = vld [vmem:[%s3172_s2 + $0x3e8] sm:$0xff]  }
  0x46   : > { %2349 = vmatpush3.bf16.msra.mxu1 %v2548_v13  ;;  %2328 = vmatprep.subr.bf16.mxu0 %v2549_v14  ;;  %v2603_v13 = vld [vmem:[%s3172_s2 + $0x328] sm:$0xff]   ;;  %v1487_v14 = vor.u32 %v1486_v11, %v1482_v3 }
  0x47   : > { %2350 = vmatprep.subr.bf16.mxu1 %v2550_v15  ;;  %v2604_v15 = vld [vmem:[%s3172_s2 + $0x3a8] sm:$0xff]  }
  0x49   : > { %2329 = vmatpush3.bf16.msra.mxu0 %v2551_v16  ;;  %v2605_v16 = vld [vmem:[%s3172_s2 + $0x360] sm:$0xff]  }
  0x4a   : > { %2351 = vmatpush3.bf16.msra.mxu1 %v2552_v17  ;;  %2330 = vmatprep.subr.bf16.mxu0 %v2553_v18  ;;  %v2606_v17 = vld [vmem:[%s3172_s2 + $0x3e0] sm:$0xff]  }
  0x4b   : > { %2352 = vmatprep.subr.bf16.mxu1 %v2554_v19  ;;  %v2607_v18 = vld [vmem:[%s3172_s2 + $0x320] sm:$0xff]  }
  0x4c   : > { %v2608_v19 = vld [vmem:[%s3172_s2 + $0x3a0] sm:$0xff]  }
  0x4d   : > { %2331 = vmatpush3.bf16.msra.mxu0 %v2555_v20  ;;  %v2609_v20 = vld [vmem:[%s3172_s2 + $0x358] sm:$0xff]  }
  0x4e   : > { %2353 = vmatpush3.bf16.msra.mxu1 %v2556_v21  ;;  %2360 = vmatprep.subr.bf16.mxu0 %v2557_v22  ;;  %v2610_v21 = vld [vmem:[%s3172_s2 + $0x3d8] sm:$0xff]  }
  0x4f   : > { %2382 = vmatprep.subr.bf16.mxu1 %v2558_v23  ;;  %v2611_v22 = vld [vmem:[%s3172_s2 + $0x318] sm:$0xff]  }
  0x50   : > { %994 = vmatmul.mubr.bf16.vlgmr.msra.gmra.mxu0 %v2832_v34  ;;  %v2569_v34 = vld [vmem:[%s3172_s2 + $0x260] sm:$0xff]   ;;  %v2612_v23 = vld [vmem:[%s3172_s2 + $0x398] sm:$0xff]  }
  0x51   : > { %1034 = vmatmul.mubr.bf16.vlgmr.msra.gmra.mxu1 %v2834_v36  ;;  %2361 = vmatpush3.bf16.msra.mxu0 %v2559_v24  ;;  %v2571_v36 = vld [vmem:[%s3172_s2 + $0x220] sm:$0xff]   ;;  %v2613_v24 = vld [vmem:[%s3172_s2 + $0x350] sm:$0xff]  }
  0x52   : > { %2383 = vmatpush3.bf16.msra.mxu1 %v2560_v25  ;;  %2362 = vmatprep.subr.bf16.mxu0 %v2561_v26  ;;  %v2614_v25 = vld [vmem:[%s3172_s2 + $0x3d0] sm:$0xff]  }
  0x53   : > { %2384 = vmatprep.subr.bf16.mxu1 %v2562_v27  ;;  %1346 = vmatprep.mubr.bf16.mxu0 %v2138_v56  ;;  %v2615_v26 = vld [vmem:[%s3172_s2 + $0x310] sm:$0xff]  }
  0x54   : > { %1386 = vmatprep.mubr.bf16.mxu1 %v2140_v58  ;;  %v2616_v27 = vld [vmem:[%s3172_s2 + $0x390] sm:$0xff]  }
  0x55   : > { %2363 = vmatpush3.bf16.msra.mxu0 %v2563_v28  ;;  %v2617_v28 = vld [vmem:[%s3172_s2 + $0x348] sm:$0xff]  }
  0x56   : > { %2385 = vmatpush3.bf16.msra.mxu1 %v2564_v29  ;;  %2364 = vmatprep.subr.bf16.mxu0 %v2565_v30  ;;  %v2618_v29 = vld [vmem:[%s3172_s2 + $0x3c8] sm:$0xff]  }
  0x57   : > { %2386 = vmatprep.subr.bf16.mxu1 %v2566_v31  ;;  %v2619_v30 = vld [vmem:[%s3172_s2 + $0x308] sm:$0xff]   ;;  %v1463_v31 = vshll.u32 %v3049_v62, 16 }
  0x59   : > { %2365 = vmatpush3.bf16.msra.mxu0 %v2567_v32  ;;  %v2620_v32 = vld [vmem:[%s3172_s2 + $0x388] sm:$0xff]  }
  0x5a   : > { %2387 = vmatpush3.bf16.msra.mxu1 %v2568_v33  ;;  %2366 = vmatprep.subr.bf16.mxu0 %v2569_v34  ;;  %v1477_v33 = vshll.u32 %v3051_v63, 16  ;;  %v2621_v34 = vld [vmem:[%s3172_s2 + $0x340] sm:$0xff]  }
  0x5b   : > { %2388 = vmatprep.subr.bf16.mxu1 %v2570_v35  ;;  %v2622_v35 = vld [vmem:[%s3172_s2 + $0x3c0] sm:$0xff]  }
  0x5d   : > { %2367 = vmatpush3.bf16.msra.mxu0 %v2571_v36  ;;  %v1461_v36 = vshrl.u32 %v3049_v62, 16 }
  0x5e   : > { %2389 = vmatpush3.bf16.msra.mxu1 %v2572_v37  ;;  %2368 = vmatprep.subr.bf16.mxu0 %v2573_v38  ;;  %v1475_v37 = vshrl.u32 %v3051_v63, 16  ;;  %v1465_v38 = vrot.slane %v1463_v31, 1 }
  0x5f   : > { %2390 = vmatprep.subr.bf16.mxu1 %v2574_v39  ;;  %v1479_v39 = vrot.slane %v1477_v33, 1 }
  0x61   : > { %2369 = vmatpush3.bf16.msra.mxu0 %v2575_v40  ;;  %v2623_v40 = vld [vmem:[%s3172_s2 + $0x300] sm:$0xff]  }
  0x62   : > { %2391 = vmatpush3.bf16.msra.mxu1 %v2576_v41  ;;  %2370 = vmatprep.subr.bf16.mxu0 %v2577_v42  ;;  %v2624_v41 = vld [vmem:[%s3172_s2 + $0x380] sm:$0xff]   ;;  %v1466_v42 = vor.u32 %v1465_v38, %v1461_v36 }
  0x63   : > { %2392 = vmatprep.subr.bf16.mxu1 %v2578_v43  ;;  %v1480_v43 = vor.u32 %v1479_v39, %v1475_v37 }
  0x65   : > { %2371 = vmatpush3.bf16.msra.mxu0 %v2579_v44 }
  0x66   : > { %2393 = vmatpush3.bf16.msra.mxu1 %v2580_v45  ;;  %2372 = vmatprep.subr.bf16.mxu0 %v2581_v46 }
  0x67   : > { %2394 = vmatprep.subr.bf16.mxu1 %v2582_v47 }
  0x69   : > { %2373 = vmatpush3.bf16.msra.mxu0 %v2583_v48 }
  0x6a   : > { %2395 = vmatpush3.bf16.msra.mxu1 %v2584_v49  ;;  %2374 = vmatprep.subr.bf16.mxu0 %v2585_v50 }
  0x6b   : > { %2396 = vmatprep.subr.bf16.mxu1 %v2586_v51 }
  0x6d   : > { %2375 = vmatpush3.bf16.msra.mxu0 %v2587_v52 }
  0x6e   : > { %2397 = vmatpush3.bf16.msra.mxu1 %v2588_v53  ;;  %2404 = vmatprep.subr.bf16.mxu0 %v2593_v57 }
  0x6f   : > { %2426 = vmatprep.subr.bf16.mxu1 %v2594_v59 }
  0x70   : > { %1347 = vmatmul.mubr.bf16.vlgmr.msra.gmra.mxu0 %v3049_v62 }
  0x71   : > { %1387 = vmatmul.mubr.bf16.vlgmr.msra.gmra.mxu1 %v3051_v63  ;;  %2405 = vmatpush3.bf16.msra.mxu0 %v2595_v60 }
  0x72   : > { %2427 = vmatpush3.bf16.msra.mxu1 %v2596_v0  ;;  %2406 = vmatprep.subr.bf16.mxu0 %v2597_v2 }
  0x73   : > { %2428 = vmatprep.subr.bf16.mxu1 %v2598_v4  ;;  %1716 = vmatprep.mubr.bf16.mxu0 %v1473_v9 }
  0x74   : > { %1756 = vmatprep.mubr.bf16.mxu1 %v1487_v14 }
  0x75   : > { %2407 = vmatpush3.bf16.msra.mxu0 %v2599_v6 }
  0x76   : > { %2429 = vmatpush3.bf16.msra.mxu1 %v2600_v8  ;;  %2408 = vmatprep.subr.bf16.mxu0 %v2601_v10 }
  0x77   : > { %2430 = vmatprep.subr.bf16.mxu1 %v2602_v12 }
  0x79   : > { %2409 = vmatpush3.bf16.msra.mxu0 %v2603_v13 }
  0x7a   : > { %2431 = vmatpush3.bf16.msra.mxu1 %v2604_v15  ;;  %2410 = vmatprep.subr.bf16.mxu0 %v2605_v16 }
  0x7b   : > { %2432 = vmatprep.subr.bf16.mxu1 %v2606_v17 }
  0x7d   : > { %2411 = vmatpush3.bf16.msra.mxu0 %v2607_v18 }
  0x7e   : > { %2433 = vmatpush3.bf16.msra.mxu1 %v2608_v19  ;;  %2412 = vmatprep.subr.bf16.mxu0 %v2609_v20 }
  0x7f   : > { %2434 = vmatprep.subr.bf16.mxu1 %v2610_v21 }
  0x81   : > { %2413 = vmatpush3.bf16.msra.mxu0 %v2611_v22 }
  0x82   : > { %2435 = vmatpush3.bf16.msra.mxu1 %v2612_v23  ;;  %2414 = vmatprep.subr.bf16.mxu0 %v2613_v24  ;;  %v2269_v24 = vld [vmem:[%s3173_s3] ss:$0 sm:$0xff] }
  0x83   : > { %2436 = vmatprep.subr.bf16.mxu1 %v2614_v25 }
  0x85   : > { %2415 = vmatpush3.bf16.msra.mxu0 %v2615_v26 }
  0x86   : > { %2437 = vmatpush3.bf16.msra.mxu1 %v2616_v27  ;;  %2416 = vmatprep.subr.bf16.mxu0 %v2617_v28 }
  0x87   : > { %2438 = vmatprep.subr.bf16.mxu1 %v2618_v29 }
  0x89   : > { %2417 = vmatpush3.bf16.msra.mxu0 %v2619_v30 }
  0x8a   : > { %2439 = vmatpush3.bf16.msra.mxu1 %v2620_v32  ;;  %2418 = vmatprep.subr.bf16.mxu0 %v2621_v34 }
  0x8b   : > { %2440 = vmatprep.subr.bf16.mxu1 %v2622_v35 }
  0x8d   : > { %2419 = vmatpush3.bf16.msra.mxu0 %v2623_v40 }
  0x8e   : > { %2441 = vmatpush3.bf16.msra.mxu1 %v2624_v41 }
  0x90   : > { %1717 = vmatmul.mubr.bf16.vlgmr.msra.gmra.mxu0 %v1466_v42 }
  0x91   : > { %1757 = vmatmul.mubr.bf16.vlgmr.msra.gmra.mxu1 %v1480_v43 }
  0xf0   : > { %v2288_v44 = vpop.f32.mrf.mxu0 }
  0xf1   : > { %v2310_v45 = vpop.f32.mrf.mxu1 }
  0xf2   : > { %v2289_v46 = vpop.f32.mrf.mxu0 }
  0xf3   : > { %v2311_v47 = vpop.f32.mrf.mxu1  ;;  %v2290_v48 = vadd.f32 %v2289_v46, %v2288_v44 }
  0xf4   : > { %v2312_v49 = vadd.f32 %v2311_v47, %v2310_v45  ;;  %v2291_v50 = vpop.f32.mrf.mxu0 }
  0xf5   : > { %v2313_v51 = vpop.f32.mrf.mxu1 }
  0xf6   : > { %v760_v52 = vadd.f32 %v2312_v49, %v2290_v48  ;;  %v2292_v53 = vpop.f32.mrf.mxu0 }
  0xf7   : > { %v2314_v54 = vpop.f32.mrf.mxu1 }
 0x110   : > { %v2332_v55 = vpop.f32.mrf.mxu0 }
 0x111   : > { %v2354_v56 = vpop.f32.mrf.mxu1 }
 0x112   : > { %v2333_v57 = vpop.f32.mrf.mxu0 }
 0x113   : > { %v2355_v58 = vpop.f32.mrf.mxu1  ;;  %v2334_v59 = vadd.f32 %v2333_v57, %v2332_v55 }
 0x114   : > { %v2335_v60 = vpop.f32.mrf.mxu0  ;;  %v2356_v63 = vadd.f32 %v2355_v58, %v2354_v56 }
 0x115   : > { %v2357_v61 = vpop.f32.mrf.mxu1  ;;  %v996_v62 = vadd.f32 %v2334_v59, %v760_v52 }
 0x116   : > { %v2336_v0 = vpop.f32.mrf.mxu0 }
 0x117   : > { %v2358_v1 = vpop.f32.mrf.mxu1  ;;  %v1036_v2 = vadd.f32 %v2356_v63, %v996_v62 }
 0x130   : > { %v2376_v3 = vpop.f32.mrf.mxu0 }
 0x131   : > { %v2398_v4 = vpop.f32.mrf.mxu1 }
 0x132   : > { %v2377_v5 = vpop.f32.mrf.mxu0 }
 0x133   : > { %v2399_v6 = vpop.f32.mrf.mxu1  ;;  %v2378_v11 = vadd.f32 %v2377_v5, %v2376_v3 }
 0x134   : > { %v2379_v7 = vpop.f32.mrf.mxu0  ;;  %v2400_v12 = vadd.f32 %v2399_v6, %v2398_v4 }
 0x135   : > { %v2401_v8 = vpop.f32.mrf.mxu1 }
 0x136   : > { %v2380_v9 = vpop.f32.mrf.mxu0  ;;  %v1389_v15 = vadd.f32 %v2400_v12, %v2378_v11 }
 0x137   : > { %v2402_v10 = vpop.f32.mrf.mxu1 }
 0x138   : > { %v1394_v22 = vadd.f32 %v1389_v15, %v1036_v2 }
 0x150   : > { %v2420_v13 = vpop.f32.mrf.mxu0 }
 0x151   : > { %v2442_v14 = vpop.f32.mrf.mxu1 }
 0x152   : > { %v2421_v16 = vpop.f32.mrf.mxu0 }
 0x153   : > { %v2443_v17 = vpop.f32.mrf.mxu1  ;;  %v2422_v18 = vadd.f32 %v2421_v16, %v2420_v13 }
 0x154   : > { %v2444_v19 = vadd.f32 %v2443_v17, %v2442_v14  ;;  %v2423_v20 = vpop.f32.mrf.mxu0 }
 0x155   : > { %v2445_v21 = vpop.f32.mrf.mxu1 }
 0x156   : > { %v1759_v23 = vadd.f32 %v2444_v19, %v2422_v18  ;;  %v2424_v25 = vpop.f32.mrf.mxu0 }
 0x157   : > { %v2446_v26 = vpop.f32.mrf.mxu1 }
 0x158   : > { %v1764_v27 = vadd.f32 %v1759_v23, %v1394_v22 }
 0x15a   : > { %v1772_v28 = vadd.f32 %v2269_v24, %v1764_v27 }
 0x15c   : > { %v1773_v29 = vmul.f32 0.2, %v1772_v28 }
 0x15e   : > { %v1774_v30 = vmax.f32 %v1772_v28, %v1773_v29 }
 0x160   : > { %v1775_v31 = vpack.c.bf16 %v1774_v30, %v1774_v30 }
 0x162   : > { %1776 = vst [vmem:[%s318_s23] sm:$0x3] %v1775_v31 }
 0x163 PF: > { %s14_s19 = sadd.s32 1, %s2663_s19   ;;  %s3175_s15 = smov %s2655_s17 }
 0x164   : > { %p11_p9 = scmp.ge.s32.totalorder %s14_s19, 10   ;;  %s3176_s16 = smov %s2659_s18 }
 0x165   : > { %s3177_s17 = smov %s3180_s20  ;;  %s3178_s18 = smov %s3184_s21 }
 0x166   :  { %13 = sbr.rel (!%p11_p9) target bundleno = 3 (0x3), region = 78 }

</bundles_post_ra>
